<compile_context>
chip_gen: v7x
topology: tpu7x:2x2x1
jax: 0.10.0
libtpu: 0.0.40
codegen_flags: <defaults>
</compile_context>

<pallas_src>
import math

import numpy as np
import jax
import jax.numpy as jnp
from jax import lax
from jax.experimental import pallas as pl
from jax.experimental.pallas import tpu as pltpu

_BN_EPS = 1e-3   # nn.BatchNorm2d(eps=0.001)
_CPAD = 128      # padded channel width (lane dimension)


# ----------------------------------------------------------------------------
# Fused Pallas kernel: the whole Inception branch for one batch element.
# All convs are (gather-matmul -> weight-matmul) sums + bias + relu.
# ----------------------------------------------------------------------------
def _fused_branch_kernel(x_ref, w1_ref, b1_ref,
                         g2_ref, w2_ref, b2_ref,
                         g3a_ref, w3a_ref, b3a_ref,
                         g3b_ref, w3b_ref, b3b_ref,
                         oa_ref, ob_ref):
    f32 = jnp.float32

    def conv(a, g_ref, w_ref, b_ref):
        # y = relu( sum_t (G_t @ a) @ W_t + b )
        n_taps = g_ref.shape[0]
        acc = None
        for t in range(n_taps):                      # static unroll (<=4 taps)
            sel = jnp.dot(g_ref[t], a, preferred_element_type=f32)
            contrib = jnp.dot(sel, w_ref[t], preferred_element_type=f32)
            acc = contrib if acc is None else acc + contrib
        return jnp.maximum(acc + b_ref[...], 0.0)

    # branch_1: 1x1 conv (BN folded) + ReLU       -> (H*W, 128)
    a1 = jnp.dot(x_ref[...], w1_ref[0], preferred_element_type=f32) + b1_ref[...]
    a1 = jnp.maximum(a1, 0.0)
    # same_padding_1 + branch_2                    -> (H2*W2, 128)
    a2 = conv(a1, g2_ref, w2_ref, b2_ref)
    # same_padding_2 + branch_3a  /  same_padding_3 + branch_3b
    oa_ref[...] = conv(a2, g3a_ref, w3a_ref, b3a_ref)
    ob_ref[...] = conv(a2, g3b_ref, w3b_ref, b3b_ref)


# ----------------------------------------------------------------------------
# Trace-time helpers (constants: gather matrices, folded weights)
# ----------------------------------------------------------------------------
def _gather_mats(h_in, w_in, pad, ksize, stride):
    """0/1 selection matrices combining ReplicationPad2d(pad) with VALID-conv
    patch extraction.  G[t, out_row, in_row] = 1 picks the source pixel of
    tap t (t = ki*kw + kj) for each output position."""
    left, right, top, bottom = pad
    kh, kw = ksize
    sh, sw = stride
    hp, wp = h_in + top + bottom, w_in + left + right
    ho, wo = (hp - kh) // sh + 1, (wp - kw) // sw + 1
    g = np.zeros((kh * kw, ho * wo, h_in * w_in), np.float32)
    for ki in range(kh):
        for kj in range(kw):
            t = ki * kw + kj
            for oi in range(ho):
                si = min(max(oi * sh + ki - top, 0), h_in - 1)
                for oj in range(wo):
                    sj = min(max(oj * sw + kj - left, 0), w_in - 1)
                    g[t, oi * wo + oj, si * w_in + sj] = 1.0
    return jnp.asarray(g), (ho, wo)


def _pack_weights(bp, cin_pad, cout_pad=_CPAD):
    """torch (Cout,Cin,KH,KW) conv weight + BN -> per-tap (KH*KW, cin_pad,
    cout_pad) matrices with the BN scale folded in, plus (1, cout_pad) bias.
    Padded channels get zero weight / zero bias -> relu(0)=0."""
    w = bp["w"]
    Cout, Cin, KH, KW = w.shape
    scale = bp["gamma"] / jnp.sqrt(bp["var"] + _BN_EPS)
    bias = bp["beta"] - bp["mean"] * scale
    wt = jnp.transpose(w, (2, 3, 1, 0)).reshape(KH * KW, Cin, Cout)  # (taps,Cin,Cout)
    wt = wt * scale[None, None, :]
    wt = jnp.pad(wt, ((0, 0), (0, cin_pad - Cin), (0, cout_pad - Cout)))
    b = jnp.pad(bias, (0, cout_pad - Cout)).reshape(1, cout_pad)
    return wt.astype(jnp.float32), b.astype(jnp.float32)


# ----------------------------------------------------------------------------
# Module config / params (ports the PyTorch __init__ math, no torch needed)
# ----------------------------------------------------------------------------
def calc_padding(in_size, kernel_size, stride):
    if in_size[0] % stride[0] == 0:
        pad_along_height = max(kernel_size[0] - stride[0], 0)
    else:
        pad_along_height = max(kernel_size[0] - in_size[0] % stride[0], 0)
    if in_size[1] % stride[1] == 0:
        pad_along_width = max(kernel_size[1] - stride[1], 0)
    else:
        pad_along_width = max(kernel_size[1] - in_size[1] % stride[1], 0)
    pad_top = pad_along_height // 2
    pad_bottom = pad_along_height - pad_top
    pad_left = pad_along_width // 2
    pad_right = pad_along_width - pad_left
    return [pad_left, pad_right, pad_top, pad_bottom]


def build_config(kernel_size, stride, in_size):
    ks2 = (math.ceil(kernel_size[0] / 2), math.ceil(kernel_size[1] / 2))
    pad1 = [ks2[1] // 2 - 1 + ks2[1] % 2, ks2[1] // 2,
            ks2[0] // 2 - 1 + ks2[0] % 2, ks2[0] // 2]
    ks3a = (1, math.ceil(kernel_size[1] / 2))
    pad2 = calc_padding([in_size[1], in_size[2]], ks3a, stride)
    ks3b = (math.ceil(kernel_size[0] / 2), 1)
    pad3 = calc_padding([in_size[1], in_size[2]], ks3b, stride)
    return dict(ks2=ks2, ks3a=ks3a, ks3b=ks3b,
                pad1=pad1, pad2=pad2, pad3=pad3, stride=tuple(stride))


def _init_branch(key, cin, cout, kh, kw):
    kw_, kg, kb, km, kv = jax.random.split(key, 5)
    return dict(
        w=0.1 * jax.random.normal(kw_, (cout, cin, kh, kw), jnp.float32),
        gamma=1.0 + 0.1 * jax.random.normal(kg, (cout,), jnp.float32),
        beta=0.1 * jax.random.normal(kb, (cout,), jnp.float32),
        mean=0.05 * jax.random.normal(km, (cout,), jnp.float32),
        var=1.0 + 0.1 * jnp.abs(jax.random.normal(kv, (cout,), jnp.float32)),
    )


def init_params(key, in_channels, out_channels, cfg):
    k1, k2, k3, k4 = jax.random.split(key, 4)
    return dict(
        b1=_init_branch(k1, in_channels, out_channels, 1, 1),
        b2=_init_branch(k2, out_channels, out_channels, *cfg["ks2"]),
        b3a=_init_branch(k3, out_channels, out_channels, *cfg["ks3a"]),
        b3b=_init_branch(k4, out_channels, out_channels, *cfg["ks3b"]),
    )


# ----------------------------------------------------------------------------
# Forward (matches InceptionBranchFactorization1Split.forward)
# ----------------------------------------------------------------------------
def inception_branch_forward(x_nchw, params, cfg):
    N, Cin, H, W = x_nchw.shape
    Cout = params["b1"]["w"].shape[0]

    # NCHW -> rows=(H*W), lanes=channels (GEMM-friendly, channels-last)
    x = jnp.transpose(x_nchw, (0, 2, 3, 1)).reshape(N, H * W, Cin).astype(jnp.float32)

    # Trace-time constants: pad+patch gather matrices and BN-folded weights.
    g2, (h2, w2) = _gather_mats(H, W, cfg["pad1"], cfg["ks2"], (1, 1))
    g3a, (h3a, w3a) = _gather_mats(h2, w2, cfg["pad2"], cfg["ks3a"], cfg["stride"])
    g3b, (h3b, w3b) = _gather_mats(h2, w2, cfg["pad3"], cfg["ks3b"], cfg["stride"])

    w1, b1 = _pack_weights(params["b1"], Cin)
    w2w, b2v = _pack_weights(params["b2"], _CPAD)
    w3aw, b3av = _pack_weights(params["b3a"], _CPAD)
    w3bw, b3bv = _pack_weights(params["b3b"], _CPAD)

    hw0 = H * W
    hw3a, hw3b = h3a * w3a, h3b * w3b

    const3 = lambda b: (0, 0, 0)
    const2 = lambda b: (0, 0)

    oa, ob = pl.pallas_call(
        _fused_branch_kernel,
        out_shape=(jax.ShapeDtypeStruct((N, hw3a, _CPAD), jnp.float32),
                   jax.ShapeDtypeStruct((N, hw3b, _CPAD), jnp.float32)),
        grid=(N,),
        in_specs=[
            pl.BlockSpec((None, hw0, Cin), lambda b: (b, 0, 0)),
            pl.BlockSpec(w1.shape, const3),
            pl.BlockSpec(b1.shape, const2),
            pl.BlockSpec(g2.shape, const3),
            pl.BlockSpec(w2w.shape, const3),
            pl.BlockSpec(b2v.shape, const2),
            pl.BlockSpec(g3a.shape, const3),
            pl.BlockSpec(w3aw.shape, const3),
            pl.BlockSpec(b3av.shape, const2),
            pl.BlockSpec(g3b.shape, const3),
            pl.BlockSpec(w3bw.shape, const3),
            pl.BlockSpec(b3bv.shape, const2),
        ],
        out_specs=(pl.BlockSpec((None, hw3a, _CPAD), lambda b: (b, 0, 0)),
                   pl.BlockSpec((None, hw3b, _CPAD), lambda b: (b, 0, 0))),
        compiler_params=pltpu.CompilerParams(dimension_semantics=("parallel",)),
    )(x, w1, b1, g2, w2w, b2v, g3a, w3aw, b3av, g3b, w3bw, b3bv)

    # Drop the channel padding, restore NHWC spatial structure, concat, -> NCHW
    xa = oa[:, :, :Cout].reshape(N, h3a, w3a, Cout)
    xb = ob[:, :, :Cout].reshape(N, h3b, w3b, Cout)
    out = jnp.concatenate([xa, xb], axis=-1)
    return jnp.transpose(out, (0, 3, 1, 2))


# ----------------------------------------------------------------------------
# Pure-JAX reference (lax.conv) for correctness checking
# ----------------------------------------------------------------------------
def _replication_pad(x, pad):  # pad = [left, right, top, bottom] (torch order)
    left, right, top, bottom = pad
    return jnp.pad(x, ((0, 0), (top, bottom), (left, right), (0, 0)), mode="edge")


def _ref_basic_conv2d(x, bp, stride):
    w = jnp.transpose(bp["w"], (2, 3, 1, 0))                      # HWIO
    y = lax.conv_general_dilated(x, w, window_strides=stride, padding="VALID",
                                 dimension_numbers=("NHWC", "HWIO", "NHWC"))
    scale = bp["gamma"] / jnp.sqrt(bp["var"] + _BN_EPS)
    bias = bp["beta"] - bp["mean"] * scale
    return jnp.maximum(y * scale + bias, 0.0)


def _ref_forward(x_nchw, params, cfg):
    x = jnp.transpose(x_nchw, (0, 2, 3, 1)).astype(jnp.float32)
    x = _ref_basic_conv2d(x, params["b1"], (1, 1))
    x = _replication_pad(x, cfg["pad1"])
    x = _ref_basic_conv2d(x, params["b2"], (1, 1))
    xa = _ref_basic_conv2d(_replication_pad(x, cfg["pad2"]), params["b3a"], cfg["stride"])
    xb = _ref_basic_conv2d(_replication_pad(x, cfg["pad3"]), params["b3b"], cfg["stride"])
    return jnp.transpose(jnp.concatenate([xa, xb], axis=-1), (0, 3, 1, 2))


if __name__ == "__main__":
    # Module hyper-params (small, consistent with the PyTorch __init__):
    in_channels, out_channels = 4, 8
    kernel_size, stride = (3, 3), (2, 2)
    in_size = (in_channels, 16, 16)          # (C, H, W) as used by __init__

    cfg = build_config(kernel_size, stride, in_size)

    key = jax.random.PRNGKey(0)
    kx, kp = jax.random.split(key)
    x = jax.random.normal(kx, (2, in_channels, 16, 16), jnp.float32)   # NCHW
    params = init_params(kp, in_channels, out_channels, cfg)

    fwd = jax.jit(lambda xx: inception_branch_forward(xx, params, cfg))
    out = jax.block_until_ready(fwd(x))

    ref = _ref_forward(x, params, cfg)
    assert out.shape == (2, 2 * out_channels, 8, 8), out.shape
    err = float(jnp.max(jnp.abs(out - ref)))
    assert err < 2e-3, err

    print("KERNEL_OK")
</pallas_src>

<mosaic_0001>
module attributes {stable_mosaic.version = 11 : i64} {
  func.func @_fused_branch_kernel(%arg0: i32, %arg1: memref<1x256x4xf32, #tpu.memory_space<vmem>>, %arg2: memref<1x4x128xf32, #tpu.memory_space<vmem>>, %arg3: memref<1x128xf32, #tpu.memory_space<vmem>>, %arg4: memref<4x256x256xf32, #tpu.memory_space<vmem>>, %arg5: memref<4x128x128xf32, #tpu.memory_space<vmem>>, %arg6: memref<1x128xf32, #tpu.memory_space<vmem>>, %arg7: memref<2x64x256xf32, #tpu.memory_space<vmem>>, %arg8: memref<2x128x128xf32, #tpu.memory_space<vmem>>, %arg9: memref<1x128xf32, #tpu.memory_space<vmem>>, %arg10: memref<2x64x256xf32, #tpu.memory_space<vmem>>, %arg11: memref<2x128x128xf32, #tpu.memory_space<vmem>>, %arg12: memref<1x128xf32, #tpu.memory_space<vmem>>, %arg13: memref<1x64x128xf32, #tpu.memory_space<vmem>>, %arg14: memref<1x64x128xf32, #tpu.memory_space<vmem>>) attributes {dimension_semantics = [#tpu.dimension_semantics<parallel>], iteration_bounds = array<i64: 2>, scalar_prefetch = 0 : i64, scratch_operands = 0 : i64, tpu.core_type = #tpu.core_type<tc>, window_params = [{transform_indices = @transform_0, window_bounds = array<i64: 1, 256, 4>}, {pipeline_mode = #tpu.pipeline_mode<synchronous>, transform_indices = @transform_1, window_bounds = array<i64: 1, 4, 128>}, {pipeline_mode = #tpu.pipeline_mode<synchronous>, transform_indices = @transform_2, window_bounds = array<i64: 1, 128>}, {pipeline_mode = #tpu.pipeline_mode<synchronous>, transform_indices = @transform_3, window_bounds = array<i64: 4, 256, 256>}, {pipeline_mode = #tpu.pipeline_mode<synchronous>, transform_indices = @transform_4, window_bounds = array<i64: 4, 128, 128>}, {pipeline_mode = #tpu.pipeline_mode<synchronous>, transform_indices = @transform_5, window_bounds = array<i64: 1, 128>}, {pipeline_mode = #tpu.pipeline_mode<synchronous>, transform_indices = @transform_6, window_bounds = array<i64: 2, 64, 256>}, {pipeline_mode = #tpu.pipeline_mode<synchronous>, transform_indices = @transform_7, window_bounds = array<i64: 2, 128, 128>}, {pipeline_mode = #tpu.pipeline_mode<synchronous>, transform_indices = @transform_8, window_bounds = array<i64: 1, 128>}, {pipeline_mode = #tpu.pipeline_mode<synchronous>, transform_indices = @transform_9, window_bounds = array<i64: 2, 64, 256>}, {pipeline_mode = #tpu.pipeline_mode<synchronous>, transform_indices = @transform_10, window_bounds = array<i64: 2, 128, 128>}, {pipeline_mode = #tpu.pipeline_mode<synchronous>, transform_indices = @transform_11, window_bounds = array<i64: 1, 128>}, {transform_indices = @transform_12, window_bounds = array<i64: 1, 64, 128>}, {transform_indices = @transform_13, window_bounds = array<i64: 1, 64, 128>}]} {
    %c0 = arith.constant 0 : index
    %c0_0 = arith.constant 0 : index
    %c0_1 = arith.constant 0 : index
    %0 = vector.load %arg1[%c0, %c0_0, %c0_1] : memref<1x256x4xf32, #tpu.memory_space<vmem>>, vector<1x256x4xf32>
    %1 = vector.shape_cast %0 : vector<1x256x4xf32> to vector<256x4xf32>
    %c0_2 = arith.constant 0 : index
    %c0_3 = arith.constant 0 : index
    %c0_4 = arith.constant 0 : index
    %2 = vector.load %arg2[%c0_2, %c0_3, %c0_4] : memref<1x4x128xf32, #tpu.memory_space<vmem>>, vector<1x4x128xf32>
    %3 = vector.shape_cast %2 : vector<1x4x128xf32> to vector<4x128xf32>
    %cst = arith.constant dense<0.000000e+00> : vector<256x128xf32>
    %4 = tpu.matmul %1, %3, %cst {dimension_numbers = #tpu.dot_dimension_numbers<[1], [0], [0], [1], [0, 0, 1, 1], [], []>} : vector<256x4xf32>, vector<4x128xf32>, vector<256x128xf32> -> vector<256x128xf32>
    %c0_5 = arith.constant 0 : index
    %c0_6 = arith.constant 0 : index
    %5 = vector.load %arg3[%c0_5, %c0_6] : memref<1x128xf32, #tpu.memory_space<vmem>>, vector<1x128xf32>
    %6 = vector.broadcast %5 : vector<1x128xf32> to vector<256x128xf32>
    %7 = arith.addf %4, %6 : vector<256x128xf32>
    %cst_7 = arith.constant 0.000000e+00 : f32
    %8 = vector.broadcast %cst_7 : f32 to vector<256x128xf32>
    %9 = arith.maximumf %7, %8 : vector<256x128xf32>
    %c0_8 = arith.constant 0 : index
    %c0_9 = arith.constant 0 : index
    %c0_10 = arith.constant 0 : index
    %10 = vector.load %arg4[%c0_8, %c0_9, %c0_10] : memref<4x256x256xf32, #tpu.memory_space<vmem>>, vector<1x256x256xf32>
    %11 = vector.shape_cast %10 : vector<1x256x256xf32> to vector<256x256xf32>
    %cst_11 = arith.constant dense<0.000000e+00> : vector<256x128xf32>
    %12 = tpu.matmul %11, %9, %cst_11 {dimension_numbers = #tpu.dot_dimension_numbers<[1], [0], [0], [1], [0, 0, 1, 1], [], []>} : vector<256x256xf32>, vector<256x128xf32>, vector<256x128xf32> -> vector<256x128xf32>
    %c0_12 = arith.constant 0 : index
    %c0_13 = arith.constant 0 : index
    %c0_14 = arith.constant 0 : index
    %13 = vector.load %arg5[%c0_12, %c0_13, %c0_14] : memref<4x128x128xf32, #tpu.memory_space<vmem>>, vector<1x128x128xf32>
    %14 = vector.shape_cast %13 : vector<1x128x128xf32> to vector<128x128xf32>
    %cst_15 = arith.constant dense<0.000000e+00> : vector<256x128xf32>
    %15 = tpu.matmul %12, %14, %cst_15 {dimension_numbers = #tpu.dot_dimension_numbers<[1], [0], [0], [1], [0, 0, 1, 1], [], []>} : vector<256x128xf32>, vector<128x128xf32>, vector<256x128xf32> -> vector<256x128xf32>
    %c1 = arith.constant 1 : index
    %c0_16 = arith.constant 0 : index
    %c0_17 = arith.constant 0 : index
    %16 = vector.load %arg4[%c1, %c0_16, %c0_17] : memref<4x256x256xf32, #tpu.memory_space<vmem>>, vector<1x256x256xf32>
    %17 = vector.shape_cast %16 : vector<1x256x256xf32> to vector<256x256xf32>
    %cst_18 = arith.constant dense<0.000000e+00> : vector<256x128xf32>
    %18 = tpu.matmul %17, %9, %cst_18 {dimension_numbers = #tpu.dot_dimension_numbers<[1], [0], [0], [1], [0, 0, 1, 1], [], []>} : vector<256x256xf32>, vector<256x128xf32>, vector<256x128xf32> -> vector<256x128xf32>
    %c1_19 = arith.constant 1 : index
    %c0_20 = arith.constant 0 : index
    %c0_21 = arith.constant 0 : index
    %19 = vector.load %arg5[%c1_19, %c0_20, %c0_21] : memref<4x128x128xf32, #tpu.memory_space<vmem>>, vector<1x128x128xf32>
    %20 = vector.shape_cast %19 : vector<1x128x128xf32> to vector<128x128xf32>
    %cst_22 = arith.constant dense<0.000000e+00> : vector<256x128xf32>
    %21 = tpu.matmul %18, %20, %cst_22 {dimension_numbers = #tpu.dot_dimension_numbers<[1], [0], [0], [1], [0, 0, 1, 1], [], []>} : vector<256x128xf32>, vector<128x128xf32>, vector<256x128xf32> -> vector<256x128xf32>
    %22 = arith.addf %15, %21 : vector<256x128xf32>
    %c2 = arith.constant 2 : index
    %c0_23 = arith.constant 0 : index
    %c0_24 = arith.constant 0 : index
    %23 = vector.load %arg4[%c2, %c0_23, %c0_24] : memref<4x256x256xf32, #tpu.memory_space<vmem>>, vector<1x256x256xf32>
    %24 = vector.shape_cast %23 : vector<1x256x256xf32> to vector<256x256xf32>
    %cst_25 = arith.constant dense<0.000000e+00> : vector<256x128xf32>
    %25 = tpu.matmul %24, %9, %cst_25 {dimension_numbers = #tpu.dot_dimension_numbers<[1], [0], [0], [1], [0, 0, 1, 1], [], []>} : vector<256x256xf32>, vector<256x128xf32>, vector<256x128xf32> -> vector<256x128xf32>
    %c2_26 = arith.constant 2 : index
    %c0_27 = arith.constant 0 : index
    %c0_28 = arith.constant 0 : index
    %26 = vector.load %arg5[%c2_26, %c0_27, %c0_28] : memref<4x128x128xf32, #tpu.memory_space<vmem>>, vector<1x128x128xf32>
    %27 = vector.shape_cast %26 : vector<1x128x128xf32> to vector<128x128xf32>
    %cst_29 = arith.constant dense<0.000000e+00> : vector<256x128xf32>
    %28 = tpu.matmul %25, %27, %cst_29 {dimension_numbers = #tpu.dot_dimension_numbers<[1], [0], [0], [1], [0, 0, 1, 1], [], []>} : vector<256x128xf32>, vector<128x128xf32>, vector<256x128xf32> -> vector<256x128xf32>
    %29 = arith.addf %22, %28 : vector<256x128xf32>
    %c3 = arith.constant 3 : index
    %c0_30 = arith.constant 0 : index
    %c0_31 = arith.constant 0 : index
    %30 = vector.load %arg4[%c3, %c0_30, %c0_31] : memref<4x256x256xf32, #tpu.memory_space<vmem>>, vector<1x256x256xf32>
    %31 = vector.shape_cast %30 : vector<1x256x256xf32> to vector<256x256xf32>
    %cst_32 = arith.constant dense<0.000000e+00> : vector<256x128xf32>
    %32 = tpu.matmul %31, %9, %cst_32 {dimension_numbers = #tpu.dot_dimension_numbers<[1], [0], [0], [1], [0, 0, 1, 1], [], []>} : vector<256x256xf32>, vector<256x128xf32>, vector<256x128xf32> -> vector<256x128xf32>
    %c3_33 = arith.constant 3 : index
    %c0_34 = arith.constant 0 : index
    %c0_35 = arith.constant 0 : index
    %33 = vector.load %arg5[%c3_33, %c0_34, %c0_35] : memref<4x128x128xf32, #tpu.memory_space<vmem>>, vector<1x128x128xf32>
    %34 = vector.shape_cast %33 : vector<1x128x128xf32> to vector<128x128xf32>
    %cst_36 = arith.constant dense<0.000000e+00> : vector<256x128xf32>
    %35 = tpu.matmul %32, %34, %cst_36 {dimension_numbers = #tpu.dot_dimension_numbers<[1], [0], [0], [1], [0, 0, 1, 1], [], []>} : vector<256x128xf32>, vector<128x128xf32>, vector<256x128xf32> -> vector<256x128xf32>
    %36 = arith.addf %29, %35 : vector<256x128xf32>
    %c0_37 = arith.constant 0 : index
    %c0_38 = arith.constant 0 : index
    %37 = vector.load %arg6[%c0_37, %c0_38] : memref<1x128xf32, #tpu.memory_space<vmem>>, vector<1x128xf32>
    %38 = vector.broadcast %37 : vector<1x128xf32> to vector<256x128xf32>
    %39 = arith.addf %36, %38 : vector<256x128xf32>
    %cst_39 = arith.constant 0.000000e+00 : f32
    %40 = vector.broadcast %cst_39 : f32 to vector<256x128xf32>
    %41 = arith.maximumf %39, %40 : vector<256x128xf32>
    %c0_40 = arith.constant 0 : index
    %c0_41 = arith.constant 0 : index
    %c0_42 = arith.constant 0 : index
    %42 = vector.load %arg7[%c0_40, %c0_41, %c0_42] : memref<2x64x256xf32, #tpu.memory_space<vmem>>, vector<1x64x256xf32>
    %43 = vector.shape_cast %42 : vector<1x64x256xf32> to vector<64x256xf32>
    %cst_43 = arith.constant dense<0.000000e+00> : vector<64x128xf32>
    %44 = tpu.matmul %43, %41, %cst_43 {dimension_numbers = #tpu.dot_dimension_numbers<[1], [0], [0], [1], [0, 0, 1, 1], [], []>} : vector<64x256xf32>, vector<256x128xf32>, vector<64x128xf32> -> vector<64x128xf32>
    %c0_44 = arith.constant 0 : index
    %c0_45 = arith.constant 0 : index
    %c0_46 = arith.constant 0 : index
    %45 = vector.load %arg8[%c0_44, %c0_45, %c0_46] : memref<2x128x128xf32, #tpu.memory_space<vmem>>, vector<1x128x128xf32>
    %46 = vector.shape_cast %45 : vector<1x128x128xf32> to vector<128x128xf32>
    %cst_47 = arith.constant dense<0.000000e+00> : vector<64x128xf32>
    %47 = tpu.matmul %44, %46, %cst_47 {dimension_numbers = #tpu.dot_dimension_numbers<[1], [0], [0], [1], [0, 0, 1, 1], [], []>} : vector<64x128xf32>, vector<128x128xf32>, vector<64x128xf32> -> vector<64x128xf32>
    %c1_48 = arith.constant 1 : index
    %c0_49 = arith.constant 0 : index
    %c0_50 = arith.constant 0 : index
    %48 = vector.load %arg7[%c1_48, %c0_49, %c0_50] : memref<2x64x256xf32, #tpu.memory_space<vmem>>, vector<1x64x256xf32>
    %49 = vector.shape_cast %48 : vector<1x64x256xf32> to vector<64x256xf32>
    %cst_51 = arith.constant dense<0.000000e+00> : vector<64x128xf32>
    %50 = tpu.matmul %49, %41, %cst_51 {dimension_numbers = #tpu.dot_dimension_numbers<[1], [0], [0], [1], [0, 0, 1, 1], [], []>} : vector<64x256xf32>, vector<256x128xf32>, vector<64x128xf32> -> vector<64x128xf32>
    %c1_52 = arith.constant 1 : index
    %c0_53 = arith.constant 0 : index
    %c0_54 = arith.constant 0 : index
    %51 = vector.load %arg8[%c1_52, %c0_53, %c0_54] : memref<2x128x128xf32, #tpu.memory_space<vmem>>, vector<1x128x128xf32>
    %52 = vector.shape_cast %51 : vector<1x128x128xf32> to vector<128x128xf32>
    %cst_55 = arith.constant dense<0.000000e+00> : vector<64x128xf32>
    %53 = tpu.matmul %50, %52, %cst_55 {dimension_numbers = #tpu.dot_dimension_numbers<[1], [0], [0], [1], [0, 0, 1, 1], [], []>} : vector<64x128xf32>, vector<128x128xf32>, vector<64x128xf32> -> vector<64x128xf32>
    %54 = arith.addf %47, %53 : vector<64x128xf32>
    %c0_56 = arith.constant 0 : index
    %c0_57 = arith.constant 0 : index
    %55 = vector.load %arg9[%c0_56, %c0_57] : memref<1x128xf32, #tpu.memory_space<vmem>>, vector<1x128xf32>
    %56 = vector.broadcast %55 : vector<1x128xf32> to vector<64x128xf32>
    %57 = arith.addf %54, %56 : vector<64x128xf32>
    %cst_58 = arith.constant 0.000000e+00 : f32
    %58 = vector.broadcast %cst_58 : f32 to vector<64x128xf32>
    %59 = arith.maximumf %57, %58 : vector<64x128xf32>
    %c0_59 = arith.constant 0 : index
    %c0_60 = arith.constant 0 : index
    %c0_61 = arith.constant 0 : index
    %60 = vector.load %arg13[%c0_59, %c0_60, %c0_61] : memref<1x64x128xf32, #tpu.memory_space<vmem>>, vector<1x64x128xf32>
    %61 = vector.shape_cast %60 : vector<1x64x128xf32> to vector<64x128xf32>
    %62 = vector.shape_cast %59 : vector<64x128xf32> to vector<1x64x128xf32>
    tpu.vector_store %arg13[%c0_59, %c0_60, %c0_61], %62 {strides = array<i32>} : memref<1x64x128xf32, #tpu.memory_space<vmem>>, vector<1x64x128xf32>,
    %c0_62 = arith.constant 0 : index
    %c0_63 = arith.constant 0 : index
    %c0_64 = arith.constant 0 : index
    %63 = vector.load %arg10[%c0_62, %c0_63, %c0_64] : memref<2x64x256xf32, #tpu.memory_space<vmem>>, vector<1x64x256xf32>
    %64 = vector.shape_cast %63 : vector<1x64x256xf32> to vector<64x256xf32>
    %cst_65 = arith.constant dense<0.000000e+00> : vector<64x128xf32>
    %65 = tpu.matmul %64, %41, %cst_65 {dimension_numbers = #tpu.dot_dimension_numbers<[1], [0], [0], [1], [0, 0, 1, 1], [], []>} : vector<64x256xf32>, vector<256x128xf32>, vector<64x128xf32> -> vector<64x128xf32>
    %c0_66 = arith.constant 0 : index
    %c0_67 = arith.constant 0 : index
    %c0_68 = arith.constant 0 : index
    %66 = vector.load %arg11[%c0_66, %c0_67, %c0_68] : memref<2x128x128xf32, #tpu.memory_space<vmem>>, vector<1x128x128xf32>
    %67 = vector.shape_cast %66 : vector<1x128x128xf32> to vector<128x128xf32>
    %cst_69 = arith.constant dense<0.000000e+00> : vector<64x128xf32>
    %68 = tpu.matmul %65, %67, %cst_69 {dimension_numbers = #tpu.dot_dimension_numbers<[1], [0], [0], [1], [0, 0, 1, 1], [], []>} : vector<64x128xf32>, vector<128x128xf32>, vector<64x128xf32> -> vector<64x128xf32>
    %c1_70 = arith.constant 1 : index
    %c0_71 = arith.constant 0 : index
    %c0_72 = arith.constant 0 : index
    %69 = vector.load %arg10[%c1_70, %c0_71, %c0_72] : memref<2x64x256xf32, #tpu.memory_space<vmem>>, vector<1x64x256xf32>
    %70 = vector.shape_cast %69 : vector<1x64x256xf32> to vector<64x256xf32>
    %cst_73 = arith.constant dense<0.000000e+00> : vector<64x128xf32>
    %71 = tpu.matmul %70, %41, %cst_73 {dimension_numbers = #tpu.dot_dimension_numbers<[1], [0], [0], [1], [0, 0, 1, 1], [], []>} : vector<64x256xf32>, vector<256x128xf32>, vector<64x128xf32> -> vector<64x128xf32>
    %c1_74 = arith.constant 1 : index
    %c0_75 = arith.constant 0 : index
    %c0_76 = arith.constant 0 : index
    %72 = vector.load %arg11[%c1_74, %c0_75, %c0_76] : memref<2x128x128xf32, #tpu.memory_space<vmem>>, vector<1x128x128xf32>
    %73 = vector.shape_cast %72 : vector<1x128x128xf32> to vector<128x128xf32>
    %cst_77 = arith.constant dense<0.000000e+00> : vector<64x128xf32>
    %74 = tpu.matmul %71, %73, %cst_77 {dimension_numbers = #tpu.dot_dimension_numbers<[1], [0], [0], [1], [0, 0, 1, 1], [], []>} : vector<64x128xf32>, vector<128x128xf32>, vector<64x128xf32> -> vector<64x128xf32>
    %75 = arith.addf %68, %74 : vector<64x128xf32>
    %c0_78 = arith.constant 0 : index
    %c0_79 = arith.constant 0 : index
    %76 = vector.load %arg12[%c0_78, %c0_79] : memref<1x128xf32, #tpu.memory_space<vmem>>, vector<1x128xf32>
    %77 = vector.broadcast %76 : vector<1x128xf32> to vector<64x128xf32>
    %78 = arith.addf %75, %77 : vector<64x128xf32>
    %cst_80 = arith.constant 0.000000e+00 : f32
    %79 = vector.broadcast %cst_80 : f32 to vector<64x128xf32>
    %80 = arith.maximumf %78, %79 : vector<64x128xf32>
    %c0_81 = arith.constant 0 : index
    %c0_82 = arith.constant 0 : index
    %c0_83 = arith.constant 0 : index
    %81 = vector.load %arg14[%c0_81, %c0_82, %c0_83] : memref<1x64x128xf32, #tpu.memory_space<vmem>>, vector<1x64x128xf32>
    %82 = vector.shape_cast %81 : vector<1x64x128xf32> to vector<64x128xf32>
    %83 = vector.shape_cast %80 : vector<64x128xf32> to vector<1x64x128xf32>
    tpu.vector_store %arg14[%c0_81, %c0_82, %c0_83], %83 {strides = array<i32>} : memref<1x64x128xf32, #tpu.memory_space<vmem>>, vector<1x64x128xf32>,
    return
  }
  func.func @transform_0(%arg0: i32) -> (i32, i32, i32) {
    %c0_i32 = arith.constant 0 : i32
    %c0_i32_0 = arith.constant 0 : i32
    %c0_i32_1 = arith.constant 0 : i32
    return %arg0, %c0_i32, %c0_i32_0 : i32, i32, i32
  }
  func.func @transform_1(%arg0: i32) -> (i32, i32, i32) {
    %c0_i32 = arith.constant 0 : i32
    %c0_i32_0 = arith.constant 0 : i32
    %c0_i32_1 = arith.constant 0 : i32
    %c0_i32_2 = arith.constant 0 : i32
    return %c0_i32, %c0_i32_0, %c0_i32_1 : i32, i32, i32
  }
  func.func @transform_2(%arg0: i32) -> (i32, i32) {
    %c0_i32 = arith.constant 0 : i32
    %c0_i32_0 = arith.constant 0 : i32
    %c0_i32_1 = arith.constant 0 : i32
    return %c0_i32, %c0_i32_0 : i32, i32
  }
  func.func @transform_3(%arg0: i32) -> (i32, i32, i32) {
    %c0_i32 = arith.constant 0 : i32
    %c0_i32_0 = arith.constant 0 : i32
    %c0_i32_1 = arith.constant 0 : i32
    %c0_i32_2 = arith.constant 0 : i32
    return %c0_i32, %c0_i32_0, %c0_i32_1 : i32, i32, i32
  }
  func.func @transform_4(%arg0: i32) -> (i32, i32, i32) {
    %c0_i32 = arith.constant 0 : i32
    %c0_i32_0 = arith.constant 0 : i32
    %c0_i32_1 = arith.constant 0 : i32
    %c0_i32_2 = arith.constant 0 : i32
    return %c0_i32, %c0_i32_0, %c0_i32_1 : i32, i32, i32
  }
  func.func @transform_5(%arg0: i32) -> (i32, i32) {
    %c0_i32 = arith.constant 0 : i32
    %c0_i32_0 = arith.constant 0 : i32
    %c0_i32_1 = arith.constant 0 : i32
    return %c0_i32, %c0_i32_0 : i32, i32
  }
  func.func @transform_6(%arg0: i32) -> (i32, i32, i32) {
    %c0_i32 = arith.constant 0 : i32
    %c0_i32_0 = arith.constant 0 : i32
    %c0_i32_1 = arith.constant 0 : i32
    %c0_i32_2 = arith.constant 0 : i32
    return %c0_i32, %c0_i32_0, %c0_i32_1 : i32, i32, i32
  }
  func.func @transform_7(%arg0: i32) -> (i32, i32, i32) {
    %c0_i32 = arith.constant 0 : i32
    %c0_i32_0 = arith.constant 0 : i32
    %c0_i32_1 = arith.constant 0 : i32
    %c0_i32_2 = arith.constant 0 : i32
    return %c0_i32, %c0_i32_0, %c0_i32_1 : i32, i32, i32
  }
  func.func @transform_8(%arg0: i32) -> (i32, i32) {
    %c0_i32 = arith.constant 0 : i32
    %c0_i32_0 = arith.constant 0 : i32
    %c0_i32_1 = arith.constant 0 : i32
    return %c0_i32, %c0_i32_0 : i32, i32
  }
  func.func @transform_9(%arg0: i32) -> (i32, i32, i32) {
    %c0_i32 = arith.constant 0 : i32
    %c0_i32_0 = arith.constant 0 : i32
    %c0_i32_1 = arith.constant 0 : i32
    %c0_i32_2 = arith.constant 0 : i32
    return %c0_i32, %c0_i32_0, %c0_i32_1 : i32, i32, i32
  }
  func.func @transform_10(%arg0: i32) -> (i32, i32, i32) {
    %c0_i32 = arith.constant 0 : i32
    %c0_i32_0 = arith.constant 0 : i32
    %c0_i32_1 = arith.constant 0 : i32
    %c0_i32_2 = arith.constant 0 : i32
    return %c0_i32, %c0_i32_0, %c0_i32_1 : i32, i32, i32
  }
  func.func @transform_11(%arg0: i32) -> (i32, i32) {
    %c0_i32 = arith.constant 0 : i32
    %c0_i32_0 = arith.constant 0 : i32
    %c0_i32_1 = arith.constant 0 : i32
    return %c0_i32, %c0_i32_0 : i32, i32
  }
  func.func @transform_12(%arg0: i32) -> (i32, i32, i32) {
    %c0_i32 = arith.constant 0 : i32
    %c0_i32_0 = arith.constant 0 : i32
    %c0_i32_1 = arith.constant 0 : i32
    return %arg0, %c0_i32, %c0_i32_0 : i32, i32, i32
  }
  func.func @transform_13(%arg0: i32) -> (i32, i32, i32) {
    %c0_i32 = arith.constant 0 : i32
    %c0_i32_0 = arith.constant 0 : i32
    %c0_i32_1 = arith.constant 0 : i32
    return %arg0, %c0_i32, %c0_i32_0 : i32, i32, i32
  }
}

</mosaic_0001>

<bundles_post_ra>
// kernel: _lambda_.1
= control target key start
LH: loop header
LB: loop body
LE: loop exit
PB: predicated region body
PF: predicated region fallthrough
CT: control target
= control target key end

     0   :  { %s7520_s0 = inlined_call_operand.vmem [shape: f32[2,256,4], index: 0, kind: input, shape index: {}]   ;;  %s7521_s1 = inlined_call_operand.vmem [shape: f32[1,4,128], index: 1, kind: input, shape index: {}]   ;;  %s7522_s2 = inlined_call_operand.vmem [shape: f32[1,128], index: 2, kind: input, shape index: {}]   ;;  %s7523_s3 = inlined_call_operand.hbm [shape: f32[4,256,256], index: 3, kind: input, shape index: {}]   ;;  %s7524_s4 = inlined_call_operand.vmem [shape: f32[4,128,128], index: 4, kind: input, shape index: {}]   ;;  %s7525_s5 = inlined_call_operand.vmem [shape: f32[1,128], index: 5, kind: input, shape index: {}]   ;;  %s7526_s6 = inlined_call_operand.hbm [shape: f32[2,64,256], index: 6, kind: input, shape index: {}]   ;;  %s7527_s7 = inlined_call_operand.hbm [shape: f32[2,128,128], index: 7, kind: input, shape index: {}]   ;;  %s7528_s8 = inlined_call_operand.vmem [shape: f32[1,128], index: 8, kind: input, shape index: {}]   ;;  %s7529_s9 = inlined_call_operand.hbm [shape: f32[2,64,256], index: 9, kind: input, shape index: {}]   ;;  %s7530_s10 = inlined_call_operand.hbm [shape: f32[2,128,128], index: 10, kind: input, shape index: {}]   ;;  %s7531_s11 = inlined_call_operand.vmem [shape: f32[1,128], index: 11, kind: input, shape index: {}]   ;;  %s7532_s12 = inlined_call_operand.vmem [shape: f32[2,64,128], index: 12, kind: output, shape index: {0}]   ;;  %s7533_s13 = inlined_call_operand.vmem [shape: f32[2,64,128], index: 13, kind: output, shape index: {1}]  }
   0x1   :  { %7537 = sst [smem:[#allocation14_spill]] %s7531_s11 }
   0x2   :  { %7538 = sst [smem:[#allocation15_spill]] %s7533_s13 }
   0x3   :  { %19 = vsyncpa [#allocation3], 0 }
   0x4   :  { %20 = vsyncpa [#allocation5], 0 }
   0x5   :  { %21 = vsyncpa [#allocation8], 0  ;;  %s6552_s25 = smov 0  }
   0x6 LB: > { %7539 = sst [smem:[#allocation13_spill]] %s6470_s25  ;;  %s6558_s26 = sadd.s32 4294967295, %s6470_s25   ;;  %s6470_s25 = sphi %s6552_s25, %s27_s25  }
   0x7   : > { %p4360_p0 = scmp.ge.s32.totalorder %s6470_s25, 1  ;;  %p341_p1 = scmp.lt.s32.totalorder %s6470_s25, 3 }
   0x8   : > { %p7535_p2 = scmp.eq.s32.totalorder %s6558_s26, 0  ;;  %s6472_s28 = smov [#allocation4]  }
   0x9   : > { %p6563_p3 = pnand %p4360_p0, %p341_p1  ;;  %s378_s29 = sshll.u32 %s6472_s28, 4  ;;  %s6567_s29 = int_to_ptr.vmem [resolvable:$true] %s378_s29 }
   0xa   : > { %s6473_s30 = smov [#allocation7]   ;;  %s6474_s16 = smov [#allocation2]  }
   0xb   : > { %s7540_s27 = scalar_select %p6563_p3, 1, 0 }
   0xc   : > { %p6268_p4 = pneg %p6563_p3  ;;  %s407_s14 = sshll.u32 %s6473_s30, 4  ;;  %s6571_s14 = int_to_ptr.vmem [resolvable:$true] %s407_s14 }
   0xd   : > { %s359_s17 = sshll.u32 %s6474_s16, 4  ;;  %s6475_s18 = smov [#allocation6]   ;;  %s6579_s17 = int_to_ptr.vmem [resolvable:$true] %s359_s17 }
   0xe   : > { %p6575_p5 = pnand %p7535_p2, %p6268_p4  ;;  %s6581_s19 = sshll.u32 %s6475_s18, 4  ;;  %s392_s19 = int_to_ptr.vmem [resolvable:$true] %s6581_s19 }
   0xf   : > { %s6312_s22 = scalar_lea.hbm %s7526_s6, 4096 }
  0x10   : > { %p6313_p6 = scmp.ne.s32.totalorder %s7526_s6, %s6312_s22  ;;  %p6591_p7 = pneg %p6575_p5 }
  0x11   : > { %p6319_p10 = scmp.lt.u32.totalorder %s6312_s22, %s7526_s6 }
  0x12   : > { %p6315_p8 = pnand %p6591_p7, %p6313_p6 }
  0x14   : > { %p6316_p9 = pneg %p6315_p8 }
  0x16   : > { %p6321_p11 = pnand %p6319_p10, %p6316_p9 }
  0x18   : > { %6324 = shalt.err (!%p6321_p11)
}
  0x19   : > { %s6325_s18 = scalar_lea.vmem %s6567_s29, 4096  ;;  %p6333_p1 = scmp.lt.s32.totalorder %s6567_s29, %s6567_s29 }
  0x1a   : > { %p6326_p12 = scmp.ne.s32.totalorder %s6567_s29, %s6325_s18  ;;  %p6334_p4 = scmp.lt.s32.totalorder %s6325_s18, %s6325_s18 }
  0x1c   : > { %p6328_p13 = pnand %p6326_p12, %p6591_p7  ;;  %p6335_p6 = por %p6334_p4, %p6333_p1 }
  0x1e   : > { %p6329_p0 = pneg %p6328_p13 }
  0x20   : > { %p6336_p8 = pnand %p6335_p6, %p6329_p0 }
  0x22   : > { %6339 = shalt.err (!%p6336_p8)
}
  0x23   : > { %s6476_s20 = smov 256   ;;  %s6477_s21 = smov 16  }
  0x24   : > { %6274 = dma.hbm_to_vmem [thread:$0]  (!%p6575_p5), %s7526_s6, 4096, %s6567_s29, [#allocation5], %s6476_s20, %s6476_s20, %s6477_s21  }
  0x25   : > { %s6340_s16 = scalar_lea.hbm %s7529_s9, 4096 }
  0x26   : > { %p6341_p9 = scmp.ne.s32.totalorder %s7529_s9, %s6340_s16  ;;  %p6347_p12 = scmp.lt.u32.totalorder %s6340_s16, %s7529_s9 }
  0x28   : > { %p6343_p10 = pnand %p6341_p9, %p6591_p7 }
  0x2a   : > { %p6344_p11 = pneg %p6343_p10 }
  0x2c   : > { %p6349_p13 = pnand %p6347_p12, %p6344_p11 }
  0x2e   : > { %6352 = shalt.err (!%p6349_p13)
}
  0x2f   : > { %s6353_s29 = scalar_lea.vmem %s6571_s14, 4096  ;;  %p6361_p6 = scmp.lt.s32.totalorder %s6571_s14, %s6571_s14 }
  0x30   : > { %p6354_p0 = scmp.ne.s32.totalorder %s6571_s14, %s6353_s29  ;;  %p6362_p8 = scmp.lt.s32.totalorder %s6353_s29, %s6353_s29 }
  0x32   : > { %p6356_p1 = pnand %p6354_p0, %p6591_p7  ;;  %p6363_p9 = por %p6362_p8, %p6361_p6 }
  0x34   : > { %p6357_p4 = pneg %p6356_p1 }
  0x36   : > { %p6364_p10 = pnand %p6363_p9, %p6357_p4 }
  0x38   : > { %6367 = shalt.err (!%p6364_p10)
}
  0x39   : > { %6280 = dma.hbm_to_vmem [thread:$0]  (!%p6575_p5), %s7529_s9, 4096, %s6571_s14, [#allocation8], %s6476_s20, %s6476_s20, %s6477_s21  }
  0x3a   : > { %s6368_s23 = scalar_lea.hbm %s7523_s3, 32768 }
  0x3b   : > { %p6369_p11 = scmp.ne.s32.totalorder %s7523_s3, %s6368_s23  ;;  %p6375_p0 = scmp.lt.u32.totalorder %s6368_s23, %s7523_s3 }
  0x3d   : > { %p6371_p12 = pnand %p6369_p11, %p6591_p7 }
  0x3f   : > { %p6372_p13 = pneg %p6371_p12 }
  0x41   : > { %p6377_p1 = pnand %p6375_p0, %p6372_p13 }
  0x43   : > { %6380 = shalt.err (!%p6377_p1)
}
  0x44   : > { %s6381_s14 = scalar_lea.vmem %s6579_s17, 32768  ;;  %p6389_p9 = scmp.lt.s32.totalorder %s6579_s17, %s6579_s17 }
  0x45   : > { %p6382_p4 = scmp.ne.s32.totalorder %s6579_s17, %s6381_s14  ;;  %p6390_p10 = scmp.lt.s32.totalorder %s6381_s14, %s6381_s14 }
  0x47   : > { %p6384_p6 = pnand %p6382_p4, %p6591_p7  ;;  %p6391_p11 = por %p6390_p10, %p6389_p9 }
  0x49   : > { %p6385_p8 = pneg %p6384_p6 }
  0x4b   : > { %p6392_p12 = pnand %p6391_p11, %p6385_p8 }
  0x4d   : > { %6395 = shalt.err (!%p6392_p12)
}
  0x4e   : > { %6271 = dma.hbm_to_vmem [thread:$0]  (!%p6575_p5), %s7523_s3, 32768, %s6579_s17, [#allocation3], %s6476_s20, %s6476_s20, %s6477_s21  }
  0x4f   : > { %s6396_s22 = scalar_lea.hbm %s7527_s7, 4096 }
  0x50   : > { %p6397_p13 = scmp.ne.s32.totalorder %s7527_s7, %s6396_s22  ;;  %p6403_p4 = scmp.lt.u32.totalorder %s6396_s22, %s7527_s7 }
  0x52   : > { %p6399_p0 = pnand %p6397_p13, %p6591_p7 }
  0x54   : > { %p6400_p1 = pneg %p6399_p0 }
  0x56   : > { %p6405_p6 = pnand %p6403_p4, %p6400_p1 }
  0x58   : > { %6408 = shalt.err (!%p6405_p6)
}
  0x59   : > { %s6409_s18 = scalar_lea.vmem %s392_s19, 4096  ;;  %p6417_p11 = scmp.lt.s32.totalorder %s392_s19, %s392_s19 }
  0x5a   : > { %p6410_p8 = scmp.ne.s32.totalorder %s392_s19, %s6409_s18  ;;  %p6418_p12 = scmp.lt.s32.totalorder %s6409_s18, %s6409_s18 }
  0x5c   : > { %p6412_p9 = pnand %p6410_p8, %p6591_p7  ;;  %p6419_p2 = por %p6418_p12, %p6417_p11 }
  0x5e   : > { %p6413_p10 = pneg %p6412_p9 }
  0x60   : > { %p6420_p3 = pnand %p6419_p2, %p6413_p10 }
  0x62   : > { %6423 = shalt.err (!%p6420_p3)
}
  0x63   : > { %s6478_s17 = smov 128   ;;  %s6479_s20 = smov 8  }
  0x64   : > { %6277 = dma.hbm_to_vmem [thread:$0]  (!%p6575_p5), %s7527_s7, 4096, %s392_s19, [#allocation5], %s6478_s17, %s6478_s17, %s6479_s20  }
  0x65   : > { %s6480_s29 = smov [#allocation9]   ;;  %s6424_s22 = scalar_lea.hbm %s7530_s10, 4096 }
  0x66   : > { %s420_s11 = sshll.u32 %s6480_s29, 4  ;;  %p6425_p2 = scmp.ne.s32.totalorder %s7530_s10, %s6424_s22  ;;  %s421_s11 = int_to_ptr.vmem [resolvable:$true] %s420_s11 }
  0x67   : > { %p6431_p0 = scmp.lt.u32.totalorder %s6424_s22, %s7530_s10 }
  0x68   : > { %p6427_p3 = pnand %p6425_p2, %p6591_p7 }
  0x6a   : > { %p6428_p13 = pneg %p6427_p3 }
  0x6c   : > { %p6433_p1 = pnand %p6431_p0, %p6428_p13 }
  0x6e   : > { %6436 = shalt.err (!%p6433_p1)
}
  0x6f   : > { %s6437_s19 = scalar_lea.vmem %s421_s11, 4096  ;;  %p6445_p9 = scmp.lt.s32.totalorder %s421_s11, %s421_s11 }
  0x70   : > { %p6438_p4 = scmp.ne.s32.totalorder %s421_s11, %s6437_s19  ;;  %p6446_p10 = scmp.lt.s32.totalorder %s6437_s19, %s6437_s19 }
  0x72   : > { %p6440_p6 = pnand %p6438_p4, %p6591_p7  ;;  %p6447_p11 = por %p6446_p10, %p6445_p9 }
  0x74   : > { %p6441_p8 = pneg %p6440_p6 }
  0x76   : > { %p6448_p12 = pnand %p6447_p11, %p6441_p8 }
  0x78   : > { %6451 = shalt.err (!%p6448_p12)
}
  0x79   : > { %6283 = dma.hbm_to_vmem [thread:$0]  (!%p6575_p5), %s7530_s10, 4096, %s421_s11, [#allocation8], %s6478_s17, %s6478_s17, %s6479_s20  }
  0x7a   : > { %p7543_p2 = scmp.ne.s32.totalorder %s7540_s27, 0 }
  0x7b   : > { %p7544_p3 = scmp.eq.s32.totalorder (!%p7543_p2), %s6558_s26, 0 }
  0x7c   : > { %447 = sbr.rel (%p7543_p2) target bundleno = 1770 (0x6ea), region = 68 }
  0x83   : > { %6457 = dma.done.wait (%p7544_p3), [#allocation3], 32768   ;;  %p7545_p7 = pmov %p7544_p3 }
  0x84   : > { %p7546_p13 = pmov %p7544_p3 }
  0x85   : > { %6459 = vsyncadd (%p7545_p7), [#allocation3], 4294934528 }
  0x86   : > { %6461 = dma.done.wait (%p7546_p13), [#allocation5], 8192   ;;  %p7547_p0 = pmov %p7544_p3 }
  0x88   : > { %6463 = vsyncadd (%p7547_p0), [#allocation5], 4294959104  ;;  %p7548_p1 = pmov %p7547_p0 }
  0x89   : > { %p7549_p5 = pmov %p7547_p0 }
  0x8a   : > { %6465 = dma.done.wait (%p7548_p1), [#allocation8], 8192  }
  0x8b   : > { %6467 = vsyncadd (%p7549_p5), [#allocation8], 4294959104  ;;  %p512_p4 = scmp.lt.s32.totalorder %s6558_s26, 1  ;;  %vm664_vm0 = vcmask 1043456   ;;  %vm567_vm1 = vcmask 31744   ;;  %v6481_v33 = vmov 0.0|0.0  }
  0x8c   : > { %v559_v0 = vld [vmem:[%s7521_s1] sm:$0xf]  ;;  %5560 = vmatprep.subr.bf16.mxu1 %v6481_v33  ;;  %v1232_v34 = vld [vmem:[#allocation2 + $0x208] sm:$0xff]  ;;  %s7550_s28 = sld [smem:[#allocation14_spill]]  ;;  %s7551_s14 = sld [smem:[#allocation15_spill]] }
  0x8d   : > { %s7554_s26 = smov (!%p512_p4, %s6558_s26), 1  ;;  %5014 = vmatprep.subr.msk.mxu0 %vm664_vm0, %v559_v0  ;;  %v6800_v35 = vld [vmem:[%s7522_s2] ss:$0 sm:$0xff]  ;;  %v926_v43 = vld [vmem:[#allocation2 + $0x8] sm:$0xff] }
  0x8e   : > { %s4466_s27 = sshll.u32 %s7554_s26, 8  ;;  %5015 = vmatpush3.msk.msra.mxu0 %vm664_vm0, %v559_v0  ;;  %1053 = vmatprep.mubr.f32.mxu1 %v926_v43  ;;  %s4467_s16 = sshll.u32 %s7554_s26, 6 }
  0x8f   : > { %s6726_s17 = scalar_lea.vmem %s7520_s0, %s4466_s27  ;;  %5608 = vmatprep.subr.bf16.mxu0 %v6481_v33  ;;  %s521_s21 = scalar_lea.vmem %s7532_s12, %s4467_s16 }
  0x90   : > { %v527_v1 = vld [vmem:[%s6726_s17] sm:$0xff]  ;;  %v528_v2 = vld [vmem:[%s6726_s17 + $0x8] sm:$0xff]  ;;  %v529_v3 = vld [vmem:[%s6726_s17 + $0x10] sm:$0xff] }
  0x91   : > { %5016 = vmatprep.mubr.msk.f32.mxu0 %vm567_vm1, %v527_v1  ;;  %v530_v4 = vld [vmem:[%s6726_s17 + $0x18] sm:$0xff]  ;;  %v531_v5 = vld [vmem:[%s6726_s17 + $0x20] sm:$0xff]  ;;  %v532_v6 = vld [vmem:[%s6726_s17 + $0x28] sm:$0xff] }
  0x92   : > { %5017 = vmatmul.mubr.msk.f32.vlgmr.msra.gmra.mrb[0].mxu0 %vm567_vm1, %v528_v2  ;;  %v533_v7 = vld [vmem:[%s6726_s17 + $0x30] sm:$0xff]  ;;  %v534_v8 = vld [vmem:[%s6726_s17 + $0x38] sm:$0xff]  ;;  %v535_v9 = vld [vmem:[%s6726_s17 + $0x40] sm:$0xff]  ;;  %s7507_s29 = scalar_lea.vmem %s7551_s14, %s4467_s16 }
  0x93   : > { %5019 = vmatprep.mubr.msk.f32.mxu0 %vm567_vm1, %v529_v3  ;;  %v536_v10 = vld [vmem:[%s6726_s17 + $0x48] sm:$0xff]  ;;  %v537_v11 = vld [vmem:[%s6726_s17 + $0x50] sm:$0xff]  ;;  %v538_v12 = vld [vmem:[%s6726_s17 + $0x58] sm:$0xff] }
  0x94   : > { %v539_v13 = vld [vmem:[%s6726_s17 + $0x60] sm:$0xff]  ;;  %v540_v14 = vld [vmem:[%s6726_s17 + $0x68] sm:$0xff]  ;;  %v541_v15 = vld [vmem:[%s6726_s17 + $0x70] sm:$0xff] }
  0x95   : > { %v542_v16 = vld [vmem:[%s6726_s17 + $0x78] sm:$0xff]  ;;  %v543_v17 = vld [vmem:[%s6726_s17 + $0x80] sm:$0xff]  ;;  %v544_v18 = vld [vmem:[%s6726_s17 + $0x88] sm:$0xff] }
  0x96   : > { %5020 = vmatmul.mubr.msk.f32.gmra.mrb[2].mxu0 %vm567_vm1, %v530_v4  ;;  %v545_v19 = vld [vmem:[%s6726_s17 + $0x90] sm:$0xff]  ;;  %v546_v20 = vld [vmem:[%s6726_s17 + $0x98] sm:$0xff]  ;;  %v547_v21 = vld [vmem:[%s6726_s17 + $0xa0] sm:$0xff] }
  0x97   : > { %5022 = vmatprep.mubr.msk.f32.mxu0 %vm567_vm1, %v531_v5  ;;  %v548_v22 = vld [vmem:[%s6726_s17 + $0xa8] sm:$0xff]  ;;  %v549_v23 = vld [vmem:[%s6726_s17 + $0xb0] sm:$0xff]  ;;  %v550_v24 = vld [vmem:[%s6726_s17 + $0xb8] sm:$0xff] }
  0x98   : > { %v551_v25 = vld [vmem:[%s6726_s17 + $0xc0] sm:$0xff]  ;;  %v552_v26 = vld [vmem:[%s6726_s17 + $0xc8] sm:$0xff]  ;;  %v553_v27 = vld [vmem:[%s6726_s17 + $0xd0] sm:$0xff] }
  0x99   : > { %v554_v28 = vld [vmem:[%s6726_s17 + $0xd8] sm:$0xff]  ;;  %v555_v29 = vld [vmem:[%s6726_s17 + $0xe0] sm:$0xff]  ;;  %v556_v30 = vld [vmem:[%s6726_s17 + $0xe8] sm:$0xff] }
  0x9a   : > { %5023 = vmatmul.mubr.msk.f32.gmra.mrb[4].mxu0 %vm567_vm1, %v532_v6  ;;  %v557_v31 = vld [vmem:[%s6726_s17 + $0xf0] sm:$0xff]  ;;  %v558_v32 = vld [vmem:[%s6726_s17 + $0xf8] sm:$0xff] }
  0x9b   : > { %5025 = vmatprep.mubr.msk.f32.mxu0 %vm567_vm1, %v533_v7 }
  0x9e   : > { %5026 = vmatmul.mubr.msk.f32.gmra.mrb[6].mxu0 %vm567_vm1, %v534_v8 }
  0x9f   : > { %5028 = vmatprep.mubr.msk.f32.mxu0 %vm567_vm1, %v535_v9 }
  0xa2   : > { %5029 = vmatmul.mubr.msk.f32.gmra.mrb[8].mxu0 %vm567_vm1, %v536_v10 }
  0xa3   : > { %5031 = vmatprep.mubr.msk.f32.mxu0 %vm567_vm1, %v537_v11 }
  0xa6   : > { %5032 = vmatmul.mubr.msk.f32.gmra.mrb[10].mxu0 %vm567_vm1, %v538_v12 }
  0xa7   : > { %5034 = vmatprep.mubr.msk.f32.mxu0 %vm567_vm1, %v539_v13 }
  0xaa   : > { %5035 = vmatmul.mubr.msk.f32.gmra.mrb[12].mxu0 %vm567_vm1, %v540_v14 }
  0xab   : > { %5037 = vmatprep.mubr.msk.f32.mxu0 %vm567_vm1, %v541_v15 }
  0xae   : > { %5038 = vmatmul.mubr.msk.f32.gmra.mrb[14].mxu0 %vm567_vm1, %v542_v16 }
  0xaf   : > { %5040 = vmatprep.mubr.msk.f32.mxu0 %vm567_vm1, %v543_v17 }
  0xb2   : > { %5041 = vmatmul.mubr.msk.f32.gmra.mrb[16].mxu0 %vm567_vm1, %v544_v18 }
  0xb3   : > { %5043 = vmatprep.mubr.msk.f32.mxu0 %vm567_vm1, %v545_v19 }
  0xb6   : > { %5044 = vmatmul.mubr.msk.f32.gmra.mrb[18].mxu0 %vm567_vm1, %v546_v20 }
  0xb7   : > { %5046 = vmatprep.mubr.msk.f32.mxu0 %vm567_vm1, %v547_v21 }
  0xba   : > { %5047 = vmatmul.mubr.msk.f32.gmra.mrb[20].mxu0 %vm567_vm1, %v548_v22 }
  0xbb   : > { %5049 = vmatprep.mubr.msk.f32.mxu0 %vm567_vm1, %v549_v23 }
  0xbe   : > { %5050 = vmatmul.mubr.msk.f32.gmra.mrb[22].mxu0 %vm567_vm1, %v550_v24 }
  0xbf   : > { %5052 = vmatprep.mubr.msk.f32.mxu0 %vm567_vm1, %v551_v25 }
  0xc2   : > { %5053 = vmatmul.mubr.msk.f32.gmra.mrb[24].mxu0 %vm567_vm1, %v552_v26 }
  0xc3   : > { %5055 = vmatprep.mubr.msk.f32.mxu0 %vm567_vm1, %v553_v27 }
  0xc6   : > { %5056 = vmatmul.mubr.msk.f32.gmra.mrb[26].mxu0 %vm567_vm1, %v554_v28 }
  0xc7   : > { %5058 = vmatprep.mubr.msk.f32.mxu0 %vm567_vm1, %v555_v29 }
  0xca   : > { %5059 = vmatmul.mubr.msk.f32.gmra.mrb[28].mxu0 %vm567_vm1, %v556_v30 }
  0xcb   : > { %5061 = vmatprep.mubr.msk.f32.mxu0 %vm567_vm1, %v557_v31 }
  0xce   : > { %5062 = vmatmul.mubr.msk.f32.gmra.mrb[30].mxu0 %vm567_vm1, %v558_v32 }
  0xcf   : > { %1359 = vmatprep.mubr.f32.mxu0 %v1232_v34 }
 0x165   : > { %v5018_v36 = vpop.f32.mrb[0].mxu0 }
 0x166   : > { %v740_v37 = vadd.f32 %v5018_v36, %v6800_v35  ;;  %v734_v38 = vpop.f32.mrb[1].mxu0 }
 0x167   : > { %v735_v39 = vadd.f32 %v6800_v35, %v734_v38 }
 0x168   : > { %v894_v40 = vmax.f32 %v740_v37, 0.0 }
 0x169   : > { %v893_v41 = vmax.f32 %v735_v39, 0.0  ;;  %v5021_v42 = vpop.f32.mrb[2].mxu0 }
 0x16a   : > { %v750_v44 = vadd.f32 %v5021_v42, %v6800_v35  ;;  %v744_v45 = vpop.f32.mrb[3].mxu0 }
 0x16b   : > { %v6805_v46 = vpack.c.bf16 %v894_v40, %v893_v41  ;;  %v745_v47 = vadd.f32 %v6800_v35, %v744_v45 }
 0x16c   : > { %v896_v48 = vmax.f32 %v750_v44, 0.0 }
 0x16d   : > { %v895_v49 = vmax.f32 %v745_v47, 0.0  ;;  %v5024_v50 = vpop.f32.mrb[4].mxu0  ;;  %5562 = vmatpush1.bf16.msra.mxu1 %v6805_v46  ;;  %5610 = vmatpush1.bf16.msra.mxu0 %v6805_v46 }
 0x16e   : > { %v760_v51 = vadd.f32 %v5024_v50, %v6800_v35  ;;  %v754_v52 = vpop.f32.mrb[5].mxu0  ;;  %5563 = vmatprep.subr.bf16.mxu1 %v6481_v33  ;;  %5611 = vmatprep.subr.bf16.mxu0 %v6481_v33 }
 0x16f   : > { %v6813_v53 = vpack.c.bf16 %v896_v48, %v895_v49  ;;  %v755_v54 = vadd.f32 %v6800_v35, %v754_v52 }
 0x170   : > { %v898_v55 = vmax.f32 %v760_v51, 0.0 }
 0x171   : > { %v897_v56 = vmax.f32 %v755_v54, 0.0  ;;  %v5027_v57 = vpop.f32.mrb[6].mxu0  ;;  %5565 = vmatpush1.bf16.msra.mxu1 %v6813_v53  ;;  %5613 = vmatpush1.bf16.msra.mxu0 %v6813_v53 }
 0x172   : > { %v770_v58 = vadd.f32 %v5027_v57, %v6800_v35  ;;  %v764_v59 = vpop.f32.mrb[7].mxu0  ;;  %5566 = vmatprep.subr.bf16.mxu1 %v6481_v33  ;;  %5614 = vmatprep.subr.bf16.mxu0 %v6481_v33 }
 0x173   : > { %v6821_v60 = vpack.c.bf16 %v898_v55, %v897_v56  ;;  %v765_v61 = vadd.f32 %v6800_v35, %v764_v59 }
 0x174   : > { %v900_v62 = vmax.f32 %v770_v58, 0.0 }
 0x175   : > { %v899_v63 = vmax.f32 %v765_v61, 0.0  ;;  %v5030_v0 = vpop.f32.mrb[8].mxu0  ;;  %5568 = vmatpush1.bf16.msra.mxu1 %v6821_v60  ;;  %5616 = vmatpush1.bf16.msra.mxu0 %v6821_v60 }
 0x176   : > { %v780_v1 = vadd.f32 %v5030_v0, %v6800_v35  ;;  %v774_v2 = vpop.f32.mrb[9].mxu0  ;;  %5569 = vmatprep.subr.bf16.mxu1 %v6481_v33  ;;  %5617 = vmatprep.subr.bf16.mxu0 %v6481_v33 }
 0x177   : > { %v6829_v3 = vpack.c.bf16 %v900_v62, %v899_v63  ;;  %v775_v4 = vadd.f32 %v6800_v35, %v774_v2 }
 0x178   : > { %v902_v5 = vmax.f32 %v780_v1, 0.0 }
 0x179   : > { %v901_v6 = vmax.f32 %v775_v4, 0.0  ;;  %v5033_v7 = vpop.f32.mrb[10].mxu0  ;;  %5571 = vmatpush1.bf16.msra.mxu1 %v6829_v3  ;;  %5619 = vmatpush1.bf16.msra.mxu0 %v6829_v3 }
 0x17a   : > { %v790_v8 = vadd.f32 %v5033_v7, %v6800_v35  ;;  %v784_v9 = vpop.f32.mrb[11].mxu0  ;;  %5572 = vmatprep.subr.bf16.mxu1 %v6481_v33  ;;  %5620 = vmatprep.subr.bf16.mxu0 %v6481_v33 }
 0x17b   : > { %v6837_v10 = vpack.c.bf16 %v902_v5, %v901_v6  ;;  %v785_v11 = vadd.f32 %v6800_v35, %v784_v9 }
 0x17c   : > { %v904_v12 = vmax.f32 %v790_v8, 0.0 }
 0x17d   : > { %v903_v13 = vmax.f32 %v785_v11, 0.0  ;;  %v5036_v14 = vpop.f32.mrb[12].mxu0  ;;  %5574 = vmatpush1.bf16.msra.mxu1 %v6837_v10  ;;  %5622 = vmatpush1.bf16.msra.mxu0 %v6837_v10 }
 0x17e   : > { %v800_v15 = vadd.f32 %v5036_v14, %v6800_v35  ;;  %v794_v16 = vpop.f32.mrb[13].mxu0  ;;  %5575 = vmatprep.subr.bf16.mxu1 %v6481_v33  ;;  %5623 = vmatprep.subr.bf16.mxu0 %v6481_v33 }
 0x17f   : > { %v6845_v17 = vpack.c.bf16 %v904_v12, %v903_v13  ;;  %v795_v18 = vadd.f32 %v6800_v35, %v794_v16 }
 0x180   : > { %v906_v19 = vmax.f32 %v800_v15, 0.0 }
 0x181   : > { %v905_v20 = vmax.f32 %v795_v18, 0.0  ;;  %v5039_v21 = vpop.f32.mrb[14].mxu0  ;;  %5577 = vmatpush1.bf16.msra.mxu1 %v6845_v17  ;;  %5625 = vmatpush1.bf16.msra.mxu0 %v6845_v17 }
 0x182   : > { %v810_v22 = vadd.f32 %v5039_v21, %v6800_v35  ;;  %v804_v23 = vpop.f32.mrb[15].mxu0  ;;  %5578 = vmatprep.subr.bf16.mxu1 %v6481_v33  ;;  %5626 = vmatprep.subr.bf16.mxu0 %v6481_v33 }
 0x183   : > { %v6853_v24 = vpack.c.bf16 %v906_v19, %v905_v20  ;;  %v805_v25 = vadd.f32 %v6800_v35, %v804_v23 }
 0x184   : > { %v908_v26 = vmax.f32 %v810_v22, 0.0 }
 0x185   : > { %v907_v27 = vmax.f32 %v805_v25, 0.0  ;;  %v5042_v28 = vpop.f32.mrb[16].mxu0  ;;  %5580 = vmatpush1.bf16.msra.mxu1 %v6853_v24  ;;  %5628 = vmatpush1.bf16.msra.mxu0 %v6853_v24 }
 0x186   : > { %v820_v29 = vadd.f32 %v5042_v28, %v6800_v35  ;;  %v814_v30 = vpop.f32.mrb[17].mxu0  ;;  %5581 = vmatprep.subr.bf16.mxu1 %v6481_v33  ;;  %5629 = vmatprep.subr.bf16.mxu0 %v6481_v33 }
 0x187   : > { %v6861_v31 = vpack.c.bf16 %v908_v26, %v907_v27  ;;  %v815_v32 = vadd.f32 %v6800_v35, %v814_v30  ;;  %v1231_v30 = vld [vmem:[#allocation2 + $0x200] sm:$0xff] }
 0x188   : > { %v910_v34 = vmax.f32 %v820_v29, 0.0 }
 0x189   : > { %v909_v36 = vmax.f32 %v815_v32, 0.0  ;;  %v5045_v37 = vpop.f32.mrb[18].mxu0  ;;  %5583 = vmatpush1.bf16.msra.mxu1 %v6861_v31  ;;  %5631 = vmatpush1.bf16.msra.mxu0 %v6861_v31  ;;  %v925_v32 = vld [vmem:[#allocation2] sm:$0xff] }
 0x18a   : > { %v830_v38 = vadd.f32 %v5045_v37, %v6800_v35  ;;  %v824_v39 = vpop.f32.mrb[19].mxu0  ;;  %5584 = vmatprep.subr.bf16.mxu1 %v6481_v33  ;;  %5632 = vmatprep.subr.bf16.mxu0 %v6481_v33  ;;  %v927_v37 = vld [vmem:[#allocation2 + $0x10] sm:$0xff] }
 0x18b   : > { %v6869_v40 = vpack.c.bf16 %v910_v34, %v909_v36  ;;  %v825_v41 = vadd.f32 %v6800_v35, %v824_v39  ;;  %v928_v34 = vld [vmem:[#allocation2 + $0x18] sm:$0xff]  ;;  %v1233_v36 = vld [vmem:[#allocation2 + $0x210] sm:$0xff]  ;;  %v930_v39 = vld [vmem:[#allocation2 + $0x28] sm:$0xff] }
 0x18c   : > { %v912_v42 = vmax.f32 %v830_v38, 0.0  ;;  %v1236_v38 = vld [vmem:[#allocation2 + $0x228] sm:$0xff] }
 0x18d   : > { %v911_v43 = vmax.f32 %v825_v41, 0.0  ;;  %v5048_v44 = vpop.f32.mrb[20].mxu0  ;;  %5586 = vmatpush1.bf16.msra.mxu1 %v6869_v40  ;;  %5634 = vmatpush1.bf16.msra.mxu0 %v6869_v40  ;;  %v1235_v41 = vld [vmem:[#allocation2 + $0x220] sm:$0xff] }
 0x18e   : > { %v840_v45 = vadd.f32 %v5048_v44, %v6800_v35  ;;  %v834_v47 = vpop.f32.mrb[21].mxu0  ;;  %5587 = vmatprep.subr.bf16.mxu1 %v6481_v33  ;;  %5635 = vmatprep.subr.bf16.mxu0 %v6481_v33  ;;  %v932_v44 = vld [vmem:[#allocation2 + $0x38] sm:$0xff] }
 0x18f   : > { %v6877_v48 = vpack.c.bf16 %v912_v42, %v911_v43  ;;  %v835_v49 = vadd.f32 %v6800_v35, %v834_v47  ;;  %v929_v42 = vld [vmem:[#allocation2 + $0x20] sm:$0xff]  ;;  %v1238_v43 = vld [vmem:[#allocation2 + $0x238] sm:$0xff]  ;;  %v931_v47 = vld [vmem:[#allocation2 + $0x30] sm:$0xff] }
 0x190   : > { %v914_v50 = vmax.f32 %v840_v45, 0.0  ;;  %v1237_v45 = vld [vmem:[#allocation2 + $0x230] sm:$0xff] }
 0x191   : > { %v913_v51 = vmax.f32 %v835_v49, 0.0  ;;  %v5051_v52 = vpop.f32.mrb[22].mxu0  ;;  %5589 = vmatpush1.bf16.msra.mxu1 %v6877_v48  ;;  %5637 = vmatpush1.bf16.msra.mxu0 %v6877_v48  ;;  %v1240_v49 = vld [vmem:[#allocation2 + $0x248] sm:$0xff] }
 0x192   : > { %v850_v54 = vadd.f32 %v5051_v52, %v6800_v35  ;;  %v844_v55 = vpop.f32.mrb[23].mxu0  ;;  %5590 = vmatprep.subr.bf16.mxu1 %v6481_v33  ;;  %5638 = vmatprep.subr.bf16.mxu0 %v6481_v33  ;;  %v933_v52 = vld [vmem:[#allocation2 + $0x40] sm:$0xff] }
 0x193   : > { %v6885_v56 = vpack.c.bf16 %v914_v50, %v913_v51  ;;  %v845_v57 = vadd.f32 %v6800_v35, %v844_v55  ;;  %v934_v50 = vld [vmem:[#allocation2 + $0x48] sm:$0xff]  ;;  %v1239_v51 = vld [vmem:[#allocation2 + $0x240] sm:$0xff]  ;;  %v936_v55 = vld [vmem:[#allocation2 + $0x58] sm:$0xff] }
 0x194   : > { %v916_v58 = vmax.f32 %v850_v54, 0.0  ;;  %v1242_v54 = vld [vmem:[#allocation2 + $0x258] sm:$0xff] }
 0x195   : > { %v915_v59 = vmax.f32 %v845_v57, 0.0  ;;  %v5054_v61 = vpop.f32.mrb[24].mxu0  ;;  %5592 = vmatpush1.bf16.msra.mxu1 %v6885_v56  ;;  %5640 = vmatpush1.bf16.msra.mxu0 %v6885_v56  ;;  %v1241_v57 = vld [vmem:[#allocation2 + $0x250] sm:$0xff] }
 0x196   : > { %v860_v62 = vadd.f32 %v5054_v61, %v6800_v35  ;;  %v854_v63 = vpop.f32.mrb[25].mxu0  ;;  %5593 = vmatprep.subr.bf16.mxu1 %v6481_v33  ;;  %5641 = vmatprep.subr.bf16.mxu0 %v6481_v33  ;;  %v938_v61 = vld [vmem:[#allocation2 + $0x68] sm:$0xff] }
 0x197   : > { %v6893_v0 = vpack.c.bf16 %v916_v58, %v915_v59  ;;  %v855_v1 = vadd.f32 %v6800_v35, %v854_v63  ;;  %v935_v58 = vld [vmem:[#allocation2 + $0x50] sm:$0xff]  ;;  %v1244_v59 = vld [vmem:[#allocation2 + $0x268] sm:$0xff]  ;;  %v937_v63 = vld [vmem:[#allocation2 + $0x60] sm:$0xff] }
 0x198   : > { %v918_v2 = vmax.f32 %v860_v62, 0.0  ;;  %v1243_v62 = vld [vmem:[#allocation2 + $0x260] sm:$0xff] }
 0x199   : > { %v917_v4 = vmax.f32 %v855_v1, 0.0  ;;  %v5057_v5 = vpop.f32.mrb[26].mxu0  ;;  %5595 = vmatpush1.bf16.msra.mxu1 %v6893_v0  ;;  %5643 = vmatpush1.bf16.msra.mxu0 %v6893_v0  ;;  %v1246_v1 = vld [vmem:[#allocation2 + $0x278] sm:$0xff] }
 0x19a   : > { %v870_v6 = vadd.f32 %v5057_v5, %v6800_v35  ;;  %v864_v7 = vpop.f32.mrb[27].mxu0  ;;  %5596 = vmatprep.subr.bf16.mxu1 %v6481_v33  ;;  %5644 = vmatprep.subr.bf16.mxu0 %v6481_v33  ;;  %v939_v5 = vld [vmem:[#allocation2 + $0x70] sm:$0xff] }
 0x19b   : > { %v6901_v8 = vpack.c.bf16 %v918_v2, %v917_v4  ;;  %v865_v9 = vadd.f32 %v6800_v35, %v864_v7  ;;  %v940_v2 = vld [vmem:[#allocation2 + $0x78] sm:$0xff]  ;;  %v1245_v4 = vld [vmem:[#allocation2 + $0x270] sm:$0xff]  ;;  %v942_v7 = vld [vmem:[#allocation2 + $0x88] sm:$0xff] }
 0x19c   : > { %v920_v11 = vmax.f32 %v870_v6, 0.0  ;;  %v1248_v6 = vld [vmem:[#allocation2 + $0x288] sm:$0xff] }
 0x19d   : > { %v919_v12 = vmax.f32 %v865_v9, 0.0  ;;  %v5060_v13 = vpop.f32.mrb[28].mxu0  ;;  %5598 = vmatpush1.bf16.msra.mxu1 %v6901_v8  ;;  %5646 = vmatpush1.bf16.msra.mxu0 %v6901_v8  ;;  %v1247_v9 = vld [vmem:[#allocation2 + $0x280] sm:$0xff] }
 0x19e   : > { %v880_v14 = vadd.f32 %v5060_v13, %v6800_v35  ;;  %v874_v15 = vpop.f32.mrb[29].mxu0  ;;  %5599 = vmatprep.subr.bf16.mxu1 %v6481_v33  ;;  %5647 = vmatprep.subr.bf16.mxu0 %v6481_v33  ;;  %v944_v13 = vld [vmem:[#allocation2 + $0x98] sm:$0xff] }
 0x19f   : > { %v6909_v16 = vpack.c.bf16 %v920_v11, %v919_v12  ;;  %v875_v18 = vadd.f32 %v6800_v35, %v874_v15  ;;  %v941_v11 = vld [vmem:[#allocation2 + $0x80] sm:$0xff]  ;;  %v1250_v12 = vld [vmem:[#allocation2 + $0x298] sm:$0xff]  ;;  %v943_v15 = vld [vmem:[#allocation2 + $0x90] sm:$0xff] }
 0x1a0   : > { %v922_v19 = vmax.f32 %v880_v14, 0.0  ;;  %v1249_v14 = vld [vmem:[#allocation2 + $0x290] sm:$0xff] }
 0x1a1   : > { %v921_v20 = vmax.f32 %v875_v18, 0.0  ;;  %v5063_v21 = vpop.f32.mrb[30].mxu0  ;;  %5601 = vmatpush1.bf16.msra.mxu1 %v6909_v16  ;;  %5649 = vmatpush1.bf16.msra.mxu0 %v6909_v16  ;;  %v1252_v18 = vld [vmem:[#allocation2 + $0x2a8] sm:$0xff] }
 0x1a2   : > { %v890_v22 = vadd.f32 %v5063_v21, %v6800_v35  ;;  %v884_v23 = vpop.f32.mrb[31].mxu0  ;;  %5602 = vmatprep.subr.bf16.mxu1 %v6481_v33  ;;  %5650 = vmatprep.subr.bf16.mxu0 %v6481_v33  ;;  %v945_v21 = vld [vmem:[#allocation2 + $0xa0] sm:$0xff] }
 0x1a3   : > { %v6917_v25 = vpack.c.bf16 %v922_v19, %v921_v20  ;;  %v885_v26 = vadd.f32 %v6800_v35, %v884_v23  ;;  %v1234_v35 = vld [vmem:[#allocation2 + $0x218] sm:$0xff]  ;;  %v946_v19 = vld [vmem:[#allocation2 + $0xa8] sm:$0xff]  ;;  %v1251_v20 = vld [vmem:[#allocation2 + $0x2a0] sm:$0xff] }
 0x1a4   : > { %v924_v27 = vmax.f32 %v890_v22, 0.0  ;;  %v1254_v22 = vld [vmem:[#allocation2 + $0x2b8] sm:$0xff] }
 0x1a5   : > { %v923_v28 = vmax.f32 %v885_v26, 0.0  ;;  %5604 = vmatpush1.bf16.msra.mxu1 %v6917_v25  ;;  %5652 = vmatpush1.bf16.msra.mxu0 %v6917_v25  ;;  %v948_v23 = vld [vmem:[#allocation2 + $0xb8] sm:$0xff]  ;;  %v1253_v26 = vld [vmem:[#allocation2 + $0x2b0] sm:$0xff] }
 0x1a6   : > { %5605 = vmatprep.subr.bf16.mxu1 %v6481_v33  ;;  %5653 = vmatprep.subr.bf16.mxu0 %v6481_v33 }
 0x1a7   : > { %v6924_v29 = vpack.c.bf16 %v924_v27, %v923_v28  ;;  %v947_v27 = vld [vmem:[#allocation2 + $0xb0] sm:$0xff]  ;;  %v1256_v28 = vld [vmem:[#allocation2 + $0x2c8] sm:$0xff] }
 0x1a9   : > { %5607 = vmatpush1.bf16.msra.mxu1 %v6924_v29  ;;  %5655 = vmatpush1.bf16.msra.mxu0 %v6924_v29 }
 0x1aa   : > { %5720 = vmatprep.subr.bf16.mxu0 %v6481_v33 }
 0x1ac   : > { %1360 = vmatmul.mubr.f32.vlgmr.msra.gmra.mrb[32].mxu0 %v1231_v30  ;;  %1054 = vmatmul.mubr.f32.vlgmr.msra.gmra.mrb[0].mxu1 %v925_v32  ;;  %v950_v30 = vld [vmem:[#allocation2 + $0xc8] sm:$0xff]  ;;  %v1255_v32 = vld [vmem:[#allocation2 + $0x2c0] sm:$0xff] }
 0x1ad   : > { %5722 = vmatpush1.bf16.msra.mxu0 %v6805_v46  ;;  %1364 = vmatprep.mubr.f32.mxu0 %v1234_v35  ;;  %v949_v35 = vld [vmem:[#allocation2 + $0xc0] sm:$0xff] }
 0x1ae   : > { %5723 = vmatprep.subr.bf16.mxu0 %v6481_v33  ;;  %1058 = vmatprep.mubr.f32.mxu1 %v928_v34  ;;  %v1258_v34 = vld [vmem:[#allocation2 + $0x2d8] sm:$0xff] }
 0x1b0   : > { %1365 = vmatmul.mubr.f32.gmra.mrb[34].mxu0 %v1233_v36  ;;  %1059 = vmatmul.mubr.f32.gmra.mrb[2].mxu1 %v927_v37  ;;  %v952_v36 = vld [vmem:[#allocation2 + $0xd8] sm:$0xff]  ;;  %v1257_v37 = vld [vmem:[#allocation2 + $0x2d0] sm:$0xff] }
 0x1b1   : > { %5725 = vmatpush1.bf16.msra.mxu0 %v6813_v53  ;;  %1369 = vmatprep.mubr.f32.mxu0 %v1236_v38  ;;  %v951_v38 = vld [vmem:[#allocation2 + $0xd0] sm:$0xff] }
 0x1b2   : > { %5726 = vmatprep.subr.bf16.mxu0 %v6481_v33  ;;  %1063 = vmatprep.mubr.f32.mxu1 %v930_v39  ;;  %v1260_v39 = vld [vmem:[#allocation2 + $0x2e8] sm:$0xff] }
 0x1b4   : > { %1370 = vmatmul.mubr.f32.gmra.mrb[36].mxu0 %v1235_v41  ;;  %1064 = vmatmul.mubr.f32.gmra.mrb[4].mxu1 %v929_v42  ;;  %v954_v41 = vld [vmem:[#allocation2 + $0xe8] sm:$0xff]  ;;  %v1259_v42 = vld [vmem:[#allocation2 + $0x2e0] sm:$0xff] }
 0x1b5   : > { %5728 = vmatpush1.bf16.msra.mxu0 %v6821_v60  ;;  %1374 = vmatprep.mubr.f32.mxu0 %v1238_v43  ;;  %v953_v43 = vld [vmem:[#allocation2 + $0xe0] sm:$0xff] }
 0x1b6   : > { %5729 = vmatprep.subr.bf16.mxu0 %v6481_v33  ;;  %1068 = vmatprep.mubr.f32.mxu1 %v932_v44  ;;  %v1262_v44 = vld [vmem:[#allocation2 + $0x2f8] sm:$0xff] }
 0x1b8   : > { %1375 = vmatmul.mubr.f32.gmra.mrb[38].mxu0 %v1237_v45  ;;  %1069 = vmatmul.mubr.f32.gmra.mrb[6].mxu1 %v931_v47  ;;  %v4413_v45 = vld [vmem:[%s7524_s4 + $0x80] sm:$0xff]  ;;  %v4414_v47 = vld [vmem:[%s7524_s4 + $0x88] sm:$0xff] }
 0x1b9   : > { %5731 = vmatpush1.bf16.msra.mxu0 %v6829_v3  ;;  %1379 = vmatprep.mubr.f32.mxu0 %v1240_v49  ;;  %v956_v49 = vld [vmem:[#allocation2 + $0xf8] sm:$0xff] }
 0x1ba   : > { %5732 = vmatprep.subr.bf16.mxu0 %v6481_v33  ;;  %1073 = vmatprep.mubr.f32.mxu1 %v934_v50  ;;  %v5656_v50 = vpack.c.bf16 %v4414_v47, %v4413_v45  ;;  %v1276_v45 = vld [vmem:[#allocation2 + $0x368] sm:$0xff] }
 0x1bb   : > { %v970_v47 = vld [vmem:[#allocation2 + $0x168] sm:$0xff] }
 0x1bc   : > { %1380 = vmatmul.mubr.f32.gmra.mrb[40].mxu0 %v1239_v51  ;;  %1074 = vmatmul.mubr.f32.gmra.mrb[8].mxu1 %v933_v52  ;;  %v1261_v51 = vld [vmem:[#allocation2 + $0x2f0] sm:$0xff] }
 0x1bd   : > { %5734 = vmatpush1.bf16.msra.mxu0 %v6837_v10  ;;  %1384 = vmatprep.mubr.f32.mxu0 %v1242_v54  ;;  %v955_v52 = vld [vmem:[#allocation2 + $0xf0] sm:$0xff]  ;;  %v1264_v54 = vld [vmem:[#allocation2 + $0x308] sm:$0xff] }
 0x1be   : > { %5735 = vmatprep.subr.bf16.mxu0 %v6481_v33  ;;  %1078 = vmatprep.mubr.f32.mxu1 %v936_v55  ;;  %v958_v55 = vld [vmem:[#allocation2 + $0x108] sm:$0xff] }
 0x1bf   : > { %5657 = vmatprep.subr.bf16.mxu1 %v5656_v50 }
 0x1c0   : > { %1385 = vmatmul.mubr.f32.gmra.mrb[42].mxu0 %v1241_v57  ;;  %1079 = vmatmul.mubr.f32.gmra.mrb[10].mxu1 %v935_v58  ;;  %v4415_v57 = vld [vmem:[%s7524_s4 + $0x90] sm:$0xff]  ;;  %v4416_v58 = vld [vmem:[%s7524_s4 + $0x98] sm:$0xff] }
 0x1c1   : > { %5737 = vmatpush1.bf16.msra.mxu0 %v6845_v17  ;;  %1389 = vmatprep.mubr.f32.mxu0 %v1244_v59  ;;  %v1263_v59 = vld [vmem:[#allocation2 + $0x300] sm:$0xff] }
 0x1c2   : > { %5738 = vmatprep.subr.bf16.mxu0 %v6481_v33  ;;  %1083 = vmatprep.mubr.f32.mxu1 %v938_v61  ;;  %v957_v61 = vld [vmem:[#allocation2 + $0x100] sm:$0xff] }
 0x1c3   : > { %5659 = vmatpush3.bf16.msra.mxu1 %v5656_v50  ;;  %v4427_v50 = vld [vmem:[%s7524_s4 + $0xf0] sm:$0xff] }
 0x1c4   : > { %1390 = vmatmul.mubr.f32.gmra.mrb[44].mxu0 %v1243_v62  ;;  %1084 = vmatmul.mubr.f32.gmra.mrb[12].mxu1 %v937_v63  ;;  %v1266_v62 = vld [vmem:[#allocation2 + $0x318] sm:$0xff] }
 0x1c5   : > { %5740 = vmatpush1.bf16.msra.mxu0 %v6853_v24  ;;  %1394 = vmatprep.mubr.f32.mxu0 %v1246_v1  ;;  %v960_v63 = vld [vmem:[#allocation2 + $0x118] sm:$0xff]  ;;  %v5660_v1 = vpack.c.bf16 %v4416_v58, %v4415_v57 }
 0x1c6   : > { %5741 = vmatprep.subr.bf16.mxu0 %v6481_v33  ;;  %1088 = vmatprep.mubr.f32.mxu1 %v940_v2  ;;  %v4417_v2 = vld [vmem:[%s7524_s4 + $0xa0] sm:$0xff]  ;;  %v972_v57 = vld [vmem:[#allocation2 + $0x178] sm:$0xff] }
 0x1c7   : > { %5661 = vmatprep.subr.bf16.mxu1 %v5660_v1 }
 0x1c8   : > { %1395 = vmatmul.mubr.f32.gmra.mrb[46].mxu0 %v1245_v4  ;;  %1089 = vmatmul.mubr.f32.gmra.mrb[14].mxu1 %v939_v5  ;;  %v4418_v4 = vld [vmem:[%s7524_s4 + $0xa8] sm:$0xff]  ;;  %v1265_v5 = vld [vmem:[#allocation2 + $0x310] sm:$0xff] }
 0x1c9   : > { %5743 = vmatpush1.bf16.msra.mxu0 %v6861_v31  ;;  %1399 = vmatprep.mubr.f32.mxu0 %v1248_v6  ;;  %v959_v6 = vld [vmem:[#allocation2 + $0x110] sm:$0xff] }
 0x1ca   : > { %5744 = vmatprep.subr.bf16.mxu0 %v6481_v33  ;;  %1093 = vmatprep.mubr.f32.mxu1 %v942_v7  ;;  %v1268_v7 = vld [vmem:[#allocation2 + $0x328] sm:$0xff] }
 0x1cb   : > { %5663 = vmatpush3.bf16.msra.mxu1 %v5660_v1  ;;  %v1279_v1 = vld [vmem:[#allocation2 + $0x380] sm:$0xff] }
 0x1cc   : > { %1400 = vmatmul.mubr.f32.gmra.mrb[48].mxu0 %v1247_v9  ;;  %1094 = vmatmul.mubr.f32.gmra.mrb[16].mxu1 %v941_v11  ;;  %v962_v9 = vld [vmem:[#allocation2 + $0x128] sm:$0xff]  ;;  %v5664_v11 = vpack.c.bf16 %v4418_v4, %v4417_v2  ;;  %v973_v2 = vld [vmem:[#allocation2 + $0x180] sm:$0xff]  ;;  %v1282_v4 = vld [vmem:[#allocation2 + $0x398] sm:$0xff] }
 0x1cd   : > { %5746 = vmatpush1.bf16.msra.mxu0 %v6869_v40  ;;  %1404 = vmatprep.mubr.f32.mxu0 %v1250_v12  ;;  %v4419_v12 = vld [vmem:[%s7524_s4 + $0xb0] sm:$0xff] }
 0x1ce   : > { %5747 = vmatprep.subr.bf16.mxu0 %v6481_v33  ;;  %1098 = vmatprep.mubr.f32.mxu1 %v944_v13  ;;  %v4420_v13 = vld [vmem:[%s7524_s4 + $0xb8] sm:$0xff] }
 0x1cf   : > { %5665 = vmatprep.subr.bf16.mxu1 %v5664_v11 }
 0x1d0   : > { %1405 = vmatmul.mubr.f32.gmra.mrb[50].mxu0 %v1249_v14  ;;  %1099 = vmatmul.mubr.f32.gmra.mrb[18].mxu1 %v943_v15  ;;  %v1267_v14 = vld [vmem:[#allocation2 + $0x320] sm:$0xff] }
 0x1d1   : > { %5749 = vmatpush1.bf16.msra.mxu0 %v6877_v48  ;;  %1409 = vmatprep.mubr.f32.mxu0 %v1252_v18  ;;  %v961_v15 = vld [vmem:[#allocation2 + $0x120] sm:$0xff]  ;;  %v1270_v18 = vld [vmem:[#allocation2 + $0x338] sm:$0xff] }
 0x1d2   : > { %5750 = vmatprep.subr.bf16.mxu0 %v6481_v33  ;;  %1103 = vmatprep.mubr.f32.mxu1 %v946_v19  ;;  %v964_v19 = vld [vmem:[#allocation2 + $0x138] sm:$0xff] }
 0x1d3   : > { %5667 = vmatpush3.bf16.msra.mxu1 %v5664_v11  ;;  %v978_v11 = vld [vmem:[#allocation2 + $0x1a8] sm:$0xff] }
 0x1d4   : > { %1410 = vmatmul.mubr.f32.gmra.mrb[52].mxu0 %v1251_v20  ;;  %1104 = vmatmul.mubr.f32.gmra.mrb[20].mxu1 %v945_v21  ;;  %v5668_v20 = vpack.c.bf16 %v4420_v13, %v4419_v12  ;;  %v4421_v21 = vld [vmem:[%s7524_s4 + $0xc0] sm:$0xff] }
 0x1d5   : > { %5752 = vmatpush1.bf16.msra.mxu0 %v6885_v56  ;;  %1414 = vmatprep.mubr.f32.mxu0 %v1254_v22  ;;  %v4422_v22 = vld [vmem:[%s7524_s4 + $0xc8] sm:$0xff]  ;;  %v1283_v12 = vld [vmem:[#allocation2 + $0x3a0] sm:$0xff] }
 0x1d6   : > { %5753 = vmatprep.subr.bf16.mxu0 %v6481_v33  ;;  %1108 = vmatprep.mubr.f32.mxu1 %v948_v23  ;;  %v1269_v23 = vld [vmem:[#allocation2 + $0x330] sm:$0xff]  ;;  %v977_v13 = vld [vmem:[#allocation2 + $0x1a0] sm:$0xff] }
 0x1d7   : > { %5669 = vmatprep.subr.bf16.mxu1 %v5668_v20 }
 0x1d8   : > { %1415 = vmatmul.mubr.f32.gmra.mrb[54].mxu0 %v1253_v26  ;;  %1109 = vmatmul.mubr.f32.gmra.mrb[22].mxu1 %v947_v27  ;;  %v963_v26 = vld [vmem:[#allocation2 + $0x130] sm:$0xff]  ;;  %v1272_v27 = vld [vmem:[#allocation2 + $0x348] sm:$0xff] }
 0x1d9   : > { %5755 = vmatpush1.bf16.msra.mxu0 %v6893_v0  ;;  %1419 = vmatprep.mubr.f32.mxu0 %v1256_v28  ;;  %v966_v28 = vld [vmem:[#allocation2 + $0x148] sm:$0xff] }
 0x1da   : > { %5756 = vmatprep.subr.bf16.mxu0 %v6481_v33  ;;  %1113 = vmatprep.mubr.f32.mxu1 %v950_v30  ;;  %v5672_v30 = vpack.c.bf16 %v4422_v22, %v4421_v21  ;;  %v982_v21 = vld [vmem:[#allocation2 + $0x1c8] sm:$0xff]  ;;  %v1287_v22 = vld [vmem:[#allocation2 + $0x3c0] sm:$0xff] }
 0x1db   : > { %5671 = vmatpush3.bf16.msra.mxu1 %v5668_v20  ;;  %v1288_v20 = vld [vmem:[#allocation2 + $0x3c8] sm:$0xff] }
 0x1dc   : > { %1420 = vmatmul.mubr.f32.gmra.mrb[56].mxu0 %v1255_v32  ;;  %1114 = vmatmul.mubr.f32.gmra.mrb[24].mxu1 %v949_v35  ;;  %v4423_v32 = vld [vmem:[%s7524_s4 + $0xd0] sm:$0xff]  ;;  %v4424_v35 = vld [vmem:[%s7524_s4 + $0xd8] sm:$0xff] }
 0x1dd   : > { %5758 = vmatpush1.bf16.msra.mxu0 %v6901_v8  ;;  %1424 = vmatprep.mubr.f32.mxu0 %v1258_v34  ;;  %v1271_v34 = vld [vmem:[#allocation2 + $0x340] sm:$0xff] }
 0x1de   : > { %5759 = vmatprep.subr.bf16.mxu0 %v6481_v33  ;;  %1118 = vmatprep.mubr.f32.mxu1 %v952_v36  ;;  %v965_v36 = vld [vmem:[#allocation2 + $0x140] sm:$0xff] }
 0x1df   : > { %5673 = vmatprep.subr.bf16.mxu1 %v5672_v30 }
 0x1e0   : > { %1425 = vmatmul.mubr.f32.gmra.mrb[58].mxu0 %v1257_v37  ;;  %1119 = vmatmul.mubr.f32.gmra.mrb[26].mxu1 %v951_v38  ;;  %v1274_v37 = vld [vmem:[#allocation2 + $0x358] sm:$0xff] }
 0x1e1   : > { %5761 = vmatpush1.bf16.msra.mxu0 %v6909_v16  ;;  %1429 = vmatprep.mubr.f32.mxu0 %v1260_v39  ;;  %v968_v38 = vld [vmem:[#allocation2 + $0x158] sm:$0xff]  ;;  %v5676_v39 = vpack.c.bf16 %v4424_v35, %v4423_v32  ;;  %v1292_v32 = vld [vmem:[#allocation2 + $0x3e8] sm:$0xff] }
 0x1e2   : > { %5762 = vmatprep.subr.bf16.mxu0 %v6481_v33  ;;  %1123 = vmatprep.mubr.f32.mxu1 %v954_v41  ;;  %v4425_v41 = vld [vmem:[%s7524_s4 + $0xe0] sm:$0xff]  ;;  %v986_v35 = vld [vmem:[#allocation2 + $0x1e8] sm:$0xff] }
 0x1e3   : > { %5675 = vmatpush3.bf16.msra.mxu1 %v5672_v30  ;;  %v983_v30 = vld [vmem:[#allocation2 + $0x1d0] sm:$0xff] }
 0x1e4   : > { %1430 = vmatmul.mubr.f32.gmra.mrb[60].mxu0 %v1259_v42  ;;  %1124 = vmatmul.mubr.f32.gmra.mrb[28].mxu1 %v953_v43  ;;  %v4426_v42 = vld [vmem:[%s7524_s4 + $0xe8] sm:$0xff]  ;;  %v1273_v43 = vld [vmem:[#allocation2 + $0x350] sm:$0xff] }
 0x1e5   : > { %5764 = vmatpush1.bf16.msra.mxu0 %v6917_v25  ;;  %1434 = vmatprep.mubr.f32.mxu0 %v1262_v44  ;;  %v967_v44 = vld [vmem:[#allocation2 + $0x150] sm:$0xff] }
 0x1e6   : > { %5765 = vmatprep.subr.bf16.mxu0 %v6481_v33  ;;  %1128 = vmatprep.mubr.f32.mxu1 %v956_v49  ;;  %v5680_v49 = vpack.c.bf16 %v4426_v42, %v4425_v41  ;;  %v987_v41 = vld [vmem:[#allocation2 + $0x1f0] sm:$0xff]  ;;  %v1989_v42 = vld [vmem:[#allocation2 + $0x408] sm:$0xff] }
 0x1e7   : > { %5677 = vmatprep.subr.bf16.mxu1 %v5676_v39 }
 0x1e8   : > { %1435 = vmatmul.mubr.f32.gmra.mrb[62].mxu0 %v1261_v51  ;;  %1129 = vmatmul.mubr.f32.gmra.mrb[30].mxu1 %v955_v52  ;;  %v4428_v51 = vld [vmem:[%s7524_s4 + $0xf8] sm:$0xff]  ;;  %v1275_v52 = vld [vmem:[#allocation2 + $0x360] sm:$0xff] }
 0x1e9   : > { %5767 = vmatpush1.bf16.msra.mxu0 %v6924_v29  ;;  %1439 = vmatprep.mubr.f32.mxu0 %v1264_v54  ;;  %v969_v54 = vld [vmem:[#allocation2 + $0x160] sm:$0xff]  ;;  %v5684_v58 = vpack.c.bf16 %v4428_v51, %v4427_v50  ;;  %v1995_v50 = vld [vmem:[#allocation2 + $0x438] sm:$0xff]  ;;  %v1994_v51 = vld [vmem:[#allocation2 + $0x430] sm:$0xff] }
 0x1ea   : > { %1133 = vmatprep.mubr.f32.mxu1 %v958_v55  ;;  %5800 = vmatprep.subr.bf16.mxu0 %v6481_v33  ;;  %v1278_v55 = vld [vmem:[#allocation2 + $0x378] sm:$0xff] }
 0x1eb   : > { %5679 = vmatpush3.bf16.msra.mxu1 %v5676_v39  ;;  %v1293_v39 = vld [vmem:[#allocation2 + $0x3f0] sm:$0xff] }
 0x1ec   : > { %1440 = vmatmul.mubr.f32.gmra.mrb[64].mxu0 %v1263_v59  ;;  %1134 = vmatmul.mubr.f32.gmra.mrb[32].mxu1 %v957_v61  ;;  %v1277_v59 = vld [vmem:[#allocation2 + $0x370] sm:$0xff] }
 0x1ed   : > { %1444 = vmatprep.mubr.f32.mxu0 %v1266_v62  ;;  %1138 = vmatprep.mubr.f32.mxu1 %v960_v63  ;;  %v971_v61 = vld [vmem:[#allocation2 + $0x170] sm:$0xff]  ;;  %v1280_v62 = vld [vmem:[#allocation2 + $0x388] sm:$0xff] }
 0x1ee   : > { %5681 = vmatprep.subr.bf16.mxu1 %v5680_v49  ;;  %v974_v63 = vld [vmem:[#allocation2 + $0x188] sm:$0xff] }
 0x1ef   : > { %5683 = vmatpush3.bf16.msra.mxu1 %v5680_v49  ;;  %v1992_v49 = vld [vmem:[#allocation2 + $0x420] sm:$0xff] }
 0x1f0   : > { %1445 = vmatmul.mubr.f32.gmra.mrb[66].mxu0 %v1265_v5  ;;  %1139 = vmatmul.mubr.f32.gmra.mrb[34].mxu1 %v959_v6  ;;  %v976_v5 = vld [vmem:[#allocation2 + $0x198] sm:$0xff]  ;;  %v1281_v6 = vld [vmem:[#allocation2 + $0x390] sm:$0xff] }
 0x1f1   : > { %1449 = vmatprep.mubr.f32.mxu0 %v1268_v7  ;;  %1143 = vmatprep.mubr.f32.mxu1 %v962_v9  ;;  %v975_v7 = vld [vmem:[#allocation2 + $0x190] sm:$0xff]  ;;  %v1284_v9 = vld [vmem:[#allocation2 + $0x3a8] sm:$0xff] }
 0x1f2   : > { %5685 = vmatprep.subr.bf16.mxu1 %v5684_v58 }
 0x1f3   : > { %5687 = vmatpush3.bf16.msra.mxu1 %v5684_v58  ;;  %v2004_v58 = vld [vmem:[#allocation2 + $0x480] sm:$0xff] }
 0x1f4   : > { %1450 = vmatmul.mubr.f32.gmra.mrb[68].mxu0 %v1267_v14  ;;  %1144 = vmatmul.mubr.f32.gmra.mrb[36].mxu1 %v961_v15  ;;  %v1286_v14 = vld [vmem:[#allocation2 + $0x3b8] sm:$0xff] }
 0x1f5   : > { %1454 = vmatprep.mubr.f32.mxu0 %v1270_v18  ;;  %1148 = vmatprep.mubr.f32.mxu1 %v964_v19  ;;  %v980_v15 = vld [vmem:[#allocation2 + $0x1b8] sm:$0xff]  ;;  %v1285_v18 = vld [vmem:[#allocation2 + $0x3b0] sm:$0xff] }
 0x1f6   : > { %v979_v19 = vld [vmem:[#allocation2 + $0x1b0] sm:$0xff] }
 0x1f8   : > { %1455 = vmatmul.mubr.f32.gmra.mrb[70].mxu0 %v1269_v23  ;;  %1149 = vmatmul.mubr.f32.gmra.mrb[38].mxu1 %v963_v26  ;;  %v981_v23 = vld [vmem:[#allocation2 + $0x1c0] sm:$0xff]  ;;  %v1290_v26 = vld [vmem:[#allocation2 + $0x3d8] sm:$0xff] }
 0x1f9   : > { %1459 = vmatprep.mubr.f32.mxu0 %v1272_v27  ;;  %1153 = vmatprep.mubr.f32.mxu1 %v966_v28  ;;  %v984_v27 = vld [vmem:[#allocation2 + $0x1d8] sm:$0xff]  ;;  %v1289_v28 = vld [vmem:[#allocation2 + $0x3d0] sm:$0xff] }
 0x1fc   : > { %1460 = vmatmul.mubr.f32.gmra.mrb[72].mxu0 %v1271_v34  ;;  %1154 = vmatmul.mubr.f32.gmra.mrb[40].mxu1 %v965_v36  ;;  %v1291_v34 = vld [vmem:[#allocation2 + $0x3e0] sm:$0xff] }
 0x1fd   : > { %1464 = vmatprep.mubr.f32.mxu0 %v1274_v37  ;;  %1158 = vmatprep.mubr.f32.mxu1 %v968_v38  ;;  %v985_v36 = vld [vmem:[#allocation2 + $0x1e0] sm:$0xff]  ;;  %v1294_v37 = vld [vmem:[#allocation2 + $0x3f8] sm:$0xff] }
 0x1fe   : > { %v988_v38 = vld [vmem:[#allocation2 + $0x1f8] sm:$0xff] }
 0x200   : > { %1465 = vmatmul.mubr.f32.gmra.mrb[74].mxu0 %v1273_v43  ;;  %1159 = vmatmul.mubr.f32.gmra.mrb[42].mxu1 %v967_v44  ;;  %v1988_v43 = vld [vmem:[#allocation2 + $0x400] sm:$0xff]  ;;  %v1991_v44 = vld [vmem:[#allocation2 + $0x418] sm:$0xff] }
 0x201   : > { %1469 = vmatprep.mubr.f32.mxu0 %v1276_v45  ;;  %1163 = vmatprep.mubr.f32.mxu1 %v970_v47  ;;  %v1990_v45 = vld [vmem:[#allocation2 + $0x410] sm:$0xff]  ;;  %v1993_v47 = vld [vmem:[#allocation2 + $0x428] sm:$0xff] }
 0x204   : > { %1470 = vmatmul.mubr.f32.gmra.mrb[76].mxu0 %v1275_v52  ;;  %1164 = vmatmul.mubr.f32.gmra.mrb[44].mxu1 %v969_v54  ;;  %v1996_v52 = vld [vmem:[#allocation2 + $0x440] sm:$0xff]  ;;  %v1998_v54 = vld [vmem:[#allocation2 + $0x450] sm:$0xff] }
 0x205   : > { %1474 = vmatprep.mubr.f32.mxu0 %v1278_v55  ;;  %1168 = vmatprep.mubr.f32.mxu1 %v972_v57  ;;  %v2000_v55 = vld [vmem:[#allocation2 + $0x460] sm:$0xff]  ;;  %v2002_v57 = vld [vmem:[#allocation2 + $0x470] sm:$0xff] }
 0x208   : > { %1475 = vmatmul.mubr.f32.gmra.mrb[78].mxu0 %v1277_v59  ;;  %1169 = vmatmul.mubr.f32.gmra.mrb[46].mxu1 %v971_v61  ;;  %v2006_v59 = vld [vmem:[#allocation2 + $0x490] sm:$0xff]  ;;  %v2008_v61 = vld [vmem:[#allocation2 + $0x4a0] sm:$0xff] }
 0x209   : > { %1479 = vmatprep.mubr.f32.mxu0 %v1280_v62  ;;  %1173 = vmatprep.mubr.f32.mxu1 %v974_v63  ;;  %v2010_v62 = vld [vmem:[#allocation2 + $0x4b0] sm:$0xff]  ;;  %v2012_v63 = vld [vmem:[#allocation2 + $0x4c0] sm:$0xff] }
 0x20c   : > { %1480 = vmatmul.mubr.f32.gmra.mrb[80].mxu0 %v1279_v1  ;;  %1174 = vmatmul.mubr.f32.gmra.mrb[48].mxu1 %v973_v2  ;;  %v2014_v1 = vld [vmem:[#allocation2 + $0x4d0] sm:$0xff]  ;;  %v1214_v2 = vld [vmem:[%s7524_s4] sm:$0xff] }
 0x20d   : > { %1484 = vmatprep.mubr.f32.mxu0 %v1282_v4  ;;  %1178 = vmatprep.mubr.f32.mxu1 %v976_v5  ;;  %v2016_v5 = vld [vmem:[#allocation2 + $0x4e0] sm:$0xff] }
 0x210   : > { %1485 = vmatmul.mubr.f32.gmra.mrb[82].mxu0 %v1281_v6  ;;  %1179 = vmatmul.mubr.f32.gmra.mrb[50].mxu1 %v975_v7  ;;  %v2018_v6 = vld [vmem:[#allocation2 + $0x4f0] sm:$0xff]  ;;  %v2021_v7 = vld [vmem:[#allocation2 + $0x508] sm:$0xff] }
 0x211   : > { %1489 = vmatprep.mubr.f32.mxu0 %v1284_v9  ;;  %1183 = vmatprep.mubr.f32.mxu1 %v978_v11  ;;  %v2020_v9 = vld [vmem:[#allocation2 + $0x500] sm:$0xff]  ;;  %v2022_v11 = vld [vmem:[#allocation2 + $0x510] sm:$0xff] }
 0x214   : > { %1490 = vmatmul.mubr.f32.gmra.mrb[84].mxu0 %v1283_v12  ;;  %1184 = vmatmul.mubr.f32.gmra.mrb[52].mxu1 %v977_v13  ;;  %v2025_v12 = vld [vmem:[#allocation2 + $0x528] sm:$0xff]  ;;  %v2024_v13 = vld [vmem:[#allocation2 + $0x520] sm:$0xff] }
 0x215   : > { %1494 = vmatprep.mubr.f32.mxu0 %v1286_v14  ;;  %1188 = vmatprep.mubr.f32.mxu1 %v980_v15  ;;  %v2027_v14 = vld [vmem:[#allocation2 + $0x538] sm:$0xff]  ;;  %v2029_v15 = vld [vmem:[#allocation2 + $0x548] sm:$0xff] }
 0x218   : > { %1495 = vmatmul.mubr.f32.gmra.mrb[86].mxu0 %v1285_v18  ;;  %1189 = vmatmul.mubr.f32.gmra.mrb[54].mxu1 %v979_v19  ;;  %v2031_v18 = vld [vmem:[#allocation2 + $0x558] sm:$0xff]  ;;  %v2033_v19 = vld [vmem:[#allocation2 + $0x568] sm:$0xff] }
 0x219   : > { %1499 = vmatprep.mubr.f32.mxu0 %v1288_v20  ;;  %1193 = vmatprep.mubr.f32.mxu1 %v982_v21 }
 0x21c   : > { %1500 = vmatmul.mubr.f32.gmra.mrb[88].mxu0 %v1287_v22  ;;  %1194 = vmatmul.mubr.f32.gmra.mrb[56].mxu1 %v981_v23  ;;  %v1216_v22 = vld [vmem:[%s7524_s4 + $0x10] sm:$0xff]  ;;  %v1217_v23 = vld [vmem:[%s7524_s4 + $0x18] sm:$0xff] }
 0x21d   : > { %1504 = vmatprep.mubr.f32.mxu0 %v1290_v26  ;;  %1198 = vmatprep.mubr.f32.mxu1 %v984_v27 }
 0x220   : > { %1505 = vmatmul.mubr.f32.gmra.mrb[90].mxu0 %v1289_v28  ;;  %1199 = vmatmul.mubr.f32.gmra.mrb[58].mxu1 %v983_v30  ;;  %v2032_v28 = vld [vmem:[#allocation2 + $0x560] sm:$0xff]  ;;  %v2035_v30 = vld [vmem:[#allocation2 + $0x578] sm:$0xff] }
 0x221   : > { %1509 = vmatprep.mubr.f32.mxu0 %v1292_v32  ;;  %1203 = vmatprep.mubr.f32.mxu1 %v986_v35  ;;  %v5692_v32 = vpack.c.bf16 %v1217_v23, %v1216_v22 }
 0x224   : > { %1510 = vmatmul.mubr.f32.gmra.mrb[92].mxu0 %v1291_v34  ;;  %1204 = vmatmul.mubr.f32.gmra.mrb[60].mxu1 %v985_v36  ;;  %v1218_v36 = vld [vmem:[%s7524_s4 + $0x20] sm:$0xff] }
 0x225   : > { %1514 = vmatprep.mubr.f32.mxu0 %v1294_v37  ;;  %1208 = vmatprep.mubr.f32.mxu1 %v988_v38  ;;  %v1219_v37 = vld [vmem:[%s7524_s4 + $0x28] sm:$0xff] }
 0x228   : > { %1515 = vmatmul.mubr.f32.gmra.mrb[94].mxu0 %v1293_v39  ;;  %1209 = vmatmul.mubr.f32.gmra.mrb[62].mxu1 %v987_v41  ;;  %v2034_v41 = vld [vmem:[#allocation2 + $0x570] sm:$0xff] }
 0x229   : > { %2116 = vmatprep.mubr.f32.mxu0 %v1989_v42  ;;  %v2037_v42 = vld [vmem:[#allocation2 + $0x588] sm:$0xff] }
 0x22c   : > { %2117 = vmatmul.mubr.f32.vlgmr.msra.gmra.mrb[96].mxu0 %v1988_v43  ;;  %v5696_v43 = vpack.c.bf16 %v1219_v37, %v1218_v36 }
 0x22d   : > { %5802 = vmatpush1.bf16.msra.mxu0 %v6805_v46  ;;  %2121 = vmatprep.mubr.f32.mxu0 %v1991_v44  ;;  %v1997_v46 = vld [vmem:[#allocation2 + $0x448] sm:$0xff] }
 0x22e   : > { %5803 = vmatprep.subr.bf16.mxu0 %v6481_v33 }
 0x230   : > { %2122 = vmatmul.mubr.f32.gmra.mrb[98].mxu0 %v1990_v45 }
 0x231   : > { %5805 = vmatpush1.bf16.msra.mxu0 %v6813_v53  ;;  %2126 = vmatprep.mubr.f32.mxu0 %v1993_v47  ;;  %v1999_v53 = vld [vmem:[#allocation2 + $0x458] sm:$0xff]  ;;  %v1220_v47 = vld [vmem:[%s7524_s4 + $0x30] sm:$0xff] }
 0x232   : > { %5806 = vmatprep.subr.bf16.mxu0 %v6481_v33 }
 0x234   : > { %2127 = vmatmul.mubr.f32.gmra.mrb[100].mxu0 %v1992_v49  ;;  %v1221_v49 = vld [vmem:[%s7524_s4 + $0x38] sm:$0xff] }
 0x235   : > { %5808 = vmatpush1.bf16.msra.mxu0 %v6821_v60  ;;  %2131 = vmatprep.mubr.f32.mxu0 %v1995_v50  ;;  %v2001_v60 = vld [vmem:[#allocation2 + $0x468] sm:$0xff] }
 0x236   : > { %5809 = vmatprep.subr.bf16.mxu0 %v6481_v33 }
 0x238   : > { %2132 = vmatmul.mubr.f32.gmra.mrb[102].mxu0 %v1994_v51 }
 0x239   : > { %5811 = vmatpush1.bf16.msra.mxu0 %v6829_v3  ;;  %2136 = vmatprep.mubr.f32.mxu0 %v1997_v46  ;;  %v2003_v3 = vld [vmem:[#allocation2 + $0x478] sm:$0xff]  ;;  %v2036_v46 = vld [vmem:[#allocation2 + $0x580] sm:$0xff] }
 0x23a   : > { %5812 = vmatprep.subr.bf16.mxu0 %v6481_v33 }
 0x23c   : > { %2137 = vmatmul.mubr.f32.gmra.mrb[104].mxu0 %v1996_v52  ;;  %v2039_v52 = vld [vmem:[#allocation2 + $0x598] sm:$0xff] }
 0x23d   : > { %5814 = vmatpush1.bf16.msra.mxu0 %v6837_v10  ;;  %2141 = vmatprep.mubr.f32.mxu0 %v1999_v53  ;;  %v2005_v10 = vld [vmem:[#allocation2 + $0x488] sm:$0xff]  ;;  %v5700_v53 = vpack.c.bf16 %v1221_v49, %v1220_v47  ;;  %v2050_v49 = vld [vmem:[#allocation2 + $0x5f0] sm:$0xff] }
 0x23e   : > { %5815 = vmatprep.subr.bf16.mxu0 %v6481_v33 }
 0x240   : > { %2142 = vmatmul.mubr.f32.gmra.mrb[106].mxu0 %v1998_v54 }
 0x241   : > { %5817 = vmatpush1.bf16.msra.mxu0 %v6845_v17  ;;  %2146 = vmatprep.mubr.f32.mxu0 %v2001_v60  ;;  %v2007_v17 = vld [vmem:[#allocation2 + $0x498] sm:$0xff] }
 0x242   : > { %5818 = vmatprep.subr.bf16.mxu0 %v6481_v33 }
 0x244   : > { %2147 = vmatmul.mubr.f32.gmra.mrb[108].mxu0 %v2000_v55  ;;  %v1222_v55 = vld [vmem:[%s7524_s4 + $0x40] sm:$0xff] }
 0x245   : > { %5820 = vmatpush1.bf16.msra.mxu0 %v6853_v24  ;;  %2151 = vmatprep.mubr.f32.mxu0 %v2003_v3  ;;  %v2009_v24 = vld [vmem:[#allocation2 + $0x4a8] sm:$0xff] }
 0x246   : > { %5821 = vmatprep.subr.bf16.mxu0 %v6481_v33  ;;  %v1223_v3 = vld [vmem:[%s7524_s4 + $0x48] sm:$0xff] }
 0x248   : > { %2152 = vmatmul.mubr.f32.gmra.mrb[110].mxu0 %v2002_v57 }
 0x249   : > { %5823 = vmatpush1.bf16.msra.mxu0 %v6861_v31  ;;  %2156 = vmatprep.mubr.f32.mxu0 %v2005_v10  ;;  %v2011_v31 = vld [vmem:[#allocation2 + $0x4b8] sm:$0xff] }
 0x24a   : > { %5824 = vmatprep.subr.bf16.mxu0 %v6481_v33 }
 0x24c   : > { %2157 = vmatmul.mubr.f32.gmra.mrb[112].mxu0 %v2004_v58  ;;  %v2038_v58 = vld [vmem:[#allocation2 + $0x590] sm:$0xff] }
 0x24d   : > { %5826 = vmatpush1.bf16.msra.mxu0 %v6869_v40  ;;  %2161 = vmatprep.mubr.f32.mxu0 %v2007_v17  ;;  %v2013_v40 = vld [vmem:[#allocation2 + $0x4c8] sm:$0xff] }
 0x24e   : > { %5827 = vmatprep.subr.bf16.mxu0 %v6481_v33  ;;  %v2041_v17 = vld [vmem:[#allocation2 + $0x5a8] sm:$0xff] }
 0x250   : > { %2162 = vmatmul.mubr.f32.gmra.mrb[114].mxu0 %v2006_v59  ;;  %v5704_v59 = vpack.c.bf16 %v1223_v3, %v1222_v55  ;;  %v2555_v55 = vld [vmem:[#allocation2 + $0x618] sm:$0xff] }
 0x251   : > { %5829 = vmatpush1.bf16.msra.mxu0 %v6877_v48  ;;  %2166 = vmatprep.mubr.f32.mxu0 %v2009_v24  ;;  %v2015_v48 = vld [vmem:[#allocation2 + $0x4d8] sm:$0xff] }
 0x252   : > { %5830 = vmatprep.subr.bf16.mxu0 %v6481_v33 }
 0x254   : > { %2167 = vmatmul.mubr.f32.gmra.mrb[116].mxu0 %v2008_v61 }
 0x255   : > { %5832 = vmatpush1.bf16.msra.mxu0 %v6885_v56  ;;  %2171 = vmatprep.mubr.f32.mxu0 %v2011_v31  ;;  %v2017_v56 = vld [vmem:[#allocation2 + $0x4e8] sm:$0xff]  ;;  %v1224_v31 = vld [vmem:[%s7524_s4 + $0x50] sm:$0xff] }
 0x256   : > { %5833 = vmatprep.subr.bf16.mxu0 %v6481_v33 }
 0x258   : > { %2172 = vmatmul.mubr.f32.gmra.mrb[118].mxu0 %v2010_v62  ;;  %v1225_v62 = vld [vmem:[%s7524_s4 + $0x58] sm:$0xff] }
 0x259   : > { %5835 = vmatpush1.bf16.msra.mxu0 %v6893_v0  ;;  %2176 = vmatprep.mubr.f32.mxu0 %v2013_v40  ;;  %v1215_v0 = vld [vmem:[%s7524_s4 + $0x8] sm:$0xff] }
 0x25a   : > { %5836 = vmatprep.subr.bf16.mxu0 %v6481_v33  ;;  %v5688_v4 = vpack.c.bf16 %v1215_v0, %v1214_v2 }
 0x25c   : > { %2177 = vmatmul.mubr.f32.gmra.mrb[120].mxu0 %v2012_v63  ;;  %5689 = vmatprep.subr.bf16.mxu1 %v5688_v4 }
 0x25d   : > { %5838 = vmatpush1.bf16.msra.mxu0 %v6901_v8  ;;  %2181 = vmatprep.mubr.f32.mxu0 %v2015_v48  ;;  %v2019_v8 = vld [vmem:[#allocation2 + $0x4f8] sm:$0xff]  ;;  %v2040_v48 = vld [vmem:[#allocation2 + $0x5a0] sm:$0xff] }
 0x25e   : > { %5839 = vmatprep.subr.bf16.mxu0 %v6481_v33 }
 0x260   : > { %2182 = vmatmul.mubr.f32.gmra.mrb[122].mxu0 %v2014_v1  ;;  %v2043_v1 = vld [vmem:[#allocation2 + $0x5b8] sm:$0xff] }
 0x261   : > { %5841 = vmatpush1.bf16.msra.mxu0 %v6909_v16  ;;  %2186 = vmatprep.mubr.f32.mxu0 %v2017_v56  ;;  %v2023_v16 = vld [vmem:[#allocation2 + $0x518] sm:$0xff]  ;;  %v5708_v56 = vpack.c.bf16 %v1225_v62, %v1224_v31 }
 0x262   : > { %5842 = vmatprep.subr.bf16.mxu0 %v6481_v33 }
 0x264   : > { %2187 = vmatmul.mubr.f32.gmra.mrb[124].mxu0 %v2016_v5  ;;  %v1227_v5 = vld [vmem:[%s7524_s4 + $0x68] sm:$0xff] }
 0x265   : > { %5844 = vmatpush1.bf16.msra.mxu0 %v6917_v25  ;;  %2191 = vmatprep.mubr.f32.mxu0 %v2019_v8  ;;  %v2026_v25 = vld [vmem:[#allocation2 + $0x530] sm:$0xff] }
 0x266   : > { %5845 = vmatprep.subr.bf16.mxu0 %v6481_v33  ;;  %v2028_v33 = vld [vmem:[#allocation2 + $0x540] sm:$0xff] }
 0x268   : > { %2192 = vmatmul.mubr.f32.gmra.mrb[126].mxu0 %v2018_v6 }
 0x269   : > { %5847 = vmatpush1.bf16.msra.mxu0 %v6924_v29  ;;  %2196 = vmatprep.mubr.f32.mxu0 %v2021_v7  ;;  %v2030_v29 = vld [vmem:[#allocation2 + $0x550] sm:$0xff] }
 0x26a   : > { %v2042_v7 = vld [vmem:[#allocation2 + $0x5b0] sm:$0xff] }
 0x26c   : > { %2197 = vmatmul.mubr.f32.gmra.mrb[128].mxu0 %v2020_v9  ;;  %v2045_v9 = vld [vmem:[#allocation2 + $0x5c8] sm:$0xff] }
 0x26d   : > { %2201 = vmatprep.mubr.f32.mxu0 %v2023_v16 }
 0x270   : > { %2202 = vmatmul.mubr.f32.gmra.mrb[130].mxu0 %v2022_v11 }
 0x271   : > { %2206 = vmatprep.mubr.f32.mxu0 %v2025_v12 }
 0x274   : > { %2207 = vmatmul.mubr.f32.gmra.mrb[132].mxu0 %v2024_v13  ;;  %v1228_v13 = vld [vmem:[%s7524_s4 + $0x70] sm:$0xff] }
 0x275   : > { %2211 = vmatprep.mubr.f32.mxu0 %v2027_v14  ;;  %v1229_v14 = vld [vmem:[%s7524_s4 + $0x78] sm:$0xff] }
 0x278   : > { %2212 = vmatmul.mubr.f32.gmra.mrb[134].mxu0 %v2026_v25 }
 0x279   : > { %2216 = vmatprep.mubr.f32.mxu0 %v2029_v15 }
 0x27c   : > { %2217 = vmatmul.mubr.f32.gmra.mrb[136].mxu0 %v2028_v33  ;;  %v2044_v33 = vld [vmem:[#allocation2 + $0x5c0] sm:$0xff] }
 0x27d   : > { %2221 = vmatprep.mubr.f32.mxu0 %v2031_v18  ;;  %v2047_v18 = vld [vmem:[#allocation2 + $0x5d8] sm:$0xff] }
 0x27f   : > { %v1361_v20 = vpop.f32.mrb[32].mxu0  ;;  %v7046_v21 = vpop.f32.mrb[0].mxu1 }
 0x280   : > { %v1363_v26 = vpop.f32.mrb[33].mxu0  ;;  %5096 = vmatprep.mubr.f32.mxu1 %v1361_v20  ;;  %2222 = vmatmul.mubr.f32.gmra.mrb[138].mxu0 %v2030_v29  ;;  %v1057_v27 = vpop.f32.mrb[1].mxu1  ;;  %v5716_v29 = vpack.c.bf16 %v1229_v14, %v1228_v13  ;;  %v2563_v13 = vld [vmem:[#allocation2 + $0x658] sm:$0xff] }
 0x281   : > { %2226 = vmatprep.mubr.f32.mxu0 %v2033_v19  ;;  %v2046_v26 = vld [vmem:[#allocation2 + $0x5d0] sm:$0xff]  ;;  %v2049_v27 = vld [vmem:[#allocation2 + $0x5e8] sm:$0xff] }
 0x283   : > { %v1366_v35 = vpop.f32.mrb[34].mxu0  ;;  %v7054_v34 = vpop.f32.mrb[2].mxu1 }
 0x284   : > { %v1368_v38 = vpop.f32.mrb[35].mxu0  ;;  %5097 = vmatmul.mubr.f32.vlgmr.msra.gmra.mrb[64].mxu1 %v1366_v35  ;;  %2227 = vmatmul.mubr.f32.gmra.mrb[140].mxu0 %v2032_v28  ;;  %v1062_v39 = vpop.f32.mrb[3].mxu1  ;;  %v4429_v28 = vld [vmem:[%s7524_s4 + $0x100] sm:$0xff] }
 0x285   : > { %2231 = vmatprep.mubr.f32.mxu0 %v2035_v30  ;;  %5691 = vmatpush3.bf16.msra.mxu1 %v5688_v4  ;;  %v1226_v4 = vld [vmem:[%s7524_s4 + $0x60] sm:$0xff]  ;;  %v4430_v30 = vld [vmem:[%s7524_s4 + $0x108] sm:$0xff] }
 0x286   : > { %5693 = vmatprep.subr.bf16.mxu1 %v5692_v32  ;;  %v5712_v16 = vpack.c.bf16 %v1227_v5, %v1226_v4  ;;  %v7112_v36 = vpack.c.bf16 %v4430_v30, %v4429_v28  ;;  %v2048_v39 = vld [vmem:[#allocation2 + $0x5e0] sm:$0xff]  ;;  %v2558_v5 = vld [vmem:[#allocation2 + $0x630] sm:$0xff]  ;;  %v2567_v28 = vld [vmem:[#allocation2 + $0x678] sm:$0xff] }
 0x287   : > { %v1371_v44 = vpop.f32.mrb[36].mxu0  ;;  %v7062_v45 = vpop.f32.mrb[4].mxu1 }
 0x288   : > { %v1373_v50 = vpop.f32.mrb[37].mxu0  ;;  %5099 = vmatprep.mubr.f32.mxu1 %v1371_v44  ;;  %2232 = vmatmul.mubr.f32.gmra.mrb[142].mxu0 %v2034_v41  ;;  %v1067_v51 = vpop.f32.mrb[5].mxu1  ;;  %v2051_v41 = vld [vmem:[#allocation2 + $0x5f8] sm:$0xff] }
 0x289   : > { %2236 = vmatprep.mubr.f32.mxu0 %v2037_v42  ;;  %5695 = vmatpush3.bf16.msra.mxu1 %v5692_v32  ;;  %v2553_v50 = vld [vmem:[#allocation2 + $0x608] sm:$0xff] }
 0x28a   : > { %5697 = vmatprep.subr.bf16.mxu1 %v5696_v43 }
 0x28b   : > { %v1376_v54 = vpop.f32.mrb[38].mxu0  ;;  %v7070_v60 = vpop.f32.mrb[6].mxu1 }
 0x28c   : > { %v1378_v57 = vpop.f32.mrb[39].mxu0  ;;  %5100 = vmatmul.mubr.f32.gmra.mrb[66].mxu1 %v1376_v54  ;;  %2237 = vmatmul.mubr.f32.gmra.mrb[144].mxu0 %v2036_v46  ;;  %v1072_v10 = vpop.f32.mrb[7].mxu1  ;;  %v2552_v54 = vld [vmem:[#allocation2 + $0x600] sm:$0xff] }
 0x28d   : > { %2241 = vmatprep.mubr.f32.mxu0 %v2039_v52  ;;  %5699 = vmatpush3.bf16.msra.mxu1 %v5696_v43 }
 0x28e   : > { %5701 = vmatprep.subr.bf16.mxu1 %v5700_v53 }
 0x28f   : > { %v1381_v24 = vpop.f32.mrb[40].mxu0  ;;  %v7078_v61 = vpop.f32.mrb[8].mxu1 }
 0x290   : > { %v1383_v40 = vpop.f32.mrb[41].mxu0  ;;  %5102 = vmatprep.mubr.f32.mxu1 %v1381_v24  ;;  %2242 = vmatmul.mubr.f32.gmra.mrb[146].mxu0 %v2038_v58  ;;  %v1077_v63 = vpop.f32.mrb[9].mxu1 }
 0x291   : > { %2246 = vmatprep.mubr.f32.mxu0 %v2041_v17  ;;  %5703 = vmatpush3.bf16.msra.mxu1 %v5700_v53  ;;  %v2554_v17 = vld [vmem:[#allocation2 + $0x610] sm:$0xff]  ;;  %v2556_v63 = vld [vmem:[#allocation2 + $0x620] sm:$0xff] }
 0x292   : > { %5705 = vmatprep.subr.bf16.mxu1 %v5704_v59 }
 0x293   : > { %v1386_v2 = vpop.f32.mrb[42].mxu0  ;;  %v7086_v0 = vpop.f32.mrb[10].mxu1 }
 0x294   : > { %v1388_v8 = vpop.f32.mrb[43].mxu0  ;;  %5103 = vmatmul.mubr.f32.gmra.mrb[68].mxu1 %v1386_v2  ;;  %2247 = vmatmul.mubr.f32.gmra.mrb[148].mxu0 %v2040_v48  ;;  %v1082_v6 = vpop.f32.mrb[11].mxu1  ;;  %v2559_v48 = vld [vmem:[#allocation2 + $0x638] sm:$0xff] }
 0x295   : > { %2251 = vmatprep.mubr.f32.mxu0 %v2043_v1  ;;  %5707 = vmatpush3.bf16.msra.mxu1 %v5704_v59  ;;  %v2557_v59 = vld [vmem:[#allocation2 + $0x628] sm:$0xff] }
 0x296   : > { %5709 = vmatprep.subr.bf16.mxu1 %v5708_v56  ;;  %v2561_v8 = vld [vmem:[#allocation2 + $0x648] sm:$0xff] }
 0x297   : > { %v1391_v11 = vpop.f32.mrb[44].mxu0  ;;  %v7094_v12 = vpop.f32.mrb[12].mxu1 }
 0x298   : > { %v1393_v25 = vpop.f32.mrb[45].mxu0  ;;  %5105 = vmatprep.mubr.f32.mxu1 %v1391_v11  ;;  %2252 = vmatmul.mubr.f32.gmra.mrb[150].mxu0 %v2042_v7  ;;  %v1087_v15 = vpop.f32.mrb[13].mxu1  ;;  %v2560_v11 = vld [vmem:[#allocation2 + $0x640] sm:$0xff] }
 0x299   : > { %2256 = vmatprep.mubr.f32.mxu0 %v2045_v9  ;;  %5711 = vmatpush3.bf16.msra.mxu1 %v5708_v56 }
 0x29a   : > { %5713 = vmatprep.subr.bf16.mxu1 %v5712_v16 }
 0x29b   : > { %v1396_v19 = vpop.f32.mrb[46].mxu0  ;;  %v7102_v20 = vpop.f32.mrb[14].mxu1 }
 0x29c   : > { %v1398_v22 = vpop.f32.mrb[47].mxu0  ;;  %5106 = vmatmul.mubr.f32.gmra.mrb[70].mxu1 %v1396_v19  ;;  %2257 = vmatmul.mubr.f32.gmra.mrb[152].mxu0 %v2044_v33  ;;  %v1092_v23 = vpop.f32.mrb[15].mxu1 }
 0x29d   : > { %2261 = vmatprep.mubr.f32.mxu0 %v2047_v18  ;;  %5715 = vmatpush3.bf16.msra.mxu1 %v5712_v16  ;;  %v2562_v18 = vld [vmem:[#allocation2 + $0x650] sm:$0xff] }
 0x29e   : > { %5717 = vmatprep.subr.bf16.mxu1 %v5716_v29 }
 0x29f   : > { %v1401_v32 = vpop.f32.mrb[48].mxu0  ;;  %v7110_v35 = vpop.f32.mrb[16].mxu1 }
 0x2a0   : > { %v1403_v37 = vpop.f32.mrb[49].mxu0  ;;  %5108 = vmatprep.mubr.f32.mxu1 %v1401_v32  ;;  %2262 = vmatmul.mubr.f32.gmra.mrb[154].mxu0 %v2046_v26  ;;  %v1097_v38 = vpop.f32.mrb[17].mxu1 }
 0x2a1   : > { %2266 = vmatprep.mubr.f32.mxu0 %v2049_v27  ;;  %5719 = vmatpush3.bf16.msra.mxu1 %v5716_v29  ;;  %v2565_v29 = vld [vmem:[#allocation2 + $0x668] sm:$0xff]  ;;  %v2564_v27 = vld [vmem:[#allocation2 + $0x660] sm:$0xff] }
 0x2a2   : > { %5769 = vmatprep.subr.bf16.mxu1 %v7112_v36 }
 0x2a3   : > { %v1406_v42 = vpop.f32.mrb[50].mxu0  ;;  %v7115_v43 = vpop.f32.mrb[18].mxu1 }
 0x2a4   : > { %v1408_v44 = vpop.f32.mrb[51].mxu0  ;;  %5109 = vmatmul.mubr.f32.gmra.mrb[72].mxu1 %v1406_v42  ;;  %2267 = vmatmul.mubr.f32.gmra.mrb[156].mxu0 %v2048_v39  ;;  %v1102_v47 = vpop.f32.mrb[19].mxu1  ;;  %v2566_v39 = vld [vmem:[#allocation2 + $0x670] sm:$0xff] }
 0x2a5   : > { %2271 = vmatprep.mubr.f32.mxu0 %v2051_v41  ;;  %v2569_v41 = vld [vmem:[#allocation2 + $0x688] sm:$0xff] }
 0x2a7   : > { %v1411_v51 = vpop.f32.mrb[52].mxu0  ;;  %v7117_v46 = vpop.f32.mrb[20].mxu1 }
 0x2a8   : > { %v1413_v52 = vpop.f32.mrb[53].mxu0  ;;  %5111 = vmatprep.mubr.f32.mxu1 %v1411_v51  ;;  %2272 = vmatmul.mubr.f32.gmra.mrb[158].mxu0 %v2050_v49  ;;  %v1107_v53 = vpop.f32.mrb[21].mxu1  ;;  %v2571_v51 = vld [vmem:[#allocation2 + $0x698] sm:$0xff] }
 0x2a9   : > { %2680 = vmatprep.mubr.f32.mxu0 %v2553_v50  ;;  %v2568_v50 = vld [vmem:[#allocation2 + $0x680] sm:$0xff] }
 0x2ab   : > { %v1416_v3 = vpop.f32.mrb[54].mxu0  ;;  %v7119_v57 = vpop.f32.mrb[22].mxu1 }
 0x2ac   : > { %v1418_v10 = vpop.f32.mrb[55].mxu0  ;;  %5112 = vmatmul.mubr.f32.gmra.mrb[74].mxu1 %v1416_v3  ;;  %2681 = vmatmul.mubr.f32.vlgmr.msra.gmra.mrb[160].mxu0 %v2552_v54  ;;  %v1112_v58 = vpop.f32.mrb[23].mxu1  ;;  %v2570_v3 = vld [vmem:[#allocation2 + $0x690] sm:$0xff] }
 0x2ad   : > { %2685 = vmatprep.mubr.f32.mxu0 %v2555_v55  ;;  %v2573_v10 = vld [vmem:[#allocation2 + $0x6a8] sm:$0xff] }
 0x2af   : > { %v1421_v24 = vpop.f32.mrb[56].mxu0  ;;  %v7121_v31 = vpop.f32.mrb[24].mxu1 }
 0x2b0   : > { %v1423_v62 = vpop.f32.mrb[57].mxu0  ;;  %5114 = vmatprep.mubr.f32.mxu1 %v1421_v24  ;;  %2686 = vmatmul.mubr.f32.gmra.mrb[162].mxu0 %v2554_v17  ;;  %v1117_v40 = vpop.f32.mrb[25].mxu1 }
 0x2b1   : > { %2690 = vmatprep.mubr.f32.mxu0 %v2557_v59  ;;  %v2572_v62 = vld [vmem:[#allocation2 + $0x6a0] sm:$0xff]  ;;  %v2575_v40 = vld [vmem:[#allocation2 + $0x6b8] sm:$0xff] }
 0x2b3   : > { %v1426_v1 = vpop.f32.mrb[58].mxu0  ;;  %v7123_v56 = vpop.f32.mrb[26].mxu1 }
 0x2b4   : > { %v1428_v2 = vpop.f32.mrb[59].mxu0  ;;  %5115 = vmatmul.mubr.f32.gmra.mrb[76].mxu1 %v1426_v1  ;;  %2691 = vmatmul.mubr.f32.gmra.mrb[164].mxu0 %v2556_v63  ;;  %v1122_v4 = vpop.f32.mrb[27].mxu1 }
 0x2b5   : > { %2695 = vmatprep.mubr.f32.mxu0 %v2559_v48  ;;  %v2574_v4 = vld [vmem:[#allocation2 + $0x6b0] sm:$0xff] }
 0x2b7   : > { %v1431_v6 = vpop.f32.mrb[60].mxu0  ;;  %v7125_v7 = vpop.f32.mrb[28].mxu1 }
 0x2b8   : > { %v1433_v9 = vpop.f32.mrb[61].mxu0  ;;  %5117 = vmatprep.mubr.f32.mxu1 %v1431_v6  ;;  %2696 = vmatmul.mubr.f32.gmra.mrb[166].mxu0 %v2558_v5  ;;  %v1127_v16 = vpop.f32.mrb[29].mxu1  ;;  %v2577_v5 = vld [vmem:[#allocation2 + $0x6c8] sm:$0xff] }
 0x2b9   : > { %2700 = vmatprep.mubr.f32.mxu0 %v2561_v8 }
 0x2bb   : > { %v1436_v14 = vpop.f32.mrb[62].mxu0  ;;  %v7127_v25 = vpop.f32.mrb[30].mxu1 }
 0x2bc   : > { %v1438_v15 = vpop.f32.mrb[63].mxu0  ;;  %5118 = vmatmul.mubr.f32.gmra.mrb[78].mxu1 %v1436_v14  ;;  %2701 = vmatmul.mubr.f32.gmra.mrb[168].mxu0 %v2560_v11  ;;  %v1132_v33 = vpop.f32.mrb[31].mxu1  ;;  %v2576_v11 = vld [vmem:[#allocation2 + $0x6c0] sm:$0xff] }
 0x2bd   : > { %2705 = vmatprep.mubr.f32.mxu0 %v2563_v13  ;;  %v2579_v13 = vld [vmem:[#allocation2 + $0x6d8] sm:$0xff] }
 0x2bf   : > { %v1441_v19 = vpop.f32.mrb[64].mxu0  ;;  %v7129_v22 = vpop.f32.mrb[32].mxu1 }
 0x2c0   : > { %v1443_v23 = vpop.f32.mrb[65].mxu0  ;;  %5120 = vmatprep.mubr.f32.mxu1 %v1441_v19  ;;  %2706 = vmatmul.mubr.f32.gmra.mrb[170].mxu0 %v2562_v18  ;;  %v1137_v26 = vpop.f32.mrb[33].mxu1  ;;  %v2581_v19 = vld [vmem:[#allocation2 + $0x6e8] sm:$0xff] }
 0x2c1   : > { %2710 = vmatprep.mubr.f32.mxu0 %v2565_v29  ;;  %v2578_v29 = vld [vmem:[#allocation2 + $0x6d0] sm:$0xff] }
 0x2c3   : > { %v1446_v30 = vpop.f32.mrb[66].mxu0  ;;  %v7131_v32 = vpop.f32.mrb[34].mxu1 }
 0x2c4   : > { %v1448_v37 = vpop.f32.mrb[67].mxu0  ;;  %5121 = vmatmul.mubr.f32.gmra.mrb[80].mxu1 %v1446_v30  ;;  %2711 = vmatmul.mubr.f32.gmra.mrb[172].mxu0 %v2564_v27  ;;  %v1142_v38 = vpop.f32.mrb[35].mxu1  ;;  %v2580_v30 = vld [vmem:[#allocation2 + $0x6e0] sm:$0xff] }
 0x2c5   : > { %2715 = vmatprep.mubr.f32.mxu0 %v2567_v28  ;;  %v2583_v37 = vld [vmem:[#allocation2 + $0x6f8] sm:$0xff] }
 0x2c7   : > { %v1451_v42 = vpop.f32.mrb[68].mxu0  ;;  %v7133_v44 = vpop.f32.mrb[36].mxu1 }
 0x2c8   : > { %v1453_v47 = vpop.f32.mrb[69].mxu0  ;;  %5123 = vmatprep.mubr.f32.mxu1 %v1451_v42  ;;  %2716 = vmatmul.mubr.f32.gmra.mrb[174].mxu0 %v2566_v39  ;;  %v1147_v49 = vpop.f32.mrb[37].mxu1 }
 0x2c9   : > { %2720 = vmatprep.mubr.f32.mxu0 %v2569_v41  ;;  %v2582_v47 = vld [vmem:[#allocation2 + $0x6f0] sm:$0xff]  ;;  %v2585_v49 = vld [vmem:[#allocation2 + $0x708] sm:$0xff] }
 0x2cb   : > { %v1456_v52 = vpop.f32.mrb[70].mxu0  ;;  %v7135_v53 = vpop.f32.mrb[38].mxu1 }
 0x2cc   : > { %v1458_v54 = vpop.f32.mrb[71].mxu0  ;;  %5124 = vmatmul.mubr.f32.gmra.mrb[82].mxu1 %v1456_v52  ;;  %2721 = vmatmul.mubr.f32.gmra.mrb[176].mxu0 %v2568_v50  ;;  %v1152_v55 = vpop.f32.mrb[39].mxu1 }
 0x2cd   : > { %2725 = vmatprep.mubr.f32.mxu0 %v2571_v51  ;;  %v2584_v55 = vld [vmem:[#allocation2 + $0x700] sm:$0xff] }
 0x2cf   : > { %v1461_v58 = vpop.f32.mrb[72].mxu0  ;;  %v7137_v17 = vpop.f32.mrb[40].mxu1 }
 0x2d0   : > { %v1463_v59 = vpop.f32.mrb[73].mxu0  ;;  %5126 = vmatprep.mubr.f32.mxu1 %v1461_v58  ;;  %2726 = vmatmul.mubr.f32.gmra.mrb[178].mxu0 %v2570_v3  ;;  %v1157_v24 = vpop.f32.mrb[41].mxu1  ;;  %v2587_v3 = vld [vmem:[#allocation2 + $0x718] sm:$0xff] }
 0x2d1   : > { %2730 = vmatprep.mubr.f32.mxu0 %v2573_v10 }
 0x2d3   : > { %v1466_v63 = vpop.f32.mrb[74].mxu0  ;;  %v7139_v48 = vpop.f32.mrb[42].mxu1 }
 0x2d4   : > { %v1468_v1 = vpop.f32.mrb[75].mxu0  ;;  %5127 = vmatmul.mubr.f32.gmra.mrb[84].mxu1 %v1466_v63  ;;  %2731 = vmatmul.mubr.f32.gmra.mrb[180].mxu0 %v2572_v62  ;;  %v1162_v2 = vpop.f32.mrb[43].mxu1  ;;  %v2586_v62 = vld [vmem:[#allocation2 + $0x710] sm:$0xff] }
 0x2d5   : > { %2735 = vmatprep.mubr.f32.mxu0 %v2575_v40  ;;  %v2589_v40 = vld [vmem:[#allocation2 + $0x728] sm:$0xff] }
 0x2d7   : > { %v1471_v8 = vpop.f32.mrb[76].mxu0  ;;  %v7141_v6 = vpop.f32.mrb[44].mxu1 }
 0x2d8   : > { %v1473_v9 = vpop.f32.mrb[77].mxu0  ;;  %5129 = vmatprep.mubr.f32.mxu1 %v1471_v8  ;;  %2736 = vmatmul.mubr.f32.gmra.mrb[182].mxu0 %v2574_v4  ;;  %v1167_v16 = vpop.f32.mrb[45].mxu1  ;;  %v2591_v8 = vld [vmem:[#allocation2 + $0x738] sm:$0xff] }
 0x2d9   : > { %2740 = vmatprep.mubr.f32.mxu0 %v2577_v5  ;;  %v2588_v5 = vld [vmem:[#allocation2 + $0x720] sm:$0xff] }
 0x2db   : > { %v1476_v14 = vpop.f32.mrb[78].mxu0  ;;  %v7143_v15 = vpop.f32.mrb[46].mxu1 }
 0x2dc   : > { %v1478_v33 = vpop.f32.mrb[79].mxu0  ;;  %5130 = vmatmul.mubr.f32.gmra.mrb[86].mxu1 %v1476_v14  ;;  %2741 = vmatmul.mubr.f32.gmra.mrb[184].mxu0 %v2576_v11  ;;  %v1172_v18 = vpop.f32.mrb[47].mxu1  ;;  %v2590_v14 = vld [vmem:[#allocation2 + $0x730] sm:$0xff] }
 0x2dd   : > { %2745 = vmatprep.mubr.f32.mxu0 %v2579_v13  ;;  %v2593_v33 = vld [vmem:[#allocation2 + $0x748] sm:$0xff] }
 0x2df   : > { %v1481_v23 = vpop.f32.mrb[80].mxu0  ;;  %v7145_v26 = vpop.f32.mrb[48].mxu1 }
 0x2e0   : > { %v1483_v27 = vpop.f32.mrb[81].mxu0  ;;  %5132 = vmatprep.mubr.f32.mxu1 %v1481_v23  ;;  %2746 = vmatmul.mubr.f32.gmra.mrb[186].mxu0 %v2578_v29  ;;  %v1177_v28 = vpop.f32.mrb[49].mxu1 }
 0x2e1   : > { %2750 = vmatprep.mubr.f32.mxu0 %v2581_v19  ;;  %v2592_v27 = vld [vmem:[#allocation2 + $0x740] sm:$0xff]  ;;  %v2595_v28 = vld [vmem:[#allocation2 + $0x758] sm:$0xff] }
 0x2e3   : > { %v1486_v38 = vpop.f32.mrb[82].mxu0  ;;  %v7147_v39 = vpop.f32.mrb[50].mxu1 }
 0x2e4   : > { %v1488_v41 = vpop.f32.mrb[83].mxu0  ;;  %5133 = vmatmul.mubr.f32.gmra.mrb[88].mxu1 %v1486_v38  ;;  %2751 = vmatmul.mubr.f32.gmra.mrb[188].mxu0 %v2580_v30  ;;  %v1182_v42 = vpop.f32.mrb[51].mxu1 }
 0x2e5   : > { %2755 = vmatprep.mubr.f32.mxu0 %v2583_v37  ;;  %v4431_v41 = vld [vmem:[%s7524_s4 + $0x110] sm:$0xff]  ;;  %v4432_v42 = vld [vmem:[%s7524_s4 + $0x118] sm:$0xff] }
 0x2e7   : > { %v1491_v50 = vpop.f32.mrb[84].mxu0  ;;  %v7149_v51 = vpop.f32.mrb[52].mxu1 }
 0x2e8   : > { %v1493_v52 = vpop.f32.mrb[85].mxu0  ;;  %5135 = vmatprep.mubr.f32.mxu1 %v1491_v50  ;;  %2756 = vmatmul.mubr.f32.gmra.mrb[190].mxu0 %v2582_v47  ;;  %v1187_v54 = vpop.f32.mrb[53].mxu1  ;;  %v2597_v50 = vld [vmem:[#allocation2 + $0x768] sm:$0xff] }
 0x2e9   : > { %2760 = vmatprep.mubr.f32.mxu0 %v2585_v49  ;;  %v2594_v49 = vld [vmem:[#allocation2 + $0x750] sm:$0xff]  ;;  %v5772_v54 = vpack.c.bf16 %v4432_v42, %v4431_v41 }
 0x2ea   : > { %v4443_v42 = vld [vmem:[%s7524_s4 + $0x170] sm:$0xff] }
 0x2eb   : > { %v1496_v10 = vpop.f32.mrb[86].mxu0  ;;  %v7151_v58 = vpop.f32.mrb[54].mxu1 }
 0x2ec   : > { %v1498_v59 = vpop.f32.mrb[87].mxu0  ;;  %5136 = vmatmul.mubr.f32.gmra.mrb[90].mxu1 %v1496_v10  ;;  %2761 = vmatmul.mubr.f32.gmra.mrb[192].mxu0 %v2584_v55  ;;  %v1192_v24 = vpop.f32.mrb[55].mxu1  ;;  %v4434_v10 = vld [vmem:[%s7524_s4 + $0x128] sm:$0xff] }
 0x2ed   : > { %2765 = vmatprep.mubr.f32.mxu0 %v2587_v3  ;;  %v4433_v3 = vld [vmem:[%s7524_s4 + $0x120] sm:$0xff]  ;;  %v2599_v59 = vld [vmem:[#allocation2 + $0x778] sm:$0xff] }
 0x2ef   : > { %v1501_v63 = vpop.f32.mrb[88].mxu0  ;;  %v7153_v1 = vpop.f32.mrb[56].mxu1 }
 0x2f0   : > { %v1503_v2 = vpop.f32.mrb[89].mxu0  ;;  %5138 = vmatprep.mubr.f32.mxu1 %v1501_v63  ;;  %2766 = vmatmul.mubr.f32.gmra.mrb[194].mxu0 %v2586_v62  ;;  %v1197_v4 = vpop.f32.mrb[57].mxu1  ;;  %v2601_v63 = vld [vmem:[#allocation2 + $0x788] sm:$0xff] }
 0x2f1   : > { %2770 = vmatprep.mubr.f32.mxu0 %v2589_v40  ;;  %v4435_v40 = vld [vmem:[%s7524_s4 + $0x130] sm:$0xff] }
 0x2f3   : > { %v1506_v9 = vpop.f32.mrb[90].mxu0  ;;  %v7155_v16 = vpop.f32.mrb[58].mxu1 }
 0x2f4   : > { %v1508_v11 = vpop.f32.mrb[91].mxu0  ;;  %5139 = vmatmul.mubr.f32.gmra.mrb[92].mxu1 %v1506_v9  ;;  %2771 = vmatmul.mubr.f32.gmra.mrb[196].mxu0 %v2588_v5  ;;  %v1202_v13 = vpop.f32.mrb[59].mxu1  ;;  %v4437_v5 = vld [vmem:[%s7524_s4 + $0x140] sm:$0xff]  ;;  %v2603_v9 = vld [vmem:[#allocation2 + $0x798] sm:$0xff] }
 0x2f5   : > { %2775 = vmatprep.mubr.f32.mxu0 %v2591_v8  ;;  %v2600_v8 = vld [vmem:[#allocation2 + $0x780] sm:$0xff] }
 0x2f7   : > { %v1511_v18 = vpop.f32.mrb[92].mxu0  ;;  %v7157_v29 = vpop.f32.mrb[60].mxu1 }
 0x2f8   : > { %v1513_v19 = vpop.f32.mrb[93].mxu0  ;;  %5141 = vmatprep.mubr.f32.mxu1 %v1511_v18  ;;  %2776 = vmatmul.mubr.f32.gmra.mrb[198].mxu0 %v2590_v14  ;;  %v1207_v23 = vpop.f32.mrb[61].mxu1  ;;  %v4439_v14 = vld [vmem:[%s7524_s4 + $0x150] sm:$0xff]  ;;  %v2605_v18 = vld [vmem:[#allocation2 + $0x7a8] sm:$0xff] }
 0x2f9   : > { %2780 = vmatprep.mubr.f32.mxu0 %v2593_v33  ;;  %v2602_v33 = vld [vmem:[#allocation2 + $0x790] sm:$0xff] }
 0x2fb   : > { %v1516_v30 = vpop.f32.mrb[94].mxu0  ;;  %v7159_v37 = vpop.f32.mrb[62].mxu1 }
 0x2fc   : > { %v1518_v38 = vpop.f32.mrb[95].mxu0  ;;  %5142 = vmatmul.mubr.f32.gmra.mrb[94].mxu1 %v1516_v30  ;;  %2781 = vmatmul.mubr.f32.gmra.mrb[200].mxu0 %v2592_v27  ;;  %v1212_v47 = vpop.f32.mrb[63].mxu1  ;;  %v4441_v27 = vld [vmem:[%s7524_s4 + $0x160] sm:$0xff]  ;;  %v2607_v30 = vld [vmem:[#allocation2 + $0x7b8] sm:$0xff] }
 0x2fd   : > { %5176 = vmatprep.mubr.f32.mxu1 %v7046_v21  ;;  %2785 = vmatprep.mubr.f32.mxu0 %v2595_v28  ;;  %v2596_v21 = vld [vmem:[#allocation2 + $0x760] sm:$0xff]  ;;  %v2606_v47 = vld [vmem:[#allocation2 + $0x7b0] sm:$0xff] }
 0x2fe   : > { %v2604_v28 = vld [vmem:[#allocation2 + $0x7a0] sm:$0xff] }
 0x2ff   : > { %v7168_v52 = vpop.f32.mrb[96].mxu0 }
 0x300   : > { %5177 = vmatmul.mubr.f32.vlgmr.msra.gmra.mrb[64].mxu1 %v7054_v34  ;;  %v2120_v55 = vpop.f32.mrb[97].mxu0  ;;  %2786 = vmatmul.mubr.f32.gmra.mrb[202].mxu0 %v2594_v49  ;;  %v5776_v34 = vpack.c.bf16 %v4434_v10, %v4433_v3  ;;  %v2609_v49 = vld [vmem:[#allocation2 + $0x7c8] sm:$0xff]  ;;  %v2608_v3 = vld [vmem:[#allocation2 + $0x7c0] sm:$0xff]  ;;  %v2611_v10 = vld [vmem:[#allocation2 + $0x7d8] sm:$0xff] }
 0x301   : > { %5179 = vmatprep.mubr.f32.mxu1 %v7062_v45  ;;  %2790 = vmatprep.mubr.f32.mxu0 %v2597_v50  ;;  %v4436_v45 = vld [vmem:[%s7524_s4 + $0x138] sm:$0xff]  ;;  %v4445_v55 = vld [vmem:[%s7524_s4 + $0x180] sm:$0xff] }
 0x302   : > { %5771 = vmatpush3.bf16.msra.mxu1 %v7112_v36  ;;  %v2598_v36 = vld [vmem:[#allocation2 + $0x770] sm:$0xff] }
 0x303   : > { %v7179_v24 = vpop.f32.mrb[98].mxu0  ;;  %5773 = vmatprep.subr.bf16.mxu1 %v5772_v54 }
 0x304   : > { %5180 = vmatmul.mubr.f32.gmra.mrb[66].mxu1 %v7070_v60  ;;  %v2125_v62 = vpop.f32.mrb[99].mxu0  ;;  %2791 = vmatmul.mubr.f32.gmra.mrb[204].mxu0 %v2596_v21  ;;  %v5780_v60 = vpack.c.bf16 %v4436_v45, %v4435_v40  ;;  %v2612_v45 = vld [vmem:[#allocation2 + $0x7e0] sm:$0xff] }
 0x305   : > { %5182 = vmatprep.mubr.f32.mxu1 %v7078_v61  ;;  %2795 = vmatprep.mubr.f32.mxu0 %v2599_v59  ;;  %v4438_v61 = vld [vmem:[%s7524_s4 + $0x148] sm:$0xff] }
 0x306   : > { %5775 = vmatpush3.bf16.msra.mxu1 %v5772_v54  ;;  %v2613_v62 = vld [vmem:[#allocation2 + $0x7e8] sm:$0xff] }
 0x307   : > { %v7189_v2 = vpop.f32.mrb[100].mxu0  ;;  %5777 = vmatprep.subr.bf16.mxu1 %v5776_v34 }
 0x308   : > { %5183 = vmatmul.mubr.f32.gmra.mrb[68].mxu1 %v7086_v0  ;;  %v2130_v4 = vpop.f32.mrb[101].mxu0  ;;  %2796 = vmatmul.mubr.f32.gmra.mrb[206].mxu0 %v2598_v36  ;;  %v5784_v0 = vpack.c.bf16 %v4438_v61, %v4437_v5  ;;  %v4450_v61 = vld [vmem:[%s7524_s4 + $0x1a8] sm:$0xff] }
 0x309   : > { %5185 = vmatprep.mubr.f32.mxu1 %v7094_v12  ;;  %2800 = vmatprep.mubr.f32.mxu0 %v2601_v63  ;;  %v4440_v12 = vld [vmem:[%s7524_s4 + $0x158] sm:$0xff]  ;;  %v2614_v63 = vld [vmem:[#allocation2 + $0x7f0] sm:$0xff] }
 0x30a   : > { %5779 = vmatpush3.bf16.msra.mxu1 %v5776_v34  ;;  %v2610_v34 = vld [vmem:[#allocation2 + $0x7d0] sm:$0xff] }
 0x30b   : > { %v7199_v11 = vpop.f32.mrb[102].mxu0  ;;  %5781 = vmatprep.subr.bf16.mxu1 %v5780_v60 }
 0x30c   : > { %5186 = vmatmul.mubr.f32.gmra.mrb[70].mxu1 %v7102_v20  ;;  %v2135_v13 = vpop.f32.mrb[103].mxu0  ;;  %2801 = vmatmul.mubr.f32.gmra.mrb[208].mxu0 %v2600_v8  ;;  %v5788_v20 = vpack.c.bf16 %v4440_v12, %v4439_v14  ;;  %v4453_v14 = vld [vmem:[%s7524_s4 + $0x1c0] sm:$0xff]  ;;  %v4454_v12 = vld [vmem:[%s7524_s4 + $0x1c8] sm:$0xff] }
 0x30d   : > { %5188 = vmatprep.mubr.f32.mxu1 %v7110_v35  ;;  %2805 = vmatprep.mubr.f32.mxu0 %v2603_v9  ;;  %v4442_v35 = vld [vmem:[%s7524_s4 + $0x168] sm:$0xff] }
 0x30e   : > { %5783 = vmatpush3.bf16.msra.mxu1 %v5780_v60 }
 0x30f   : > { %v7209_v19 = vpop.f32.mrb[104].mxu0  ;;  %5785 = vmatprep.subr.bf16.mxu1 %v5784_v0 }
 0x310   : > { %5189 = vmatmul.mubr.f32.gmra.mrb[72].mxu1 %v7115_v43  ;;  %v2140_v23 = vpop.f32.mrb[105].mxu0  ;;  %2806 = vmatmul.mubr.f32.gmra.mrb[210].mxu0 %v2602_v33  ;;  %v5792_v43 = vpack.c.bf16 %v4442_v35, %v4441_v27 }
 0x311   : > { %5191 = vmatprep.mubr.f32.mxu1 %v7117_v46  ;;  %2810 = vmatprep.mubr.f32.mxu0 %v2605_v18  ;;  %v4444_v46 = vld [vmem:[%s7524_s4 + $0x178] sm:$0xff] }
 0x312   : > { %5787 = vmatpush3.bf16.msra.mxu1 %v5784_v0  ;;  %v4452_v0 = vld [vmem:[%s7524_s4 + $0x1b8] sm:$0xff] }
 0x313   : > { %v7219_v38 = vpop.f32.mrb[106].mxu0  ;;  %5789 = vmatprep.subr.bf16.mxu1 %v5788_v20 }
 0x314   : > { %5192 = vmatmul.mubr.f32.gmra.mrb[74].mxu1 %v7119_v57  ;;  %v2145_v41 = vpop.f32.mrb[107].mxu0  ;;  %2811 = vmatmul.mubr.f32.gmra.mrb[212].mxu0 %v2604_v28  ;;  %v5796_v57 = vpack.c.bf16 %v4444_v46, %v4443_v42  ;;  %v4457_v28 = vld [vmem:[%s7524_s4 + $0x1e0] sm:$0xff]  ;;  %v4459_v42 = vld [vmem:[%s7524_s4 + $0x1f0] sm:$0xff]  ;;  %v4460_v46 = vld [vmem:[%s7524_s4 + $0x1f8] sm:$0xff] }
 0x315   : > { %5194 = vmatprep.mubr.f32.mxu1 %v7121_v31  ;;  %2815 = vmatprep.mubr.f32.mxu0 %v2607_v30  ;;  %v4446_v31 = vld [vmem:[%s7524_s4 + $0x188] sm:$0xff] }
 0x316   : > { %5791 = vmatpush3.bf16.msra.mxu1 %v5788_v20  ;;  %v4456_v20 = vld [vmem:[%s7524_s4 + $0x1d8] sm:$0xff]  ;;  %v4458_v30 = vld [vmem:[%s7524_s4 + $0x1e8] sm:$0xff] }
 0x317   : > { %v7229_v50 = vpop.f32.mrb[108].mxu0  ;;  %5793 = vmatprep.subr.bf16.mxu1 %v5792_v43 }
 0x318   : > { %5195 = vmatmul.mubr.f32.gmra.mrb[76].mxu1 %v7123_v56  ;;  %v2150_v54 = vpop.f32.mrb[109].mxu0  ;;  %2816 = vmatmul.mubr.f32.gmra.mrb[214].mxu0 %v2606_v47  ;;  %v5848_v56 = vpack.c.bf16 %v4446_v31, %v4445_v55 }
 0x319   : > { %5197 = vmatprep.mubr.f32.mxu1 %v7125_v7  ;;  %2820 = vmatprep.mubr.f32.mxu0 %v2609_v49  ;;  %v5876_v49 = vpack.c.bf16 %v4460_v46, %v4459_v42 }
 0x31a   : > { %5795 = vmatpush3.bf16.msra.mxu1 %v5792_v43  ;;  %v5872_v43 = vpack.c.bf16 %v4458_v30, %v4457_v28 }
 0x31b   : > { %v7239_v21 = vpop.f32.mrb[110].mxu0  ;;  %5797 = vmatprep.subr.bf16.mxu1 %v5796_v57 }
 0x31c   : > { %5198 = vmatmul.mubr.f32.gmra.mrb[78].mxu1 %v7127_v25  ;;  %v2155_v59 = vpop.f32.mrb[111].mxu0  ;;  %2821 = vmatmul.mubr.f32.gmra.mrb[216].mxu0 %v2608_v3  ;;  %v2615_v25 = vld [vmem:[#allocation2 + $0x7f8] sm:$0xff] }
 0x31d   : > { %5200 = vmatprep.mubr.f32.mxu1 %v7129_v22  ;;  %2825 = vmatprep.mubr.f32.mxu0 %v2611_v10 }
 0x31e   : > { %5799 = vmatpush3.bf16.msra.mxu1 %v5796_v57 }
 0x31f   : > { %v7243_v40 = vpop.f32.mrb[112].mxu0  ;;  %5849 = vmatprep.subr.bf16.mxu1 %v5848_v56 }
 0x320   : > { %5201 = vmatmul.mubr.f32.gmra.mrb[80].mxu1 %v7131_v32  ;;  %v2160_v7 = vpop.f32.mrb[113].mxu0  ;;  %2826 = vmatmul.mubr.f32.gmra.mrb[218].mxu0 %v2610_v34 }
 0x321   : > { %5203 = vmatprep.mubr.f32.mxu1 %v7133_v44  ;;  %2830 = vmatprep.mubr.f32.mxu0 %v2613_v62 }
 0x323   : > { %v7247_v36 = vpop.f32.mrb[114].mxu0 }
 0x324   : > { %5204 = vmatmul.mubr.f32.gmra.mrb[82].mxu1 %v7135_v53  ;;  %v2165_v22 = vpop.f32.mrb[115].mxu0  ;;  %2831 = vmatmul.mubr.f32.gmra.mrb[220].mxu0 %v2612_v45 }
 0x325   : > { %5206 = vmatprep.mubr.f32.mxu1 %v7137_v17  ;;  %2835 = vmatprep.mubr.f32.mxu0 %v2615_v25 }
 0x327   : > { %v7251_v60 = vpop.f32.mrb[116].mxu0 }
 0x328   : > { %5207 = vmatmul.mubr.f32.gmra.mrb[84].mxu1 %v7139_v48  ;;  %v2170_v32 = vpop.f32.mrb[117].mxu0  ;;  %2836 = vmatmul.mubr.f32.gmra.mrb[222].mxu0 %v2614_v63 }
 0x329   : > { %5209 = vmatprep.mubr.f32.mxu1 %v7141_v6 }
 0x32b   : > { %v7255_v44 = vpop.f32.mrb[118].mxu0 }
 0x32c   : > { %5210 = vmatmul.mubr.f32.gmra.mrb[86].mxu1 %v7143_v15  ;;  %v2175_v4 = vpop.f32.mrb[119].mxu0 }
 0x32d   : > { %5212 = vmatprep.mubr.f32.mxu1 %v7145_v26 }
 0x32f   : > { %v7259_v53 = vpop.f32.mrb[120].mxu0 }
 0x330   : > { %5213 = vmatmul.mubr.f32.gmra.mrb[88].mxu1 %v7147_v39  ;;  %v2180_v17 = vpop.f32.mrb[121].mxu0  ;;  %v4447_v39 = vld [vmem:[%s7524_s4 + $0x190] sm:$0xff] }
 0x331   : > { %5215 = vmatprep.mubr.f32.mxu1 %v7149_v51  ;;  %v4448_v51 = vld [vmem:[%s7524_s4 + $0x198] sm:$0xff] }
 0x333   : > { %v7263_v5 = vpop.f32.mrb[122].mxu0 }
 0x334   : > { %5216 = vmatmul.mubr.f32.gmra.mrb[90].mxu1 %v7151_v58  ;;  %v2185_v48 = vpop.f32.mrb[123].mxu0 }
 0x335   : > { %5218 = vmatprep.mubr.f32.mxu1 %v7153_v1  ;;  %v5852_v1 = vpack.c.bf16 %v4448_v51, %v4447_v39 }
 0x337   : > { %v7267_v6 = vpop.f32.mrb[124].mxu0 }
 0x338   : > { %5219 = vmatmul.mubr.f32.gmra.mrb[92].mxu1 %v7155_v16  ;;  %v2190_v15 = vpop.f32.mrb[125].mxu0 }
 0x339   : > { %5221 = vmatprep.mubr.f32.mxu1 %v7157_v29  ;;  %v4449_v29 = vld [vmem:[%s7524_s4 + $0x1a0] sm:$0xff] }
 0x33b   : > { %v7271_v26 = vpop.f32.mrb[126].mxu0 }
 0x33c   : > { %5222 = vmatmul.mubr.f32.gmra.mrb[94].mxu1 %v7159_v37  ;;  %v2195_v58 = vpop.f32.mrb[127].mxu0  ;;  %v5856_v37 = vpack.c.bf16 %v4450_v61, %v4449_v29 }
 0x33d   : > { %5256 = vmatprep.mubr.f32.mxu1 %v7168_v52  ;;  %v4451_v52 = vld [vmem:[%s7524_s4 + $0x1b0] sm:$0xff] }
 0x33f   : > { %v2198_v16 = vpop.f32.mrb[128].mxu0 }
 0x340   : > { %v2200_v8 = vpop.f32.mrb[129].mxu0  ;;  %5257 = vmatmul.mubr.f32.vlgmr.msra.gmra.mrb[64].mxu1 %v7179_v24  ;;  %v5860_v24 = vpack.c.bf16 %v4452_v0, %v4451_v52 }
 0x341   : > { %5259 = vmatprep.mubr.f32.mxu1 %v7189_v2  ;;  %5851 = vmatpush3.bf16.msra.mxu1 %v5848_v56 }
 0x342   : > { %5853 = vmatprep.subr.bf16.mxu1 %v5852_v1 }
 0x343   : > { %v2203_v9 = vpop.f32.mrb[130].mxu0 }
 0x344   : > { %v2205_v13 = vpop.f32.mrb[131].mxu0  ;;  %5260 = vmatmul.mubr.f32.gmra.mrb[66].mxu1 %v7199_v11  ;;  %v5864_v11 = vpack.c.bf16 %v4454_v12, %v4453_v14 }
 0x345   : > { %5262 = vmatprep.mubr.f32.mxu1 %v7209_v19  ;;  %5855 = vmatpush3.bf16.msra.mxu1 %v5852_v1  ;;  %v4455_v19 = vld [vmem:[%s7524_s4 + $0x1d0] sm:$0xff] }
 0x346   : > { %5857 = vmatprep.subr.bf16.mxu1 %v5856_v37  ;;  %v5868_v27 = vpack.c.bf16 %v4456_v20, %v4455_v19 }
 0x347   : > { %v2208_v2 = vpop.f32.mrb[132].mxu0 }
 0x348   : > { %v2210_v33 = vpop.f32.mrb[133].mxu0  ;;  %5263 = vmatmul.mubr.f32.gmra.mrb[68].mxu1 %v7219_v38 }
 0x349   : > { %5265 = vmatprep.mubr.f32.mxu1 %v7229_v50  ;;  %5859 = vmatpush3.bf16.msra.mxu1 %v5856_v37 }
 0x34a   : > { %5861 = vmatprep.subr.bf16.mxu1 %v5860_v24 }
 0x34b   : > { %v2213_v18 = vpop.f32.mrb[134].mxu0 }
 0x34c   : > { %v2215_v23 = vpop.f32.mrb[135].mxu0  ;;  %5266 = vmatmul.mubr.f32.gmra.mrb[70].mxu1 %v7239_v21 }
 0x34d   : > { %5268 = vmatprep.mubr.f32.mxu1 %v7243_v40  ;;  %5863 = vmatpush3.bf16.msra.mxu1 %v5860_v24 }
 0x34e   : > { %5865 = vmatprep.subr.bf16.mxu1 %v5864_v11 }
 0x34f   : > { %v2218_v35 = vpop.f32.mrb[136].mxu0 }
 0x350   : > { %v2220_v38 = vpop.f32.mrb[137].mxu0  ;;  %5269 = vmatmul.mubr.f32.gmra.mrb[72].mxu1 %v7247_v36 }
 0x351   : > { %5271 = vmatprep.mubr.f32.mxu1 %v7251_v60  ;;  %5867 = vmatpush3.bf16.msra.mxu1 %v5864_v11 }
 0x352   : > { %5869 = vmatprep.subr.bf16.mxu1 %v5868_v27 }
 0x353   : > { %v2223_v41 = vpop.f32.mrb[138].mxu0 }
 0x354   : > { %v2225_v47 = vpop.f32.mrb[139].mxu0  ;;  %5272 = vmatmul.mubr.f32.gmra.mrb[74].mxu1 %v7255_v44 }
 0x355   : > { %5274 = vmatprep.mubr.f32.mxu1 %v7259_v53  ;;  %5871 = vmatpush3.bf16.msra.mxu1 %v5868_v27 }
 0x356   : > { %5873 = vmatprep.subr.bf16.mxu1 %v5872_v43 }
 0x357   : > { %v2228_v50 = vpop.f32.mrb[140].mxu0 }
 0x358   : > { %v2230_v57 = vpop.f32.mrb[141].mxu0  ;;  %5275 = vmatmul.mubr.f32.gmra.mrb[76].mxu1 %v7263_v5 }
 0x359   : > { %5277 = vmatprep.mubr.f32.mxu1 %v7267_v6  ;;  %5875 = vmatpush3.bf16.msra.mxu1 %v5872_v43 }
 0x35a   : > { %5877 = vmatprep.subr.bf16.mxu1 %v5876_v49 }
 0x35b   : > { %v2233_v54 = vpop.f32.mrb[142].mxu0 }
 0x35c   : > { %v2235_v55 = vpop.f32.mrb[143].mxu0  ;;  %5278 = vmatmul.mubr.f32.gmra.mrb[78].mxu1 %v7271_v26 }
 0x35d   : > { %5280 = vmatprep.mubr.f32.mxu1 %v2198_v16  ;;  %5879 = vmatpush3.bf16.msra.mxu1 %v5876_v49 }
 0x35f   : > { %v2238_v31 = vpop.f32.mrb[144].mxu0 }
 0x360   : > { %v2240_v3 = vpop.f32.mrb[145].mxu0  ;;  %5281 = vmatmul.mubr.f32.gmra.mrb[80].mxu1 %v2203_v9 }
 0x361   : > { %5283 = vmatprep.mubr.f32.mxu1 %v2208_v2 }
 0x363   : > { %v2243_v10 = vpop.f32.mrb[146].mxu0 }
 0x364   : > { %v2245_v21 = vpop.f32.mrb[147].mxu0  ;;  %5284 = vmatmul.mubr.f32.gmra.mrb[82].mxu1 %v2213_v18 }
 0x365   : > { %5286 = vmatprep.mubr.f32.mxu1 %v2218_v35 }
 0x367   : > { %v2248_v56 = vpop.f32.mrb[148].mxu0 }
 0x368   : > { %v2250_v59 = vpop.f32.mrb[149].mxu0  ;;  %5287 = vmatmul.mubr.f32.gmra.mrb[84].mxu1 %v2223_v41 }
 0x369   : > { %5289 = vmatprep.mubr.f32.mxu1 %v2228_v50 }
 0x36b   : > { %v2253_v34 = vpop.f32.mrb[150].mxu0 }
 0x36c   : > { %v2255_v62 = vpop.f32.mrb[151].mxu0  ;;  %5290 = vmatmul.mubr.f32.gmra.mrb[86].mxu1 %v2233_v54 }
 0x36d   : > { %5292 = vmatprep.mubr.f32.mxu1 %v2238_v31 }
 0x36f   : > { %v2258_v40 = vpop.f32.mrb[152].mxu0 }
 0x370   : > { %v2260_v7 = vpop.f32.mrb[153].mxu0  ;;  %5293 = vmatmul.mubr.f32.gmra.mrb[88].mxu1 %v2243_v10 }
 0x371   : > { %5295 = vmatprep.mubr.f32.mxu1 %v2248_v56 }
 0x373   : > { %v2263_v45 = vpop.f32.mrb[154].mxu0 }
 0x374   : > { %v2265_v25 = vpop.f32.mrb[155].mxu0  ;;  %5296 = vmatmul.mubr.f32.gmra.mrb[90].mxu1 %v2253_v34 }
 0x375   : > { %5298 = vmatprep.mubr.f32.mxu1 %v2258_v40 }
 0x377   : > { %v2268_v36 = vpop.f32.mrb[156].mxu0 }
 0x378   : > { %v2270_v22 = vpop.f32.mrb[157].mxu0  ;;  %5299 = vmatmul.mubr.f32.gmra.mrb[92].mxu1 %v2263_v45 }
 0x379   : > { %5301 = vmatprep.mubr.f32.mxu1 %v2268_v36 }
 0x37b   : > { %v2273_v63 = vpop.f32.mrb[158].mxu0 }
 0x37c   : > { %v2275_v60 = vpop.f32.mrb[159].mxu0  ;;  %5302 = vmatmul.mubr.f32.gmra.mrb[94].mxu1 %v2273_v63 }
 0x37f   : > { %v2682_v32 = vpop.f32.mrb[160].mxu0 }
 0x380   : > { %v2684_v44 = vpop.f32.mrb[161].mxu0  ;;  %5336 = vmatprep.mubr.f32.mxu1 %v2682_v32  ;;  %v7335_v32 = vld [vmem:[%s7525_s5] ss:$0 sm:$0xff] }
 0x383   : > { %v2687_v4 = vpop.f32.mrb[162].mxu0 }
 0x384   : > { %v2689_v53 = vpop.f32.mrb[163].mxu0  ;;  %5337 = vmatmul.mubr.f32.vlgmr.msra.gmra.mrb[64].mxu1 %v2687_v4 }
 0x387   : > { %v2692_v17 = vpop.f32.mrb[164].mxu0 }
 0x388   : > { %v2694_v5 = vpop.f32.mrb[165].mxu0  ;;  %5339 = vmatprep.mubr.f32.mxu1 %v2692_v17 }
 0x389   : > { %v3325_v5 = vld [vmem:[#allocation4 + $0x88] sm:$0xff] }
 0x38a   : > { %3404 = vmatprep.mubr.f32.mxu0 %v3325_v5 }
 0x38b   : > { %v2697_v48 = vpop.f32.mrb[166].mxu0 }
 0x38c   : > { %v2699_v6 = vpop.f32.mrb[167].mxu0  ;;  %5340 = vmatmul.mubr.f32.gmra.mrb[66].mxu1 %v2697_v48 }
 0x38f   : > { %v2702_v15 = vpop.f32.mrb[168].mxu0 }
 0x390   : > { %v2704_v26 = vpop.f32.mrb[169].mxu0  ;;  %5342 = vmatprep.mubr.f32.mxu1 %v2702_v15 }
 0x393   : > { %v2707_v39 = vpop.f32.mrb[170].mxu0 }
 0x394   : > { %v2709_v51 = vpop.f32.mrb[171].mxu0  ;;  %5343 = vmatmul.mubr.f32.gmra.mrb[68].mxu1 %v2707_v39 }
 0x397   : > { %v2712_v58 = vpop.f32.mrb[172].mxu0 }
 0x398   : > { %v2714_v1 = vpop.f32.mrb[173].mxu0  ;;  %5345 = vmatprep.mubr.f32.mxu1 %v2712_v58 }
 0x39b   : > { %v2717_v16 = vpop.f32.mrb[174].mxu0 }
 0x39c   : > { %v2719_v29 = vpop.f32.mrb[175].mxu0  ;;  %5346 = vmatmul.mubr.f32.gmra.mrb[70].mxu1 %v2717_v16 }
 0x39f   : > { %v2722_v61 = vpop.f32.mrb[176].mxu0 }
 0x3a0   : > { %v2724_v8 = vpop.f32.mrb[177].mxu0  ;;  %5348 = vmatprep.mubr.f32.mxu1 %v2722_v61 }
 0x3a3   : > { %v2727_v37 = vpop.f32.mrb[178].mxu0 }
 0x3a4   : > { %v2729_v9 = vpop.f32.mrb[179].mxu0  ;;  %5349 = vmatmul.mubr.f32.gmra.mrb[72].mxu1 %v2727_v37 }
 0x3a7   : > { %v2732_v52 = vpop.f32.mrb[180].mxu0 }
 0x3a8   : > { %v2734_v0 = vpop.f32.mrb[181].mxu0  ;;  %5351 = vmatprep.mubr.f32.mxu1 %v2732_v52 }
 0x3ab   : > { %v2737_v13 = vpop.f32.mrb[182].mxu0 }
 0x3ac   : > { %v2739_v24 = vpop.f32.mrb[183].mxu0  ;;  %5352 = vmatmul.mubr.f32.gmra.mrb[74].mxu1 %v2737_v13 }
 0x3ad   : > { %v3187_v24 = vld [vmem:[#allocation4 + $0x8] sm:$0xff] }
 0x3af   : > { %v2742_v2 = vpop.f32.mrb[184].mxu0 }
 0x3b0   : > { %v2744_v14 = vpop.f32.mrb[185].mxu0  ;;  %5354 = vmatprep.mubr.f32.mxu1 %v2742_v2 }
 0x3b3   : > { %v2747_v12 = vpop.f32.mrb[186].mxu0 }
 0x3b4   : > { %v2749_v33 = vpop.f32.mrb[187].mxu0  ;;  %5355 = vmatmul.mubr.f32.gmra.mrb[76].mxu1 %v2747_v12 }
 0x3b7   : > { %v2752_v11 = vpop.f32.mrb[188].mxu0 }
 0x3b8   : > { %v2754_v18 = vpop.f32.mrb[189].mxu0  ;;  %5357 = vmatprep.mubr.f32.mxu1 %v2752_v11 }
 0x3bb   : > { %v2757_v19 = vpop.f32.mrb[190].mxu0 }
 0x3bc   : > { %v2759_v20 = vpop.f32.mrb[191].mxu0  ;;  %5358 = vmatmul.mubr.f32.gmra.mrb[78].mxu1 %v2757_v19 }
 0x3bf   : > { %v2762_v23 = vpop.f32.mrb[192].mxu0 }
 0x3c0   : > { %v2764_v27 = vpop.f32.mrb[193].mxu0  ;;  %5360 = vmatprep.mubr.f32.mxu1 %v2762_v23 }
 0x3c3   : > { %v2767_v35 = vpop.f32.mrb[194].mxu0 }
 0x3c4   : > { %v2769_v28 = vpop.f32.mrb[195].mxu0  ;;  %5361 = vmatmul.mubr.f32.gmra.mrb[80].mxu1 %v2767_v35 }
 0x3c7   : > { %v2772_v30 = vpop.f32.mrb[196].mxu0 }
 0x3c8   : > { %v2774_v38 = vpop.f32.mrb[197].mxu0  ;;  %5363 = vmatprep.mubr.f32.mxu1 %v2772_v30 }
 0x3cb   : > { %v2777_v43 = vpop.f32.mrb[198].mxu0 }
 0x3cc   : > { %5364 = vmatmul.mubr.f32.gmra.mrb[82].mxu1 %v2777_v43  ;;  %v2779_v41 = vpop.f32.mrb[199].mxu0 }
 0x3cf   : > { %v2782_v42 = vpop.f32.mrb[200].mxu0 }
 0x3d0   : > { %v2784_v46 = vpop.f32.mrb[201].mxu0  ;;  %5366 = vmatprep.mubr.f32.mxu1 %v2782_v42 }
 0x3d3   : > { %v2787_v47 = vpop.f32.mrb[202].mxu0 }
 0x3d4   : > { %5367 = vmatmul.mubr.f32.gmra.mrb[84].mxu1 %v2787_v47  ;;  %v2789_v49 = vpop.f32.mrb[203].mxu0 }
 0x3d7   : > { %v2792_v50 = vpop.f32.mrb[204].mxu0 }
 0x3d8   : > { %v2794_v57 = vpop.f32.mrb[205].mxu0  ;;  %5369 = vmatprep.mubr.f32.mxu1 %v2792_v50 }
 0x3db   : > { %v2797_v54 = vpop.f32.mrb[206].mxu0 }
 0x3dc   : > { %5370 = vmatmul.mubr.f32.gmra.mrb[86].mxu1 %v2797_v54  ;;  %v2799_v55 = vpop.f32.mrb[207].mxu0 }
 0x3df   : > { %v2802_v31 = vpop.f32.mrb[208].mxu0 }
 0x3e0   : > { %v2804_v3 = vpop.f32.mrb[209].mxu0  ;;  %5372 = vmatprep.mubr.f32.mxu1 %v2802_v31 }
 0x3e3   : > { %v2807_v10 = vpop.f32.mrb[210].mxu0 }
 0x3e4   : > { %5373 = vmatmul.mubr.f32.gmra.mrb[88].mxu1 %v2807_v10  ;;  %v2809_v21 = vpop.f32.mrb[211].mxu0 }
 0x3e7   : > { %v2812_v56 = vpop.f32.mrb[212].mxu0 }
 0x3e8   : > { %v2814_v59 = vpop.f32.mrb[213].mxu0  ;;  %5375 = vmatprep.mubr.f32.mxu1 %v2812_v56 }
 0x3eb   : > { %v2817_v34 = vpop.f32.mrb[214].mxu0 }
 0x3ec   : > { %5376 = vmatmul.mubr.f32.gmra.mrb[90].mxu1 %v2817_v34  ;;  %v2819_v62 = vpop.f32.mrb[215].mxu0 }
 0x3ef   : > { %v2822_v40 = vpop.f32.mrb[216].mxu0 }
 0x3f0   : > { %v2824_v7 = vpop.f32.mrb[217].mxu0  ;;  %5378 = vmatprep.mubr.f32.mxu1 %v2822_v40 }
 0x3f3   : > { %v2827_v45 = vpop.f32.mrb[218].mxu0 }
 0x3f4   : > { %5379 = vmatmul.mubr.f32.gmra.mrb[92].mxu1 %v2827_v45  ;;  %v2829_v25 = vpop.f32.mrb[219].mxu0 }
 0x3f7   : > { %v2832_v36 = vpop.f32.mrb[220].mxu0 }
 0x3f8   : > { %v2834_v22 = vpop.f32.mrb[221].mxu0  ;;  %5381 = vmatprep.mubr.f32.mxu1 %v2832_v36 }
 0x3fb   : > { %v2837_v63 = vpop.f32.mrb[222].mxu0 }
 0x3fc   : > { %5382 = vmatmul.mubr.f32.gmra.mrb[94].mxu1 %v2837_v63  ;;  %v2839_v60 = vpop.f32.mrb[223].mxu0 }
 0x3fd   : > { %3266 = vmatprep.mubr.f32.mxu1 %v3187_v24 }
 0x457   : > { %v5338_v44 = vpop.f32.mrb[64].mxu1 }
 0x458   : > { %v3123_v4 = vadd.f32 %v5338_v44, %v7335_v32  ;;  %v2924_v53 = vpop.f32.mrb[65].mxu1 }
 0x459   : > { %v3122_v17 = vadd.f32 %v7335_v32, %v2924_v53 }
 0x45a   : > { %v3155_v48 = vmax.f32 %v3123_v4, 0.0 }
 0x45b   : > { %v3154_v6 = vmax.f32 %v3122_v17, 0.0 }
 0x45d   : > { %v7339_v15 = vpack.c.bf16 %v3155_v48, %v3154_v6 }
 0x45f   : > { %v5341_v26 = vpop.f32.mrb[66].mxu1 }
 0x460   : > { %v3125_v39 = vadd.f32 %v5341_v26, %v7335_v32  ;;  %v2934_v51 = vpop.f32.mrb[67].mxu1 }
 0x461   : > { %v3124_v58 = vadd.f32 %v7335_v32, %v2934_v51 }
 0x462   : > { %v3157_v1 = vmax.f32 %v3125_v39, 0.0 }
 0x463   : > { %v3156_v16 = vmax.f32 %v3124_v58, 0.0 }
 0x465   : > { %v7343_v29 = vpack.c.bf16 %v3157_v1, %v3156_v16 }
 0x467   : > { %v5344_v61 = vpop.f32.mrb[68].mxu1 }
 0x468   : > { %v3127_v8 = vadd.f32 %v5344_v61, %v7335_v32  ;;  %v2944_v37 = vpop.f32.mrb[69].mxu1 }
 0x469   : > { %v3126_v9 = vadd.f32 %v7335_v32, %v2944_v37 }
 0x46a   : > { %v3159_v52 = vmax.f32 %v3127_v8, 0.0 }
 0x46b   : > { %v3158_v0 = vmax.f32 %v3126_v9, 0.0 }
 0x46d   : > { %v7347_v13 = vpack.c.bf16 %v3159_v52, %v3158_v0 }
 0x46f   : > { %v5347_v2 = vpop.f32.mrb[70].mxu1 }
 0x470   : > { %v3129_v14 = vadd.f32 %v5347_v2, %v7335_v32  ;;  %v2954_v12 = vpop.f32.mrb[71].mxu1 }
 0x471   : > { %v3128_v33 = vadd.f32 %v7335_v32, %v2954_v12 }
 0x472   : > { %v3161_v11 = vmax.f32 %v3129_v14, 0.0 }
 0x473   : > { %v3160_v18 = vmax.f32 %v3128_v33, 0.0 }
 0x475   : > { %v7351_v19 = vpack.c.bf16 %v3161_v11, %v3160_v18 }
 0x477   : > { %v5350_v20 = vpop.f32.mrb[72].mxu1 }
 0x478   : > { %v3131_v23 = vadd.f32 %v5350_v20, %v7335_v32  ;;  %v2964_v27 = vpop.f32.mrb[73].mxu1 }
 0x479   : > { %v3130_v35 = vadd.f32 %v7335_v32, %v2964_v27 }
 0x47a   : > { %v3163_v28 = vmax.f32 %v3131_v23, 0.0 }
 0x47b   : > { %v3162_v30 = vmax.f32 %v3130_v35, 0.0 }
 0x47d   : > { %v7355_v38 = vpack.c.bf16 %v3163_v28, %v3162_v30 }
 0x47f   : > { %v5353_v43 = vpop.f32.mrb[74].mxu1 }
 0x480   : > { %v3133_v41 = vadd.f32 %v5353_v43, %v7335_v32  ;;  %v2974_v42 = vpop.f32.mrb[75].mxu1 }
 0x481   : > { %v3132_v46 = vadd.f32 %v7335_v32, %v2974_v42 }
 0x482   : > { %v3165_v47 = vmax.f32 %v3133_v41, 0.0 }
 0x483   : > { %v3164_v49 = vmax.f32 %v3132_v46, 0.0 }
 0x485   : > { %v7359_v50 = vpack.c.bf16 %v3165_v47, %v3164_v49 }
 0x487   : > { %v5356_v57 = vpop.f32.mrb[76].mxu1 }
 0x488   : > { %v3135_v54 = vadd.f32 %v5356_v57, %v7335_v32  ;;  %v2984_v55 = vpop.f32.mrb[77].mxu1 }
 0x489   : > { %v3134_v31 = vadd.f32 %v7335_v32, %v2984_v55 }
 0x48a   : > { %v3167_v3 = vmax.f32 %v3135_v54, 0.0 }
 0x48b   : > { %v3166_v10 = vmax.f32 %v3134_v31, 0.0 }
 0x48d   : > { %v7363_v21 = vpack.c.bf16 %v3167_v3, %v3166_v10 }
 0x48f   : > { %v5359_v56 = vpop.f32.mrb[78].mxu1 }
 0x490   : > { %v3137_v59 = vadd.f32 %v5359_v56, %v7335_v32  ;;  %v2994_v34 = vpop.f32.mrb[79].mxu1 }
 0x491   : > { %v3136_v62 = vadd.f32 %v7335_v32, %v2994_v34 }
 0x492   : > { %v3169_v40 = vmax.f32 %v3137_v59, 0.0 }
 0x493   : > { %v3168_v7 = vmax.f32 %v3136_v62, 0.0 }
 0x495   : > { %v7367_v45 = vpack.c.bf16 %v3169_v40, %v3168_v7  ;;  %v3446_v7 = vld [vmem:[#allocation6 + $0x80] sm:$0xff] }
 0x497   : > { %v5362_v25 = vpop.f32.mrb[80].mxu1 }
 0x498   : > { %v3139_v36 = vadd.f32 %v5362_v25, %v7335_v32  ;;  %v3004_v22 = vpop.f32.mrb[81].mxu1  ;;  %v3447_v25 = vld [vmem:[#allocation6 + $0x88] sm:$0xff] }
 0x499   : > { %v3138_v63 = vadd.f32 %v7335_v32, %v3004_v22 }
 0x49a   : > { %v3171_v60 = vmax.f32 %v3139_v36, 0.0 }
 0x49b   : > { %v3170_v44 = vmax.f32 %v3138_v63, 0.0  ;;  %v5944_v63 = vpack.c.bf16 %v3447_v25, %v3446_v7 }
 0x49d   : > { %v7371_v4 = vpack.c.bf16 %v3171_v60, %v3170_v44  ;;  %v3324_v60 = vld [vmem:[#allocation4 + $0x80] sm:$0xff] }
 0x49e   : > { %v3186_v44 = vld [vmem:[#allocation4] sm:$0xff] }
 0x49f   : > { %v5365_v53 = vpop.f32.mrb[82].mxu1  ;;  %5881 = vmatprep.subr.bf16.mxu1 %v7371_v4  ;;  %5913 = vmatprep.subr.bf16.mxu0 %v7371_v4 }
 0x4a0   : > { %v3141_v17 = vadd.f32 %v5365_v53, %v7335_v32  ;;  %v3014_v5 = vpop.f32.mrb[83].mxu1  ;;  %5883 = vmatpush3.bf16.msra.mxu1 %v7339_v15  ;;  %5915 = vmatpush3.bf16.msra.mxu0 %v7339_v15  ;;  %v3189_v53 = vld [vmem:[#allocation4 + $0x18] sm:$0xff] }
 0x4a1   : > { %v3140_v48 = vadd.f32 %v7335_v32, %v3014_v5  ;;  %v3449_v5 = vld [vmem:[#allocation6 + $0x98] sm:$0xff] }
 0x4a2   : > { %v3173_v6 = vmax.f32 %v3141_v17, 0.0  ;;  %v3448_v17 = vld [vmem:[#allocation6 + $0x90] sm:$0xff] }
 0x4a3   : > { %v3172_v26 = vmax.f32 %v3140_v48, 0.0  ;;  %v3326_v48 = vld [vmem:[#allocation4 + $0x90] sm:$0xff] }
 0x4a5   : > { %v7379_v39 = vpack.c.bf16 %v3173_v6, %v3172_v26  ;;  %v3188_v6 = vld [vmem:[#allocation4 + $0x10] sm:$0xff]  ;;  %v3329_v26 = vld [vmem:[#allocation4 + $0xa8] sm:$0xff] }
 0x4a7   : > { %v5368_v51 = vpop.f32.mrb[84].mxu1  ;;  %5885 = vmatprep.subr.bf16.mxu1 %v7379_v39  ;;  %5917 = vmatprep.subr.bf16.mxu0 %v7379_v39 }
 0x4a8   : > { %v3143_v58 = vadd.f32 %v5368_v51, %v7335_v32  ;;  %v3024_v1 = vpop.f32.mrb[85].mxu1  ;;  %5887 = vmatpush3.bf16.msra.mxu1 %v7343_v29  ;;  %5919 = vmatpush3.bf16.msra.mxu0 %v7343_v29  ;;  %v3191_v51 = vld [vmem:[#allocation4 + $0x28] sm:$0xff] }
 0x4a9   : > { %v3142_v16 = vadd.f32 %v7335_v32, %v3024_v1  ;;  %v3328_v1 = vld [vmem:[#allocation4 + $0xa0] sm:$0xff] }
 0x4aa   : > { %v3175_v61 = vmax.f32 %v3143_v58, 0.0  ;;  %v5948_v58 = vpack.c.bf16 %v3449_v5, %v3448_v17  ;;  %v3708_v17 = vld [vmem:[#allocation7 + $0x28] sm:$0xff]  ;;  %v3710_v5 = vld [vmem:[#allocation7 + $0x38] sm:$0xff] }
 0x4ab   : > { %v3174_v8 = vmax.f32 %v3142_v16, 0.0  ;;  %v3190_v16 = vld [vmem:[#allocation4 + $0x20] sm:$0xff] }
 0x4ad   : > { %v7387_v37 = vpack.c.bf16 %v3175_v61, %v3174_v8  ;;  %v3331_v61 = vld [vmem:[#allocation4 + $0xb8] sm:$0xff] }
 0x4ae   : > { %v3193_v8 = vld [vmem:[#allocation4 + $0x38] sm:$0xff] }
 0x4af   : > { %v5371_v9 = vpop.f32.mrb[86].mxu1  ;;  %5889 = vmatprep.subr.bf16.mxu1 %v7387_v37  ;;  %5921 = vmatprep.subr.bf16.mxu0 %v7387_v37 }
 0x4b0   : > { %v3145_v52 = vadd.f32 %v5371_v9, %v7335_v32  ;;  %v3034_v0 = vpop.f32.mrb[87].mxu1  ;;  %5891 = vmatpush3.bf16.msra.mxu1 %v7347_v13  ;;  %5923 = vmatpush3.bf16.msra.mxu0 %v7347_v13  ;;  %v3450_v9 = vld [vmem:[#allocation6 + $0xa0] sm:$0xff] }
 0x4b1   : > { %v3144_v24 = vadd.f32 %v7335_v32, %v3034_v0  ;;  %v3330_v0 = vld [vmem:[#allocation4 + $0xb0] sm:$0xff] }
 0x4b2   : > { %v3177_v2 = vmax.f32 %v3145_v52, 0.0  ;;  %v3451_v52 = vld [vmem:[#allocation6 + $0xa8] sm:$0xff] }
 0x4b3   : > { %v3176_v14 = vmax.f32 %v3144_v24, 0.0  ;;  %v3192_v24 = vld [vmem:[#allocation4 + $0x30] sm:$0xff] }
 0x4b5   : > { %v7395_v12 = vpack.c.bf16 %v3177_v2, %v3176_v14  ;;  %v3333_v2 = vld [vmem:[#allocation4 + $0xc8] sm:$0xff] }
 0x4b6   : > { %v3195_v14 = vld [vmem:[#allocation4 + $0x48] sm:$0xff] }
 0x4b7   : > { %v5374_v33 = vpop.f32.mrb[88].mxu1  ;;  %5893 = vmatprep.subr.bf16.mxu1 %v7395_v12  ;;  %5925 = vmatprep.subr.bf16.mxu0 %v7395_v12 }
 0x4b8   : > { %v3147_v11 = vadd.f32 %v5374_v33, %v7335_v32  ;;  %v3044_v18 = vpop.f32.mrb[89].mxu1  ;;  %5895 = vmatpush3.bf16.msra.mxu1 %v7351_v19  ;;  %5927 = vmatpush3.bf16.msra.mxu0 %v7351_v19  ;;  %v5952_v33 = vpack.c.bf16 %v3451_v52, %v3450_v9  ;;  %v3853_v9 = vld [vmem:[#allocation7 + $0xe0] sm:$0xff] }
 0x4b9   : > { %v3146_v20 = vadd.f32 %v7335_v32, %v3044_v18  ;;  %v3194_v18 = vld [vmem:[#allocation4 + $0x40] sm:$0xff] }
 0x4ba   : > { %v3179_v23 = vmax.f32 %v3147_v11, 0.0  ;;  %v3332_v11 = vld [vmem:[#allocation4 + $0xc0] sm:$0xff] }
 0x4bb   : > { %v3178_v27 = vmax.f32 %v3146_v20, 0.0  ;;  %v3335_v20 = vld [vmem:[#allocation4 + $0xd8] sm:$0xff] }
 0x4bd   : > { %v7403_v35 = vpack.c.bf16 %v3179_v23, %v3178_v27  ;;  %v3197_v23 = vld [vmem:[#allocation4 + $0x58] sm:$0xff]  ;;  %v3452_v27 = vld [vmem:[#allocation6 + $0xb0] sm:$0xff] }
 0x4bf   : > { %v5377_v28 = vpop.f32.mrb[90].mxu1  ;;  %5897 = vmatprep.subr.bf16.mxu1 %v7403_v35  ;;  %5929 = vmatprep.subr.bf16.mxu0 %v7403_v35 }
 0x4c0   : > { %v3149_v30 = vadd.f32 %v5377_v28, %v7335_v32  ;;  %v3054_v43 = vpop.f32.mrb[91].mxu1  ;;  %5899 = vmatpush3.bf16.msra.mxu1 %v7355_v38  ;;  %5931 = vmatpush3.bf16.msra.mxu0 %v7355_v38  ;;  %v3453_v28 = vld [vmem:[#allocation6 + $0xb8] sm:$0xff] }
 0x4c1   : > { %v3148_v41 = vadd.f32 %v7335_v32, %v3054_v43  ;;  %v3196_v43 = vld [vmem:[#allocation4 + $0x50] sm:$0xff] }
 0x4c2   : > { %v3181_v42 = vmax.f32 %v3149_v30, 0.0  ;;  %v3334_v30 = vld [vmem:[#allocation4 + $0xd0] sm:$0xff] }
 0x4c3   : > { %v3180_v46 = vmax.f32 %v3148_v41, 0.0  ;;  %v3337_v41 = vld [vmem:[#allocation4 + $0xe8] sm:$0xff] }
 0x4c5   : > { %v7411_v47 = vpack.c.bf16 %v3181_v42, %v3180_v46  ;;  %v3199_v42 = vld [vmem:[#allocation4 + $0x68] sm:$0xff]  ;;  %v5956_v46 = vpack.c.bf16 %v3453_v28, %v3452_v27  ;;  %v3966_v27 = vld [vmem:[#allocation9 + $0x98] sm:$0xff] }
 0x4c7   : > { %v5380_v49 = vpop.f32.mrb[92].mxu1  ;;  %5901 = vmatprep.subr.bf16.mxu1 %v7411_v47  ;;  %5933 = vmatprep.subr.bf16.mxu0 %v7411_v47 }
 0x4c8   : > { %v3151_v57 = vadd.f32 %v5380_v49, %v7335_v32  ;;  %v3064_v54 = vpop.f32.mrb[93].mxu1  ;;  %5903 = vmatpush3.bf16.msra.mxu1 %v7359_v50  ;;  %5935 = vmatpush3.bf16.msra.mxu0 %v7359_v50  ;;  %v3336_v49 = vld [vmem:[#allocation4 + $0xe0] sm:$0xff] }
 0x4c9   : > { %v3150_v55 = vadd.f32 %v7335_v32, %v3064_v54  ;;  %v3339_v54 = vld [vmem:[#allocation4 + $0xf8] sm:$0xff] }
 0x4ca   : > { %v3183_v31 = vmax.f32 %v3151_v57, 0.0  ;;  %v3198_v57 = vld [vmem:[#allocation4 + $0x60] sm:$0xff] }
 0x4cb   : > { %v3182_v3 = vmax.f32 %v3150_v55, 0.0  ;;  %v3201_v55 = vld [vmem:[#allocation4 + $0x78] sm:$0xff] }
 0x4cd   : > { %v7419_v10 = vpack.c.bf16 %v3183_v31, %v3182_v3  ;;  %v3454_v31 = vld [vmem:[#allocation6 + $0xc0] sm:$0xff]  ;;  %v3455_v3 = vld [vmem:[#allocation6 + $0xc8] sm:$0xff] }
 0x4ce   : > { %v5960_v7 = vpack.c.bf16 %v3455_v3, %v3454_v31  ;;  %v3973_v31 = vld [vmem:[#allocation9 + $0xd0] sm:$0xff]  ;;  %v3974_v3 = vld [vmem:[#allocation9 + $0xd8] sm:$0xff] }
 0x4cf   : > { %v5383_v56 = vpop.f32.mrb[94].mxu1  ;;  %5905 = vmatprep.subr.bf16.mxu1 %v7419_v10  ;;  %5937 = vmatprep.subr.bf16.mxu0 %v7419_v10 }
 0x4d0   : > { %v3153_v59 = vadd.f32 %v5383_v56, %v7335_v32  ;;  %v3074_v34 = vpop.f32.mrb[95].mxu1  ;;  %5907 = vmatpush3.bf16.msra.mxu1 %v7363_v21  ;;  %5939 = vmatpush3.bf16.msra.mxu0 %v7363_v21  ;;  %v3338_v56 = vld [vmem:[#allocation4 + $0xf0] sm:$0xff] }
 0x4d1   : > { %v3152_v62 = vadd.f32 %v7335_v32, %v3074_v34  ;;  %v3327_v32 = vld [vmem:[#allocation4 + $0x98] sm:$0xff]  ;;  %v3456_v34 = vld [vmem:[#allocation6 + $0xd0] sm:$0xff] }
 0x4d2   : > { %v3185_v40 = vmax.f32 %v3153_v59, 0.0  ;;  %v3200_v59 = vld [vmem:[#allocation4 + $0x70] sm:$0xff] }
 0x4d3   : > { %v3184_v36 = vmax.f32 %v3152_v62, 0.0  ;;  %v3457_v62 = vld [vmem:[#allocation6 + $0xd8] sm:$0xff] }
 0x4d4   : > { %v5964_v25 = vpack.c.bf16 %v3457_v62, %v3456_v34  ;;  %v3976_v34 = vld [vmem:[#allocation9 + $0xe8] sm:$0xff] }
 0x4d5   : > { %v7427_v22 = vpack.c.bf16 %v3185_v40, %v3184_v36  ;;  %v3704_v40 = vld [vmem:[#allocation7 + $0x8] sm:$0xff]  ;;  %v3703_v36 = vld [vmem:[#allocation7] sm:$0xff] }
 0x4d7   : > { %5909 = vmatprep.subr.bf16.mxu1 %v7427_v22  ;;  %5941 = vmatprep.subr.bf16.mxu0 %v7427_v22 }
 0x4d8   : > { %5911 = vmatpush3.bf16.msra.mxu1 %v7367_v45  ;;  %5943 = vmatpush3.bf16.msra.mxu0 %v7367_v45 }
 0x4d9   : > { %6009 = vmatprep.subr.bf16.mxu0 %v7371_v4  ;;  %5945 = vmatprep.subr.bf16.mxu1 %v5944_v63 }
 0x4db   : > { %3405 = vmatmul.mubr.f32.vlgmr.msra.gmra.mrb[224].mxu0 %v3324_v60  ;;  %3267 = vmatmul.mubr.f32.vlgmr.msra.gmra.mrb[96].mxu1 %v3186_v44  ;;  %v3459_v60 = vld [vmem:[#allocation6 + $0xe8] sm:$0xff]  ;;  %v3706_v44 = vld [vmem:[#allocation7 + $0x18] sm:$0xff] }
 0x4dc   : > { %6011 = vmatpush3.bf16.msra.mxu0 %v7339_v15  ;;  %3409 = vmatprep.mubr.f32.mxu0 %v3327_v32 }
 0x4dd   : > { %6013 = vmatprep.subr.bf16.mxu0 %v7379_v39  ;;  %3271 = vmatprep.mubr.f32.mxu1 %v3189_v53  ;;  %v3705_v53 = vld [vmem:[#allocation7 + $0x10] sm:$0xff] }
 0x4de   : > { %5947 = vmatpush3.bf16.msra.mxu1 %v5944_v63  ;;  %v3458_v63 = vld [vmem:[#allocation6 + $0xe0] sm:$0xff] }
 0x4df   : > { %3410 = vmatmul.mubr.f32.gmra.mrb[226].mxu0 %v3326_v48  ;;  %3272 = vmatmul.mubr.f32.gmra.mrb[98].mxu1 %v3188_v6  ;;  %v5968_v32 = vpack.c.bf16 %v3459_v60, %v3458_v63  ;;  %v3711_v48 = vld [vmem:[#allocation7 + $0x40] sm:$0xff]  ;;  %v3844_v6 = vld [vmem:[#allocation7 + $0x98] sm:$0xff] }
 0x4e0   : > { %6015 = vmatpush3.bf16.msra.mxu0 %v7343_v29  ;;  %3414 = vmatprep.mubr.f32.mxu0 %v3329_v26  ;;  %v3846_v26 = vld [vmem:[#allocation7 + $0xa8] sm:$0xff] }
 0x4e1   : > { %6017 = vmatprep.subr.bf16.mxu0 %v7387_v37  ;;  %3276 = vmatprep.mubr.f32.mxu1 %v3191_v51  ;;  %v3848_v51 = vld [vmem:[#allocation7 + $0xb8] sm:$0xff] }
 0x4e2   : > { %5949 = vmatprep.subr.bf16.mxu1 %v5948_v58 }
 0x4e3   : > { %3415 = vmatmul.mubr.f32.gmra.mrb[228].mxu0 %v3328_v1  ;;  %3277 = vmatmul.mubr.f32.gmra.mrb[100].mxu1 %v3190_v16  ;;  %v3852_v1 = vld [vmem:[#allocation7 + $0xd8] sm:$0xff]  ;;  %v3854_v16 = vld [vmem:[#allocation7 + $0xe8] sm:$0xff] }
 0x4e4   : > { %6019 = vmatpush3.bf16.msra.mxu0 %v7347_v13  ;;  %3419 = vmatprep.mubr.f32.mxu0 %v3331_v61  ;;  %v3460_v61 = vld [vmem:[#allocation6 + $0xf0] sm:$0xff] }
 0x4e5   : > { %6021 = vmatprep.subr.bf16.mxu0 %v7395_v12  ;;  %3281 = vmatprep.mubr.f32.mxu1 %v3193_v8  ;;  %v3461_v8 = vld [vmem:[#allocation6 + $0xf8] sm:$0xff] }
 0x4e6   : > { %5951 = vmatpush3.bf16.msra.mxu1 %v5948_v58  ;;  %v3850_v58 = vld [vmem:[#allocation7 + $0xc8] sm:$0xff]  ;;  %v5972_v52 = vpack.c.bf16 %v3461_v8, %v3460_v61 }
 0x4e7   : > { %3420 = vmatmul.mubr.f32.gmra.mrb[230].mxu0 %v3330_v0  ;;  %3282 = vmatmul.mubr.f32.gmra.mrb[102].mxu1 %v3192_v24  ;;  %v3856_v0 = vld [vmem:[#allocation7 + $0xf8] sm:$0xff]  ;;  %v3307_v24 = vld [vmem:[#allocation6] sm:$0xff] }
 0x4e8   : > { %6023 = vmatpush3.bf16.msra.mxu0 %v7351_v19  ;;  %3424 = vmatprep.mubr.f32.mxu0 %v3333_v2  ;;  %v3308_v2 = vld [vmem:[#allocation6 + $0x8] sm:$0xff] }
 0x4e9   : > { %6025 = vmatprep.subr.bf16.mxu0 %v7403_v35  ;;  %3286 = vmatprep.mubr.f32.mxu1 %v3195_v14  ;;  %v3855_v14 = vld [vmem:[#allocation7 + $0xf0] sm:$0xff] }
 0x4ea   : > { %5953 = vmatprep.subr.bf16.mxu1 %v5952_v33 }
 0x4eb   : > { %3425 = vmatmul.mubr.f32.gmra.mrb[232].mxu0 %v3332_v11  ;;  %3287 = vmatmul.mubr.f32.gmra.mrb[104].mxu1 %v3194_v18  ;;  %v3963_v11 = vld [vmem:[#allocation9 + $0x80] sm:$0xff]  ;;  %v3964_v18 = vld [vmem:[#allocation9 + $0x88] sm:$0xff] }
 0x4ec   : > { %6027 = vmatpush3.bf16.msra.mxu0 %v7355_v38  ;;  %3429 = vmatprep.mubr.f32.mxu0 %v3335_v20  ;;  %v6072_v20 = vpack.c.bf16 %v3964_v18, %v3963_v11 }
 0x4ed   : > { %6029 = vmatprep.subr.bf16.mxu0 %v7411_v47  ;;  %3291 = vmatprep.mubr.f32.mxu1 %v3197_v23  ;;  %v3965_v23 = vld [vmem:[#allocation9 + $0x90] sm:$0xff] }
 0x4ee   : > { %5955 = vmatpush3.bf16.msra.mxu1 %v5952_v33  ;;  %v7465_v33 = vpack.c.bf16 %v3308_v2, %v3307_v24  ;;  %v6076_v28 = vpack.c.bf16 %v3966_v27, %v3965_v23  ;;  %v3318_v23 = vld [vmem:[#allocation6 + $0x58] sm:$0xff] }
 0x4ef   : > { %3430 = vmatmul.mubr.f32.gmra.mrb[234].mxu0 %v3334_v30  ;;  %3292 = vmatmul.mubr.f32.gmra.mrb[106].mxu1 %v3196_v43  ;;  %v3967_v30 = vld [vmem:[#allocation9 + $0xa0] sm:$0xff]  ;;  %v3968_v43 = vld [vmem:[#allocation9 + $0xa8] sm:$0xff] }
 0x4f0   : > { %6031 = vmatpush3.bf16.msra.mxu0 %v7359_v50  ;;  %3434 = vmatprep.mubr.f32.mxu0 %v3337_v41  ;;  %v6080_v41 = vpack.c.bf16 %v3968_v43, %v3967_v30 }
 0x4f1   : > { %6033 = vmatprep.subr.bf16.mxu0 %v7419_v10  ;;  %3296 = vmatprep.mubr.f32.mxu1 %v3199_v42  ;;  %v3969_v42 = vld [vmem:[#allocation9 + $0xb0] sm:$0xff] }
 0x4f2   : > { %5957 = vmatprep.subr.bf16.mxu1 %v5956_v46 }
 0x4f3   : > { %3435 = vmatmul.mubr.f32.gmra.mrb[236].mxu0 %v3336_v49  ;;  %3297 = vmatmul.mubr.f32.gmra.mrb[108].mxu1 %v3198_v57  ;;  %v3971_v57 = vld [vmem:[#allocation9 + $0xc0] sm:$0xff] }
 0x4f4   : > { %6035 = vmatpush3.bf16.msra.mxu0 %v7363_v21  ;;  %3439 = vmatprep.mubr.f32.mxu0 %v3339_v54  ;;  %v3972_v54 = vld [vmem:[#allocation9 + $0xc8] sm:$0xff] }
 0x4f5   : > { %6037 = vmatprep.subr.bf16.mxu0 %v7427_v22  ;;  %3301 = vmatprep.mubr.f32.mxu1 %v3201_v55  ;;  %v6088_v55 = vpack.c.bf16 %v3972_v54, %v3971_v57  ;;  %v3320_v57 = vld [vmem:[#allocation6 + $0x68] sm:$0xff] }
 0x4f6   : > { %5959 = vmatpush3.bf16.msra.mxu1 %v5956_v46  ;;  %v3970_v46 = vld [vmem:[#allocation9 + $0xb8] sm:$0xff] }
 0x4f7   : > { %3440 = vmatmul.mubr.f32.gmra.mrb[238].mxu0 %v3338_v56  ;;  %3302 = vmatmul.mubr.f32.gmra.mrb[110].mxu1 %v3200_v59  ;;  %v6084_v49 = vpack.c.bf16 %v3970_v46, %v3969_v42  ;;  %v6092_v56 = vpack.c.bf16 %v3974_v3, %v3973_v31  ;;  %v3975_v59 = vld [vmem:[#allocation9 + $0xe0] sm:$0xff] }
 0x4f8   : > { %6039 = vmatpush3.bf16.msra.mxu0 %v7367_v45  ;;  %3783 = vmatprep.mubr.f32.mxu0 %v3704_v40  ;;  %v6096_v62 = vpack.c.bf16 %v3976_v34, %v3975_v59  ;;  %v3977_v40 = vld [vmem:[#allocation9 + $0xf0] sm:$0xff] }
 0x4f9   : > { %6041 = vmatprep.subr.bf16.mxu0 %v7371_v4  ;;  %5961 = vmatprep.subr.bf16.mxu1 %v5960_v7  ;;  %v3707_v4 = vld [vmem:[#allocation7 + $0x20] sm:$0xff] }
 0x4fa   : > { %5963 = vmatpush3.bf16.msra.mxu1 %v5960_v7  ;;  %v3978_v7 = vld [vmem:[#allocation9 + $0xf8] sm:$0xff] }
 0x4fb   : > { %3784 = vmatmul.mubr.f32.vlgmr.msra.gmra.mrb[240].mxu0 %v3703_v36  ;;  %5965 = vmatprep.subr.bf16.mxu1 %v5964_v25 }
 0x4fc   : > { %6043 = vmatpush3.bf16.msra.mxu0 %v7339_v15  ;;  %3788 = vmatprep.mubr.f32.mxu0 %v3706_v44  ;;  %v3709_v15 = vld [vmem:[#allocation7 + $0x30] sm:$0xff] }
 0x4fd   : > { %6045 = vmatprep.subr.bf16.mxu0 %v7379_v39  ;;  %v3712_v39 = vld [vmem:[#allocation7 + $0x48] sm:$0xff] }
 0x4fe   : > { %5967 = vmatpush3.bf16.msra.mxu1 %v5964_v25  ;;  %v6100_v25 = vpack.c.bf16 %v3978_v7, %v3977_v40  ;;  %v3322_v40 = vld [vmem:[#allocation6 + $0x78] sm:$0xff] }
 0x4ff   : > { %3789 = vmatmul.mubr.f32.gmra.mrb[242].mxu0 %v3705_v53  ;;  %5969 = vmatprep.subr.bf16.mxu1 %v5968_v32 }
 0x500   : > { %6047 = vmatpush3.bf16.msra.mxu0 %v7343_v29  ;;  %3793 = vmatprep.mubr.f32.mxu0 %v3708_v17  ;;  %v3714_v29 = vld [vmem:[#allocation7 + $0x58] sm:$0xff]  ;;  %v3309_v17 = vld [vmem:[#allocation6 + $0x10] sm:$0xff] }
 0x501   : > { %6049 = vmatprep.subr.bf16.mxu0 %v7387_v37  ;;  %v3713_v37 = vld [vmem:[#allocation7 + $0x50] sm:$0xff] }
 0x502   : > { %5971 = vmatpush3.bf16.msra.mxu1 %v5968_v32 }
 0x503   : > { %3794 = vmatmul.mubr.f32.gmra.mrb[244].mxu0 %v3707_v4  ;;  %5973 = vmatprep.subr.bf16.mxu1 %v5972_v52  ;;  %v3310_v4 = vld [vmem:[#allocation6 + $0x18] sm:$0xff] }
 0x504   : > { %6051 = vmatpush3.bf16.msra.mxu0 %v7347_v13  ;;  %3798 = vmatprep.mubr.f32.mxu0 %v3710_v5  ;;  %v3716_v13 = vld [vmem:[#allocation7 + $0x68] sm:$0xff] }
 0x505   : > { %6053 = vmatprep.subr.bf16.mxu0 %v7395_v12  ;;  %v3715_v12 = vld [vmem:[#allocation7 + $0x60] sm:$0xff] }
 0x506   : > { %5975 = vmatpush3.bf16.msra.mxu1 %v5972_v52  ;;  %v3316_v52 = vld [vmem:[#allocation6 + $0x48] sm:$0xff] }
 0x507   : > { %3799 = vmatmul.mubr.f32.gmra.mrb[246].mxu0 %v3709_v15  ;;  %5977 = vmatprep.subr.bf16.mxu1 %v7465_v33 }
 0x508   : > { %6055 = vmatpush3.bf16.msra.mxu0 %v7351_v19  ;;  %3803 = vmatprep.mubr.f32.mxu0 %v3712_v39  ;;  %v3718_v19 = vld [vmem:[#allocation7 + $0x78] sm:$0xff] }
 0x509   : > { %6057 = vmatprep.subr.bf16.mxu0 %v7403_v35  ;;  %v3717_v35 = vld [vmem:[#allocation7 + $0x70] sm:$0xff] }
 0x50b   : > { %3804 = vmatmul.mubr.f32.gmra.mrb[248].mxu0 %v3711_v48 }
 0x50c   : > { %6059 = vmatpush3.bf16.msra.mxu0 %v7355_v38  ;;  %3808 = vmatprep.mubr.f32.mxu0 %v3714_v29  ;;  %v3842_v38 = vld [vmem:[#allocation7 + $0x88] sm:$0xff] }
 0x50d   : > { %6061 = vmatprep.subr.bf16.mxu0 %v7411_v47  ;;  %v3841_v47 = vld [vmem:[#allocation7 + $0x80] sm:$0xff] }
 0x50f   : > { %3809 = vmatmul.mubr.f32.gmra.mrb[250].mxu0 %v3713_v37  ;;  %v5980_v37 = vpack.c.bf16 %v3310_v4, %v3309_v17  ;;  %v3824_v17 = vld [vmem:[#allocation9] sm:$0xff]  ;;  %v3825_v4 = vld [vmem:[#allocation9 + $0x8] sm:$0xff] }
 0x510   : > { %6063 = vmatpush3.bf16.msra.mxu0 %v7359_v50  ;;  %3813 = vmatprep.mubr.f32.mxu0 %v3716_v13  ;;  %v3843_v50 = vld [vmem:[#allocation7 + $0x90] sm:$0xff] }
 0x511   : > { %6065 = vmatprep.subr.bf16.mxu0 %v7419_v10  ;;  %v3845_v10 = vld [vmem:[#allocation7 + $0xa0] sm:$0xff] }
 0x513   : > { %3814 = vmatmul.mubr.f32.gmra.mrb[252].mxu0 %v3715_v12  ;;  %v3311_v12 = vld [vmem:[#allocation6 + $0x20] sm:$0xff] }
 0x514   : > { %6067 = vmatpush3.bf16.msra.mxu0 %v7363_v21  ;;  %3818 = vmatprep.mubr.f32.mxu0 %v3718_v19  ;;  %v3847_v21 = vld [vmem:[#allocation7 + $0xb0] sm:$0xff]  ;;  %v3312_v19 = vld [vmem:[#allocation6 + $0x28] sm:$0xff] }
 0x515   : > { %6069 = vmatprep.subr.bf16.mxu0 %v7427_v22  ;;  %v3849_v22 = vld [vmem:[#allocation7 + $0xc0] sm:$0xff] }
 0x517   : > { %3819 = vmatmul.mubr.f32.gmra.mrb[254].mxu0 %v3717_v35 }
 0x518   : > { %6071 = vmatpush3.bf16.msra.mxu0 %v7367_v45  ;;  %3921 = vmatprep.mubr.f32.mxu0 %v3842_v38  ;;  %v3851_v45 = vld [vmem:[#allocation7 + $0xd0] sm:$0xff] }
 0x519   : > { %6073 = vmatprep.subr.bf16.mxu0 %v6072_v20 }
 0x51b   : > { %3922 = vmatmul.mubr.f32.vlgmr.msra.gmra.mrb[0].mxu0 %v3841_v47 }
 0x51c   : > { %3926 = vmatprep.mubr.f32.mxu0 %v3844_v6  ;;  %6075 = vmatpush3.bf16.msra.mxu0 %v6072_v20  ;;  %v3317_v20 = vld [vmem:[#allocation6 + $0x50] sm:$0xff] }
 0x51d   : > { %6077 = vmatprep.subr.bf16.mxu0 %v6076_v28 }
 0x51f   : > { %3927 = vmatmul.mubr.f32.gmra.mrb[2].mxu0 %v3843_v50  ;;  %v5984_v50 = vpack.c.bf16 %v3312_v19, %v3311_v12 }
 0x520   : > { %3931 = vmatprep.mubr.f32.mxu0 %v3846_v26  ;;  %6079 = vmatpush3.bf16.msra.mxu0 %v6076_v28 }
 0x521   : > { %6081 = vmatprep.subr.bf16.mxu0 %v6080_v41 }
 0x523   : > { %3932 = vmatmul.mubr.f32.gmra.mrb[4].mxu0 %v3845_v10 }
 0x524   : > { %3936 = vmatprep.mubr.f32.mxu0 %v3848_v51  ;;  %6083 = vmatpush3.bf16.msra.mxu0 %v6080_v41  ;;  %v3313_v51 = vld [vmem:[#allocation6 + $0x30] sm:$0xff]  ;;  %v5996_v41 = vpack.c.bf16 %v3318_v23, %v3317_v20  ;;  %v3837_v20 = vld [vmem:[#allocation9 + $0x68] sm:$0xff] }
 0x525   : > { %6085 = vmatprep.subr.bf16.mxu0 %v6084_v49 }
 0x527   : > { %3937 = vmatmul.mubr.f32.gmra.mrb[6].mxu0 %v3847_v21  ;;  %v3314_v21 = vld [vmem:[#allocation6 + $0x38] sm:$0xff] }
 0x528   : > { %3941 = vmatprep.mubr.f32.mxu0 %v3850_v58  ;;  %6087 = vmatpush3.bf16.msra.mxu0 %v6084_v49  ;;  %v3319_v49 = vld [vmem:[#allocation6 + $0x60] sm:$0xff] }
 0x529   : > { %6089 = vmatprep.subr.bf16.mxu0 %v6088_v55  ;;  %v6000_v59 = vpack.c.bf16 %v3320_v57, %v3319_v49 }
 0x52b   : > { %3942 = vmatmul.mubr.f32.gmra.mrb[8].mxu0 %v3849_v22 }
 0x52c   : > { %3946 = vmatprep.mubr.f32.mxu0 %v3852_v1  ;;  %6091 = vmatpush3.bf16.msra.mxu0 %v6088_v55 }
 0x52d   : > { %6093 = vmatprep.subr.bf16.mxu0 %v6092_v56 }
 0x52f   : > { %3947 = vmatmul.mubr.f32.gmra.mrb[10].mxu0 %v3851_v45 }
 0x530   : > { %3951 = vmatprep.mubr.f32.mxu0 %v3854_v16  ;;  %6095 = vmatpush3.bf16.msra.mxu0 %v6092_v56  ;;  %v5988_v16 = vpack.c.bf16 %v3314_v21, %v3313_v51  ;;  %v3830_v21 = vld [vmem:[#allocation9 + $0x30] sm:$0xff] }
 0x531   : > { %6097 = vmatprep.subr.bf16.mxu0 %v6096_v62 }
 0x533   : > { %3952 = vmatmul.mubr.f32.gmra.mrb[12].mxu0 %v3853_v9  ;;  %v3315_v9 = vld [vmem:[#allocation6 + $0x40] sm:$0xff] }
 0x534   : > { %3956 = vmatprep.mubr.f32.mxu0 %v3856_v0  ;;  %6099 = vmatpush3.bf16.msra.mxu0 %v6096_v62  ;;  %v3321_v62 = vld [vmem:[#allocation6 + $0x70] sm:$0xff] }
 0x535   : > { %6101 = vmatprep.subr.bf16.mxu0 %v6100_v25 }
 0x537   : > { %3957 = vmatmul.mubr.f32.gmra.mrb[14].mxu0 %v3855_v14 }
 0x538   : > { %6103 = vmatpush3.bf16.msra.mxu0 %v6100_v25 }
 0x5ae   : > { %v4782_v36 = vpop.f32.mrb[224].mxu0  ;;  %v4726_v63 = vpop.f32.mrb[96].mxu1 }
 0x5af   : > { %v4783_v60 = vpop.f32.mrb[225].mxu0  ;;  %v4727_v44 = vpop.f32.mrb[97].mxu1 }
 0x5b0   : > { %v4784_v32 = vadd.f32 %v4783_v60, %v4782_v36  ;;  %v7468_v53 = vadd.f32 %v4727_v44, %v4726_v63  ;;  %v6004_v44 = vpack.c.bf16 %v3322_v40, %v3321_v62 }
 0x5b2   : > { %v4785_v5 = vpop.f32.mrb[226].mxu0  ;;  %5416 = vmatprep.mubr.f32.mxu1 %v4784_v32  ;;  %v4729_v15 = vpop.f32.mrb[98].mxu1 }
 0x5b3   : > { %v4786_v39 = vpop.f32.mrb[227].mxu0  ;;  %v4730_v48 = vpop.f32.mrb[99].mxu1 }
 0x5b4   : > { %v4787_v29 = vadd.f32 %v4786_v39, %v4785_v5  ;;  %v7470_v13 = vadd.f32 %v4730_v48, %v4729_v15  ;;  %v6104_v39 = vpack.c.bf16 %v3825_v4, %v3824_v17 }
 0x5b6   : > { %5417 = vmatmul.mubr.f32.vlgmr.msra.gmra.mrb[112].mxu1 %v4787_v29  ;;  %v4788_v35 = vpop.f32.mrb[228].mxu0  ;;  %v4732_v38 = vpop.f32.mrb[100].mxu1  ;;  %v3826_v29 = vld [vmem:[#allocation9 + $0x10] sm:$0xff] }
 0x5b7   : > { %5979 = vmatpush3.bf16.msra.mxu1 %v7465_v33  ;;  %v4789_v47 = vpop.f32.mrb[229].mxu0  ;;  %v4733_v6 = vpop.f32.mrb[101].mxu1  ;;  %v5992_v33 = vpack.c.bf16 %v3316_v52, %v3315_v9 }
 0x5b8   : > { %5981 = vmatprep.subr.bf16.mxu1 %v5980_v37  ;;  %v4790_v26 = vadd.f32 %v4789_v47, %v4788_v35  ;;  %v7473_v10 = vadd.f32 %v4733_v6, %v4732_v38  ;;  %v3828_v47 = vld [vmem:[#allocation9 + $0x20] sm:$0xff]  ;;  %v3829_v6 = vld [vmem:[#allocation9 + $0x28] sm:$0xff] }
 0x5ba   : > { %v4791_v58 = vpop.f32.mrb[230].mxu0  ;;  %5419 = vmatprep.mubr.f32.mxu1 %v4790_v26  ;;  %v4735_v22 = vpop.f32.mrb[102].mxu1  ;;  %v6112_v26 = vpack.c.bf16 %v3829_v6, %v3828_v47 }
 0x5bb   : > { %5983 = vmatpush3.bf16.msra.mxu1 %v5980_v37  ;;  %v4792_v1 = vpop.f32.mrb[231].mxu0  ;;  %v4736_v45 = vpop.f32.mrb[103].mxu1  ;;  %v3827_v37 = vld [vmem:[#allocation9 + $0x18] sm:$0xff] }
 0x5bc   : > { %5985 = vmatprep.subr.bf16.mxu1 %v5984_v50  ;;  %v4793_v61 = vadd.f32 %v4792_v1, %v4791_v58  ;;  %v7475_v8 = vadd.f32 %v4736_v45, %v4735_v22  ;;  %v6108_v35 = vpack.c.bf16 %v3827_v37, %v3826_v29  ;;  %v3831_v58 = vld [vmem:[#allocation9 + $0x38] sm:$0xff] }
 0x5bd   : > { %v6116_v45 = vpack.c.bf16 %v3831_v58, %v3830_v21 }
 0x5be   : > { %v4794_v0 = vpop.f32.mrb[232].mxu0  ;;  %5420 = vmatmul.mubr.f32.gmra.mrb[114].mxu1 %v4793_v61  ;;  %v4738_v24 = vpop.f32.mrb[104].mxu1  ;;  %v3833_v61 = vld [vmem:[#allocation9 + $0x48] sm:$0xff] }
 0x5bf   : > { %5987 = vmatpush3.bf16.msra.mxu1 %v5984_v50  ;;  %v4795_v2 = vpop.f32.mrb[233].mxu0  ;;  %v4739_v14 = vpop.f32.mrb[105].mxu1 }
 0x5c0   : > { %5989 = vmatprep.subr.bf16.mxu1 %v5988_v16  ;;  %v4796_v11 = vadd.f32 %v4795_v2, %v4794_v0  ;;  %v7477_v18 = vadd.f32 %v4739_v14, %v4738_v24  ;;  %v3835_v24 = vld [vmem:[#allocation9 + $0x58] sm:$0xff] }
 0x5c2   : > { %v4797_v27 = vpop.f32.mrb[234].mxu0  ;;  %5422 = vmatprep.mubr.f32.mxu1 %v4796_v11  ;;  %v4741_v28 = vpop.f32.mrb[106].mxu1 }
 0x5c3   : > { %5991 = vmatpush3.bf16.msra.mxu1 %v5988_v16  ;;  %v4798_v30 = vpop.f32.mrb[235].mxu0  ;;  %v4742_v43 = vpop.f32.mrb[107].mxu1  ;;  %v3832_v16 = vld [vmem:[#allocation9 + $0x40] sm:$0xff] }
 0x5c4   : > { %5993 = vmatprep.subr.bf16.mxu1 %v5992_v33  ;;  %v4799_v42 = vadd.f32 %v4798_v30, %v4797_v27  ;;  %v7479_v46 = vadd.f32 %v4742_v43, %v4741_v28  ;;  %v6120_v52 = vpack.c.bf16 %v3833_v61, %v3832_v16  ;;  %v3838_v43 = vld [vmem:[#allocation9 + $0x70] sm:$0xff] }
 0x5c6   : > { %v4800_v54 = vpop.f32.mrb[236].mxu0  ;;  %5423 = vmatmul.mubr.f32.gmra.mrb[116].mxu1 %v4799_v42  ;;  %v4744_v55 = vpop.f32.mrb[108].mxu1 }
 0x5c7   : > { %5995 = vmatpush3.bf16.msra.mxu1 %v5992_v33  ;;  %v4801_v31 = vpop.f32.mrb[237].mxu0  ;;  %v4745_v3 = vpop.f32.mrb[109].mxu1 }
 0x5c8   : > { %5997 = vmatprep.subr.bf16.mxu1 %v5996_v41  ;;  %v4802_v56 = vadd.f32 %v4801_v31, %v4800_v54  ;;  %v4746_v34 = vadd.f32 %v4745_v3, %v4744_v55 }
 0x5ca   : > { %v4803_v7 = vpop.f32.mrb[238].mxu0  ;;  %5425 = vmatprep.mubr.f32.mxu1 %v4802_v56  ;;  %v4747_v25 = vpop.f32.mrb[110].mxu1 }
 0x5cb   : > { %5999 = vmatpush3.bf16.msra.mxu1 %v5996_v41  ;;  %v4804_v36 = vpop.f32.mrb[239].mxu0  ;;  %v4748_v63 = vpop.f32.mrb[111].mxu1  ;;  %v3839_v41 = vld [vmem:[#allocation9 + $0x78] sm:$0xff] }
 0x5cc   : > { %6001 = vmatprep.subr.bf16.mxu1 %v6000_v59  ;;  %v4805_v60 = vadd.f32 %v4804_v36, %v4803_v7  ;;  %v4749_v32 = vadd.f32 %v4748_v63, %v4747_v25  ;;  %v6132_v57 = vpack.c.bf16 %v3839_v41, %v3838_v43 }
 0x5ce   : > { %5426 = vmatmul.mubr.f32.gmra.mrb[118].mxu1 %v4805_v60  ;;  %v4886_v5 = vpop.f32.mrb[240].mxu0 }
 0x5cf   : > { %6003 = vmatpush3.bf16.msra.mxu1 %v6000_v59  ;;  %5460 = vmatprep.mubr.f32.mxu1 %v7468_v53  ;;  %v4887_v15 = vpop.f32.mrb[241].mxu0 }
 0x5d0   : > { %6005 = vmatprep.subr.bf16.mxu1 %v6004_v44  ;;  %v4888_v48 = vadd.f32 %v4887_v15, %v4886_v5 }
 0x5d2   : > { %v4889_v12 = vpop.f32.mrb[242].mxu0 }
 0x5d3   : > { %6007 = vmatpush3.bf16.msra.mxu1 %v6004_v44  ;;  %v4890_v19 = vpop.f32.mrb[243].mxu0 }
 0x5d4   : > { %6105 = vmatprep.subr.bf16.mxu1 %v6104_v39  ;;  %v7482_v38 = vadd.f32 %v4890_v19, %v4889_v12  ;;  %v4462_v12 = vld [vmem:[%s7528_s8] ss:$0 sm:$0xff] }
 0x5d6   : > { %5461 = vmatmul.mubr.f32.vlgmr.msra.gmra.mrb[112].mxu1 %v7470_v13  ;;  %v4892_v50 = vpop.f32.mrb[244].mxu0 }
 0x5d7   : > { %6107 = vmatpush3.bf16.msra.mxu1 %v6104_v39  ;;  %5463 = vmatprep.mubr.f32.mxu1 %v7473_v10  ;;  %v4893_v53 = vpop.f32.mrb[245].mxu0 }
 0x5d8   : > { %6109 = vmatprep.subr.bf16.mxu1 %v6108_v35  ;;  %v4894_v51 = vadd.f32 %v4893_v53, %v4892_v50 }
 0x5da   : > { %5464 = vmatmul.mubr.f32.gmra.mrb[114].mxu1 %v7475_v8  ;;  %v4895_v22 = vpop.f32.mrb[246].mxu0  ;;  %v3834_v8 = vld [vmem:[#allocation9 + $0x50] sm:$0xff] }
 0x5db   : > { %6111 = vmatpush3.bf16.msra.mxu1 %v6108_v35  ;;  %5466 = vmatprep.mubr.f32.mxu1 %v7477_v18  ;;  %v4896_v1 = vpop.f32.mrb[247].mxu0  ;;  %v6124_v33 = vpack.c.bf16 %v3835_v24, %v3834_v8  ;;  %v3836_v18 = vld [vmem:[#allocation9 + $0x60] sm:$0xff] }
 0x5dc   : > { %6113 = vmatprep.subr.bf16.mxu1 %v6112_v26  ;;  %v4897_v13 = vadd.f32 %v4896_v1, %v4895_v22  ;;  %v6128_v30 = vpack.c.bf16 %v3837_v20, %v3836_v18 }
 0x5de   : > { %5467 = vmatmul.mubr.f32.gmra.mrb[116].mxu1 %v7479_v46  ;;  %v4898_v10 = vpop.f32.mrb[248].mxu0 }
 0x5df   : > { %6115 = vmatpush3.bf16.msra.mxu1 %v6112_v26  ;;  %v4899_v9 = vpop.f32.mrb[249].mxu0  ;;  %5469 = vmatprep.mubr.f32.mxu1 %v4746_v34 }
 0x5e0   : > { %6117 = vmatprep.subr.bf16.mxu1 %v6116_v45  ;;  %v4900_v0 = vadd.f32 %v4899_v9, %v4898_v10 }
 0x5e2   : > { %v4901_v2 = vpop.f32.mrb[250].mxu0  ;;  %5470 = vmatmul.mubr.f32.gmra.mrb[118].mxu1 %v4749_v32 }
 0x5e3   : > { %6119 = vmatpush3.bf16.msra.mxu1 %v6116_v45  ;;  %v4902_v14 = vpop.f32.mrb[251].mxu0  ;;  %5548 = vmatprep.mubr.f32.mxu1 %v4888_v48 }
 0x5e4   : > { %6121 = vmatprep.subr.bf16.mxu1 %v6120_v52  ;;  %v4903_v11 = vadd.f32 %v4902_v14, %v4901_v2 }
 0x5e6   : > { %v4904_v23 = vpop.f32.mrb[252].mxu0 }
 0x5e7   : > { %6123 = vmatpush3.bf16.msra.mxu1 %v6120_v52  ;;  %v4905_v27 = vpop.f32.mrb[253].mxu0 }
 0x5e8   : > { %6125 = vmatprep.subr.bf16.mxu1 %v6124_v33  ;;  %v4906_v28 = vadd.f32 %v4905_v27, %v4904_v23 }
 0x5ea   : > { %v4907_v42 = vpop.f32.mrb[254].mxu0 }
 0x5eb   : > { %6127 = vmatpush3.bf16.msra.mxu1 %v6124_v33  ;;  %v4908_v46 = vpop.f32.mrb[255].mxu0 }
 0x5ec   : > { %6129 = vmatprep.subr.bf16.mxu1 %v6128_v30  ;;  %v4909_v49 = vadd.f32 %v4908_v46, %v4907_v42 }
 0x5ee   : > { %v4942_v54 = vpop.f32.mrb[0].mxu0 }
 0x5ef   : > { %6131 = vmatpush3.bf16.msra.mxu1 %v6128_v30  ;;  %v4943_v55 = vpop.f32.mrb[1].mxu0 }
 0x5f0   : > { %v4944_v31 = vadd.f32 %v4943_v55, %v4942_v54  ;;  %6133 = vmatprep.subr.bf16.mxu1 %v6132_v57 }
 0x5f2   : > { %v4945_v3 = vpop.f32.mrb[2].mxu0  ;;  %5504 = vmatprep.mubr.f32.mxu0 %v4944_v31 }
 0x5f3   : > { %v4946_v56 = vpop.f32.mrb[3].mxu0  ;;  %6135 = vmatpush3.bf16.msra.mxu1 %v6132_v57 }
 0x5f4   : > { %v4947_v59 = vadd.f32 %v4946_v56, %v4945_v3 }
 0x5f6   : > { %5505 = vmatmul.mubr.f32.vlgmr.msra.gmra.mrb[16].mxu0 %v4947_v59  ;;  %5549 = vmatmul.mubr.f32.vlgmr.msra.gmra.mrb[120].mxu1 %v7482_v38  ;;  %v4948_v34 = vpop.f32.mrb[4].mxu0 }
 0x5f7   : > { %v4949_v62 = vpop.f32.mrb[5].mxu0  ;;  %5551 = vmatprep.mubr.f32.mxu1 %v4894_v51 }
 0x5f8   : > { %v4950_v40 = vadd.f32 %v4949_v62, %v4948_v34 }
 0x5fa   : > { %v4951_v7 = vpop.f32.mrb[6].mxu0  ;;  %5507 = vmatprep.mubr.f32.mxu0 %v4950_v40  ;;  %5552 = vmatmul.mubr.f32.gmra.mrb[122].mxu1 %v4897_v13 }
 0x5fb   : > { %v4952_v25 = vpop.f32.mrb[7].mxu0  ;;  %5554 = vmatprep.mubr.f32.mxu1 %v4900_v0 }
 0x5fc   : > { %v4953_v36 = vadd.f32 %v4952_v25, %v4951_v7 }
 0x5fe   : > { %5508 = vmatmul.mubr.f32.gmra.mrb[18].mxu0 %v4953_v36  ;;  %v4954_v63 = vpop.f32.mrb[8].mxu0  ;;  %5555 = vmatmul.mubr.f32.gmra.mrb[124].mxu1 %v4903_v11  ;;  %v4463_v11 = vld [vmem:[%s7550_s28] ss:$0 sm:$0xff] }
 0x5ff   : > { %v4955_v60 = vpop.f32.mrb[9].mxu0  ;;  %5557 = vmatprep.mubr.f32.mxu1 %v4906_v28 }
 0x600   : > { %v4956_v44 = vadd.f32 %v4955_v60, %v4954_v63 }
 0x602   : > { %v4957_v32 = vpop.f32.mrb[10].mxu0  ;;  %5510 = vmatprep.mubr.f32.mxu0 %v4956_v44  ;;  %5558 = vmatmul.mubr.f32.gmra.mrb[126].mxu1 %v4909_v49 }
 0x603   : > { %v4958_v17 = vpop.f32.mrb[11].mxu0 }
 0x604   : > { %v4959_v4 = vadd.f32 %v4958_v17, %v4957_v32 }
 0x606   : > { %5511 = vmatmul.mubr.f32.gmra.mrb[20].mxu0 %v4959_v4  ;;  %v4960_v5 = vpop.f32.mrb[12].mxu0 }
 0x607   : > { %v4961_v15 = vpop.f32.mrb[13].mxu0 }
 0x608   : > { %v4962_v39 = vadd.f32 %v4961_v15, %v4960_v5 }
 0x60a   : > { %v4963_v48 = vpop.f32.mrb[14].mxu0  ;;  %5513 = vmatprep.mubr.f32.mxu0 %v4962_v39 }
 0x60b   : > { %v4964_v29 = vpop.f32.mrb[15].mxu0 }
 0x60c   : > { %v4965_v37 = vadd.f32 %v4964_v29, %v4963_v48 }
 0x60e   : > { %5514 = vmatmul.mubr.f32.gmra.mrb[22].mxu0 %v4965_v37 }
 0x6a9   : > { %v5462_v19 = vpop.f32.mrb[112].mxu1 }
 0x6aa   : > { %v3680_v35 = vadd.f32 %v5462_v19, %v4462_v12  ;;  %v3633_v38 = vpop.f32.mrb[113].mxu1 }
 0x6ab   : > { %v3679_v47 = vadd.f32 %v4462_v12, %v3633_v38 }
 0x6ac   : > { %v3688_v6 = vmax.f32 %v3680_v35, 0.0 }
 0x6ad   : > { %v3687_v50 = vmax.f32 %v3679_v47, 0.0  ;;  %v5465_v53 = vpop.f32.mrb[114].mxu1 }
 0x6ae   : > { %3696 = vst [vmem:[%s521_s21 + $0x8] sm:$0xff] %v3688_v6  ;;  %v3682_v26 = vadd.f32 %v5465_v53, %v4462_v12  ;;  %v3643_v51 = vpop.f32.mrb[115].mxu1 }
 0x6af   : > { %3695 = vst [vmem:[%s521_s21] sm:$0xff] %v3687_v50  ;;  %v3681_v21 = vadd.f32 %v4462_v12, %v3643_v51 }
 0x6b0   : > { %v3690_v58 = vmax.f32 %v3682_v26, 0.0 }
 0x6b1   : > { %v3689_v22 = vmax.f32 %v3681_v21, 0.0  ;;  %v5468_v1 = vpop.f32.mrb[116].mxu1 }
 0x6b2   : > { %3698 = vst [vmem:[%s521_s21 + $0x18] sm:$0xff] %v3690_v58  ;;  %v3684_v45 = vadd.f32 %v5468_v1, %v4462_v12  ;;  %v3653_v13 = vpop.f32.mrb[117].mxu1 }
 0x6b3   : > { %3697 = vst [vmem:[%s521_s21 + $0x10] sm:$0xff] %v3689_v22  ;;  %v3683_v16 = vadd.f32 %v4462_v12, %v3653_v13 }
 0x6b4   : > { %v3692_v61 = vmax.f32 %v3684_v45, 0.0 }
 0x6b5   : > { %v3691_v10 = vmax.f32 %v3683_v16, 0.0  ;;  %v5471_v9 = vpop.f32.mrb[118].mxu1 }
 0x6b6   : > { %3700 = vst [vmem:[%s521_s21 + $0x28] sm:$0xff] %v3692_v61  ;;  %v3686_v52 = vadd.f32 %v5471_v9, %v4462_v12  ;;  %v3663_v0 = vpop.f32.mrb[119].mxu1 }
 0x6b7   : > { %3699 = vst [vmem:[%s521_s21 + $0x20] sm:$0xff] %v3691_v10  ;;  %v3685_v8 = vadd.f32 %v4462_v12, %v3663_v0 }
 0x6b8   : > { %v3694_v24 = vmax.f32 %v3686_v52, 0.0 }
 0x6b9   : > { %v3693_v2 = vmax.f32 %v3685_v8, 0.0 }
 0x6ba   : > { %3702 = vst [vmem:[%s521_s21 + $0x38] sm:$0xff] %v3694_v24 }
 0x6bb   : > { %3701 = vst [vmem:[%s521_s21 + $0x30] sm:$0xff] %v3693_v2 }
 0x6c9   : > { %v5506_v14 = vpop.f32.mrb[16].mxu0  ;;  %v5550_v33 = vpop.f32.mrb[120].mxu1 }
 0x6ca   : > { %v4156_v18 = vadd.f32 %v5550_v33, %v5506_v14  ;;  %v4045_v20 = vpop.f32.mrb[17].mxu0  ;;  %v4150_v23 = vpop.f32.mrb[121].mxu1 }
 0x6cb   : > { %v4151_v27 = vadd.f32 %v4150_v23, %v4045_v20 }
 0x6cc   : > { %v4197_v28 = vadd.f32 %v4463_v11, %v4156_v18 }
 0x6cd   : > { %v4196_v30 = vadd.f32 %v4463_v11, %v4151_v27  ;;  %v5553_v43 = vpop.f32.mrb[122].mxu1 }
 0x6ce   : > { %v4205_v41 = vmax.f32 %v4197_v28, 0.0  ;;  %v4160_v42 = vpop.f32.mrb[123].mxu1 }
 0x6cf   : > { %v4204_v46 = vmax.f32 %v4196_v30, 0.0 }
 0x6d0   : > { %4213 = vst [vmem:[%s7507_s29 + $0x8] sm:$0xff] %v4205_v41 }
 0x6d1   : > { %4212 = vst [vmem:[%s7507_s29] sm:$0xff] %v4204_v46  ;;  %v5509_v49 = vpop.f32.mrb[18].mxu0  ;;  %v5556_v57 = vpop.f32.mrb[124].mxu1 }
 0x6d2   : > { %v4166_v54 = vadd.f32 %v5553_v43, %v5509_v49  ;;  %v4055_v55 = vpop.f32.mrb[19].mxu0  ;;  %v4170_v31 = vpop.f32.mrb[125].mxu1 }
 0x6d3   : > { %v4161_v3 = vadd.f32 %v4160_v42, %v4055_v55 }
 0x6d4   : > { %v4199_v56 = vadd.f32 %v4463_v11, %v4166_v54 }
 0x6d5   : > { %v4198_v59 = vadd.f32 %v4463_v11, %v4161_v3  ;;  %v5559_v34 = vpop.f32.mrb[126].mxu1 }
 0x6d6   : > { %v4207_v62 = vmax.f32 %v4199_v56, 0.0  ;;  %v4180_v40 = vpop.f32.mrb[127].mxu1 }
 0x6d7   : > { %v4206_v7 = vmax.f32 %v4198_v59, 0.0 }
 0x6d8   : > { %4215 = vst [vmem:[%s7507_s29 + $0x18] sm:$0xff] %v4207_v62 }
 0x6d9   : > { %4214 = vst [vmem:[%s7507_s29 + $0x10] sm:$0xff] %v4206_v7  ;;  %v5512_v25 = vpop.f32.mrb[20].mxu0 }
 0x6da   : > { %v4176_v36 = vadd.f32 %v5556_v57, %v5512_v25  ;;  %v4065_v63 = vpop.f32.mrb[21].mxu0 }
 0x6db   : > { %v4171_v60 = vadd.f32 %v4170_v31, %v4065_v63 }
 0x6dc   : > { %v4201_v44 = vadd.f32 %v4463_v11, %v4176_v36 }
 0x6dd   : > { %v4200_v32 = vadd.f32 %v4463_v11, %v4171_v60 }
 0x6de   : > { %v4209_v17 = vmax.f32 %v4201_v44, 0.0 }
 0x6df   : > { %v4208_v4 = vmax.f32 %v4200_v32, 0.0 }
 0x6e0   : > { %4217 = vst [vmem:[%s7507_s29 + $0x28] sm:$0xff] %v4209_v17 }
 0x6e1   : > { %4216 = vst [vmem:[%s7507_s29 + $0x20] sm:$0xff] %v4208_v4  ;;  %v5515_v5 = vpop.f32.mrb[22].mxu0 }
 0x6e2   : > { %v4186_v15 = vadd.f32 %v5559_v34, %v5515_v5  ;;  %v4075_v39 = vpop.f32.mrb[23].mxu0 }
 0x6e3   : > { %v4181_v48 = vadd.f32 %v4180_v40, %v4075_v39 }
 0x6e4   : > { %v4203_v29 = vadd.f32 %v4463_v11, %v4186_v15 }
 0x6e5   : > { %v4202_v37 = vadd.f32 %v4463_v11, %v4181_v48 }
 0x6e6   : > { %v4211_v12 = vmax.f32 %v4203_v29, 0.0 }
 0x6e7   : > { %v4210_v19 = vmax.f32 %v4202_v37, 0.0 }
 0x6e8   : > { %4219 = vst [vmem:[%s7507_s29 + $0x38] sm:$0xff] %v4211_v12 }
 0x6e9   : > { %4218 = vst [vmem:[%s7507_s29 + $0x30] sm:$0xff] %v4210_v19 }
 0x6ea PF: > { %s7552_s26 = sld [smem:[#allocation13_spill]] }
 0x6f0   : > { %s27_s25 = sadd.s32 1, %s7552_s26  }
 0x6f1   : > { %p24_p6 = scmp.ge.s32.totalorder %s27_s25, 4  }
 0x6f3   :  { %26 = sbr.rel (!%p24_p6) target bundleno = 6 (0x6), region = 141 }
 0x6fa   :  { %4257 = vsyncpa [#allocation3], 1 }
 0x6fb   :  { %4259 = vsyncpa [#allocation3 + $0x1], 1 }
 0x6fc   :  { %4260 = vsyncpa [#allocation5], 1 }
 0x6fd   :  { %4261 = vsyncpa [#allocation8], 1 }

</bundles_post_ra>
